<compile_context>
chip_gen: v7x
topology: tpu7x:2x2x1
jax: 0.10.0
libtpu: 0.0.40
codegen_flags: <defaults>
</compile_context>

<pallas_src>
import jax
import jax.numpy as jnp
from jax import lax
from jax.experimental import pallas as pl
from jax.experimental.pallas import tpu as pltpu

K = 7        # kernel_size
PAD = 3      # padding (kernel_size==7 -> padding 3)


def _largest_divisor_leq(n, cap):
    best = 1
    for d in range(1, n + 1):
        if n % d == 0 and d <= cap:
            best = d
    return best


def _choose_tiles(N, C, HW, itemsize):
    """Pick (batch block Nb, channel block Ct) against a ~32 MiB VMEM budget.

    Rough per-step VMEM model:
      2 * Nb*Ct*HW*itemsize      double-buffered x block
      + ~26 * Nb*HW*4            sum/max scratch + 14 pre-masked f32 planes,
                                 4 accumulators, shift temporaries
    Conservative so it also fits v7x (64 MiB physical / 32 MiB scoped) and
    v5e's small default scoped limit.
    """
    nb = _largest_divisor_leq(N, max(1, (12 << 20) // (26 * 4 * HW)))
    cap = max(1, min(128, (4 << 20) // (nb * HW * itemsize)))
    if C <= cap:
        ct = C
    else:
        # prefer a multiple-of-8 divisor (sublane-friendly channel block)
        mult8 = [d for d in range(8, cap + 1, 8) if C % d == 0]
        ct = mult8[-1] if mult8 else _largest_divisor_leq(C, cap)
    return nb, ct


def spatial_attention(x, weight):
    """x: (N, C, H, W); weight: (1, 2, K, K) -> sigmoid attention map (N,1,H,W)."""
    N, C, H, W = x.shape
    HW = H * W
    nb, ct = _choose_tiles(N, C, HW, x.dtype.itemsize)
    n_cb = C // ct
    w_flat = weight.reshape(-1).astype(jnp.float32)   # layout [ci, kh, kw]
    pow2_w = (W & (W - 1)) == 0

    def kernel(w_ref, x_ref, o_ref, sum_ref, max_ref):
        # w_ref:   SMEM f32[2*K*K]     flattened conv weight
        # x_ref:   VMEM (nb, ct, HW)   one channel tile of nb batch elements
        # o_ref:   VMEM (nb, 1, HW)    attention map (flattened spatial)
        # sum/max: VMEM (nb, HW) f32   channel-reduction accumulators
        cb = pl.program_id(1)

        # ---- fused channel sum + max: single pass over this x tile ----
        x0 = x_ref[:, 0, :].astype(jnp.float32)
        s, m = x0, x0
        for c in range(1, ct):
            xc = x_ref[:, c, :].astype(jnp.float32)
            s = s + xc
            m = jnp.maximum(m, xc)

        @pl.when(cb == 0)
        def _init():
            sum_ref[...] = jnp.zeros_like(sum_ref)
            max_ref[...] = jnp.full_like(max_ref, -jnp.inf)

        sum_ref[...] = sum_ref[...] + s
        max_ref[...] = jnp.maximum(max_ref[...], m)

        # ---- last channel step: 7x7 conv over (avg, max) planes + sigmoid ----
        @pl.when(cb == n_cb - 1)
        def _finalize():
            avg = sum_ref[...] * (1.0 / C)
            planes = (avg, max_ref[...])

            # column index of each flattened pixel (stops taps from leaking
            # across a row's W boundary).
            lane = lax.broadcasted_iota(jnp.int32, (nb, HW), 1)
            col = (lane & (W - 1)) if pow2_w else (lane % W)

            # Hoisted out of the 98-tap loop: one pre-masked copy per
            # (plane, kw); zero the source columns that a shift by dw would
            # wrap across a row boundary.  14 copies total.
            pre = []
            for p in planes:
                row = []
                for kw in range(K):
                    dw = kw - PAD
                    if dw > 0:
                        q = jnp.where(col >= dw, p, 0.0)
                    elif dw < 0:
                        q = jnp.where(col < W + dw, p, 0.0)
                    else:
                        q = p
                    row.append(q)
                pre.append(row)

            # 98-tap unrolled conv: per tap one zero-filled lane shift of the
            # pre-masked plane + multiply-accumulate.  Four independent
            # accumulators expose ILP across the VALU slots.
            accs = [jnp.zeros((nb, HW), jnp.float32) for _ in range(4)]
            t = 0
            for ci in range(2):
                for kh in range(K):
                    dh = kh - PAD
                    for kw in range(K):
                        dw = kw - PAD
                        d = dh * W + dw
                        p = pre[ci][kw]
                        if abs(d) >= HW:
                            sh = jnp.zeros((nb, HW), jnp.float32)
                        elif d == 0:
                            sh = p
                        elif d > 0:
                            sh = jnp.concatenate(
                                [p[:, d:], jnp.zeros((nb, d), jnp.float32)],
                                axis=1)
                        else:
                            sh = jnp.concatenate(
                                [jnp.zeros((nb, -d), jnp.float32),
                                 p[:, :HW + d]], axis=1)
                        wgt = w_ref[ci * K * K + kh * K + kw]
                        accs[t % 4] = accs[t % 4] + wgt * sh
                        t += 1
            acc = (accs[0] + accs[1]) + (accs[2] + accs[3])
            o_ref[:, 0, :] = jax.nn.sigmoid(acc).astype(o_ref.dtype)

    out = pl.pallas_call(
        kernel,
        out_shape=jax.ShapeDtypeStruct((N, 1, HW), x.dtype),
        grid=(N // nb, n_cb),
        in_specs=[
            pl.BlockSpec(memory_space=pltpu.MemorySpace.SMEM),      # weights
            pl.BlockSpec((nb, ct, HW), lambda g, cb: (g, cb, 0)),   # x tile
        ],
        out_specs=pl.BlockSpec((nb, 1, HW), lambda g, cb: (g, 0, 0)),
        scratch_shapes=[pltpu.VMEM((nb, HW), jnp.float32),
                        pltpu.VMEM((nb, HW), jnp.float32)],
        compiler_params=pltpu.CompilerParams(
            dimension_semantics=("parallel", "arbitrary"),
            vmem_limit_bytes=32 * 1024 * 1024),
    )(w_flat, x.reshape(N, C, HW))
    # TODO(synk): add an H-tiled path (3-row halo) for very large spatial planes.
    return out.reshape(N, 1, H, W)


def _reference(x, weight):
    avg = jnp.mean(x, axis=1, keepdims=True)
    mx = jnp.max(x, axis=1, keepdims=True)
    cat = jnp.concatenate([avg, mx], axis=1)
    y = lax.conv_general_dilated(
        cat, weight,
        window_strides=(1, 1),
        padding=((PAD, PAD), (PAD, PAD)),
        dimension_numbers=("NCHW", "OIHW", "NCHW"),
        precision=lax.Precision.HIGHEST)
    return jax.nn.sigmoid(y)


if __name__ == "__main__":
    key = jax.random.PRNGKey(0)
    kx, kw = jax.random.split(key)

    N, C, H, W = 2, 4, 16, 16
    x = jax.random.normal(kx, (N, C, H, W), dtype=jnp.float32)

    # nn.Conv2d(2, 1, 7, bias=False) default init: U(-1/sqrt(fan_in), 1/sqrt(fan_in))
    fan_in = 2 * K * K
    bound = 1.0 / (fan_in ** 0.5)
    weight = jax.random.uniform(kw, (1, 2, K, K), dtype=jnp.float32,
                                minval=-bound, maxval=bound)

    out = spatial_attention(x, weight)
    out = jax.block_until_ready(out)

    ref = _reference(x, weight)
    assert out.shape == (N, 1, H, W)
    err = float(jnp.max(jnp.abs(out - ref)))
    assert err < 1e-5, f"max abs err {err}"

    print("KERNEL_OK")
</pallas_src>

<mosaic_0001>
module attributes {stable_mosaic.version = 11 : i64} {
  func.func @kernel(%arg0: i32, %arg1: i32, %arg2: memref<98xf32, #tpu.memory_space<smem>>, %arg3: memref<2x4x256xf32, #tpu.memory_space<vmem>>, %arg4: memref<2x1x256xf32, #tpu.memory_space<vmem>>, %arg5: memref<2x256xf32, #tpu.memory_space<vmem>>, %arg6: memref<2x256xf32, #tpu.memory_space<vmem>>) attributes {dimension_semantics = [#tpu.dimension_semantics<parallel>, #tpu.dimension_semantics<arbitrary>], iteration_bounds = array<i64: 1, 1>, scalar_prefetch = 0 : i64, scratch_operands = 2 : i64, tpu.core_type = #tpu.core_type<tc>, window_params = [{transform_indices = @transform_0, window_bounds = array<i64: 98>}, {transform_indices = @transform_1, window_bounds = array<i64: 2, 4, 256>}, {transform_indices = @transform_2, window_bounds = array<i64: 2, 1, 256>}]} {
    %c0 = arith.constant 0 : index
    %c0_0 = arith.constant 0 : index
    %c0_1 = arith.constant 0 : index
    %0 = vector.load %arg3[%c0, %c0_0, %c0_1] : memref<2x4x256xf32, #tpu.memory_space<vmem>>, vector<2x1x256xf32>
    %1 = vector.shape_cast %0 : vector<2x1x256xf32> to vector<2x256xf32>
    %c0_2 = arith.constant 0 : index
    %c1 = arith.constant 1 : index
    %c0_3 = arith.constant 0 : index
    %2 = vector.load %arg3[%c0_2, %c1, %c0_3] : memref<2x4x256xf32, #tpu.memory_space<vmem>>, vector<2x1x256xf32>
    %3 = vector.shape_cast %2 : vector<2x1x256xf32> to vector<2x256xf32>
    %4 = arith.addf %1, %3 : vector<2x256xf32>
    %5 = arith.maximumf %1, %3 : vector<2x256xf32>
    %c0_4 = arith.constant 0 : index
    %c2 = arith.constant 2 : index
    %c0_5 = arith.constant 0 : index
    %6 = vector.load %arg3[%c0_4, %c2, %c0_5] : memref<2x4x256xf32, #tpu.memory_space<vmem>>, vector<2x1x256xf32>
    %7 = vector.shape_cast %6 : vector<2x1x256xf32> to vector<2x256xf32>
    %8 = arith.addf %4, %7 : vector<2x256xf32>
    %9 = arith.maximumf %5, %7 : vector<2x256xf32>
    %c0_6 = arith.constant 0 : index
    %c3 = arith.constant 3 : index
    %c0_7 = arith.constant 0 : index
    %10 = vector.load %arg3[%c0_6, %c3, %c0_7] : memref<2x4x256xf32, #tpu.memory_space<vmem>>, vector<2x1x256xf32>
    %11 = vector.shape_cast %10 : vector<2x1x256xf32> to vector<2x256xf32>
    %12 = arith.addf %8, %11 : vector<2x256xf32>
    %13 = arith.maximumf %9, %11 : vector<2x256xf32>
    %c0_i32 = arith.constant 0 : i32
    %14 = arith.cmpi eq, %arg1, %c0_i32 : i32
    %15 = arith.extui %14 : i1 to i32
    %c0_i32_8 = arith.constant 0 : i32
    %16 = arith.cmpi ne, %15, %c0_i32_8 : i32
    scf.if %16 {
      %cst = arith.constant 0.000000e+00 : f32
      %26 = vector.broadcast %cst : f32 to vector<2x256xf32>
      %c0_19 = arith.constant 0 : index
      %c0_20 = arith.constant 0 : index
      %27 = vector.load %arg5[%c0_19, %c0_20] : memref<2x256xf32, #tpu.memory_space<vmem>>, vector<2x256xf32>
      tpu.vector_store %arg5[%c0_19, %c0_20], %26 {strides = array<i32>} : memref<2x256xf32, #tpu.memory_space<vmem>>, vector<2x256xf32>,
      %cst_21 = arith.constant 0xFF800000 : f32
      %28 = vector.broadcast %cst_21 : f32 to vector<2x256xf32>
      %c0_22 = arith.constant 0 : index
      %c0_23 = arith.constant 0 : index
      %29 = vector.load %arg6[%c0_22, %c0_23] : memref<2x256xf32, #tpu.memory_space<vmem>>, vector<2x256xf32>
      tpu.vector_store %arg6[%c0_22, %c0_23], %28 {strides = array<i32>} : memref<2x256xf32, #tpu.memory_space<vmem>>, vector<2x256xf32>,
    } else {
    }
    %c0_9 = arith.constant 0 : index
    %c0_10 = arith.constant 0 : index
    %17 = vector.load %arg5[%c0_9, %c0_10] : memref<2x256xf32, #tpu.memory_space<vmem>>, vector<2x256xf32>
    %18 = arith.addf %17, %12 : vector<2x256xf32>
    %c0_11 = arith.constant 0 : index
    %c0_12 = arith.constant 0 : index
    %19 = vector.load %arg5[%c0_11, %c0_12] : memref<2x256xf32, #tpu.memory_space<vmem>>, vector<2x256xf32>
    tpu.vector_store %arg5[%c0_11, %c0_12], %18 {strides = array<i32>} : memref<2x256xf32, #tpu.memory_space<vmem>>, vector<2x256xf32>,
    %c0_13 = arith.constant 0 : index
    %c0_14 = arith.constant 0 : index
    %20 = vector.load %arg6[%c0_13, %c0_14] : memref<2x256xf32, #tpu.memory_space<vmem>>, vector<2x256xf32>
    %21 = arith.maximumf %20, %13 : vector<2x256xf32>
    %c0_15 = arith.constant 0 : index
    %c0_16 = arith.constant 0 : index
    %22 = vector.load %arg6[%c0_15, %c0_16] : memref<2x256xf32, #tpu.memory_space<vmem>>, vector<2x256xf32>
    tpu.vector_store %arg6[%c0_15, %c0_16], %21 {strides = array<i32>} : memref<2x256xf32, #tpu.memory_space<vmem>>, vector<2x256xf32>,
    %c0_i32_17 = arith.constant 0 : i32
    %23 = arith.cmpi eq, %arg1, %c0_i32_17 : i32
    %24 = arith.extui %23 : i1 to i32
    %c0_i32_18 = arith.constant 0 : i32
    %25 = arith.cmpi ne, %24, %c0_i32_18 : i32
    scf.if %25 {
      %c0_19 = arith.constant 0 : index
      %c0_20 = arith.constant 0 : index
      %26 = vector.load %arg5[%c0_19, %c0_20] : memref<2x256xf32, #tpu.memory_space<vmem>>, vector<2x256xf32>
      %cst = arith.constant 2.500000e-01 : f32
      %27 = vector.broadcast %cst : f32 to vector<2x256xf32>
      %28 = arith.mulf %26, %27 : vector<2x256xf32>
      %c0_21 = arith.constant 0 : index
      %c0_22 = arith.constant 0 : index
      %29 = vector.load %arg6[%c0_21, %c0_22] : memref<2x256xf32, #tpu.memory_space<vmem>>, vector<2x256xf32>
      %30 = tpu.iota {dimensions = array<i32: 1>} : vector<2x256xi32>
      %c15_i32 = arith.constant 15 : i32
      %31 = vector.broadcast %c15_i32 : i32 to vector<2x256xi32>
      %32 = arith.andi %30, %31 : vector<2x256xi32>
      %c13_i32 = arith.constant 13 : i32
      %33 = vector.broadcast %c13_i32 : i32 to vector<2x256xi32>
      %34 = arith.cmpi slt, %32, %33 : vector<2x256xi32>
      %cst_23 = arith.constant 0.000000e+00 : f32
      %35 = vector.broadcast %cst_23 : f32 to vector<2x256xf32>
      %36 = arith.select %34, %28, %35 : vector<2x256xi1>, vector<2x256xf32>
      %c14_i32 = arith.constant 14 : i32
      %37 = vector.broadcast %c14_i32 : i32 to vector<2x256xi32>
      %38 = arith.cmpi slt, %32, %37 : vector<2x256xi32>
      %cst_24 = arith.constant 0.000000e+00 : f32
      %39 = vector.broadcast %cst_24 : f32 to vector<2x256xf32>
      %40 = arith.select %38, %28, %39 : vector<2x256xi1>, vector<2x256xf32>
      %c15_i32_25 = arith.constant 15 : i32
      %41 = vector.broadcast %c15_i32_25 : i32 to vector<2x256xi32>
      %42 = arith.cmpi slt, %32, %41 : vector<2x256xi32>
      %cst_26 = arith.constant 0.000000e+00 : f32
      %43 = vector.broadcast %cst_26 : f32 to vector<2x256xf32>
      %44 = arith.select %42, %28, %43 : vector<2x256xi1>, vector<2x256xf32>
      %c1_i32 = arith.constant 1 : i32
      %45 = vector.broadcast %c1_i32 : i32 to vector<2x256xi32>
      %46 = arith.cmpi sge, %32, %45 : vector<2x256xi32>
      %cst_27 = arith.constant 0.000000e+00 : f32
      %47 = vector.broadcast %cst_27 : f32 to vector<2x256xf32>
      %48 = arith.select %46, %28, %47 : vector<2x256xi1>, vector<2x256xf32>
      %c2_i32 = arith.constant 2 : i32
      %49 = vector.broadcast %c2_i32 : i32 to vector<2x256xi32>
      %50 = arith.cmpi sge, %32, %49 : vector<2x256xi32>
      %cst_28 = arith.constant 0.000000e+00 : f32
      %51 = vector.broadcast %cst_28 : f32 to vector<2x256xf32>
      %52 = arith.select %50, %28, %51 : vector<2x256xi1>, vector<2x256xf32>
      %c3_i32 = arith.constant 3 : i32
      %53 = vector.broadcast %c3_i32 : i32 to vector<2x256xi32>
      %54 = arith.cmpi sge, %32, %53 : vector<2x256xi32>
      %cst_29 = arith.constant 0.000000e+00 : f32
      %55 = vector.broadcast %cst_29 : f32 to vector<2x256xf32>
      %56 = arith.select %54, %28, %55 : vector<2x256xi1>, vector<2x256xf32>
      %c13_i32_30 = arith.constant 13 : i32
      %57 = vector.broadcast %c13_i32_30 : i32 to vector<2x256xi32>
      %58 = arith.cmpi slt, %32, %57 : vector<2x256xi32>
      %cst_31 = arith.constant 0.000000e+00 : f32
      %59 = vector.broadcast %cst_31 : f32 to vector<2x256xf32>
      %60 = arith.select %58, %29, %59 : vector<2x256xi1>, vector<2x256xf32>
      %c14_i32_32 = arith.constant 14 : i32
      %61 = vector.broadcast %c14_i32_32 : i32 to vector<2x256xi32>
      %62 = arith.cmpi slt, %32, %61 : vector<2x256xi32>
      %cst_33 = arith.constant 0.000000e+00 : f32
      %63 = vector.broadcast %cst_33 : f32 to vector<2x256xf32>
      %64 = arith.select %62, %29, %63 : vector<2x256xi1>, vector<2x256xf32>
      %c15_i32_34 = arith.constant 15 : i32
      %65 = vector.broadcast %c15_i32_34 : i32 to vector<2x256xi32>
      %66 = arith.cmpi slt, %32, %65 : vector<2x256xi32>
      %cst_35 = arith.constant 0.000000e+00 : f32
      %67 = vector.broadcast %cst_35 : f32 to vector<2x256xf32>
      %68 = arith.select %66, %29, %67 : vector<2x256xi1>, vector<2x256xf32>
      %c1_i32_36 = arith.constant 1 : i32
      %69 = vector.broadcast %c1_i32_36 : i32 to vector<2x256xi32>
      %70 = arith.cmpi sge, %32, %69 : vector<2x256xi32>
      %cst_37 = arith.constant 0.000000e+00 : f32
      %71 = vector.broadcast %cst_37 : f32 to vector<2x256xf32>
      %72 = arith.select %70, %29, %71 : vector<2x256xi1>, vector<2x256xf32>
      %c2_i32_38 = arith.constant 2 : i32
      %73 = vector.broadcast %c2_i32_38 : i32 to vector<2x256xi32>
      %74 = arith.cmpi sge, %32, %73 : vector<2x256xi32>
      %cst_39 = arith.constant 0.000000e+00 : f32
      %75 = vector.broadcast %cst_39 : f32 to vector<2x256xf32>
      %76 = arith.select %74, %29, %75 : vector<2x256xi1>, vector<2x256xf32>
      %c3_i32_40 = arith.constant 3 : i32
      %77 = vector.broadcast %c3_i32_40 : i32 to vector<2x256xi32>
      %78 = arith.cmpi sge, %32, %77 : vector<2x256xi32>
      %cst_41 = arith.constant 0.000000e+00 : f32
      %79 = vector.broadcast %cst_41 : f32 to vector<2x256xf32>
      %80 = arith.select %78, %29, %79 : vector<2x256xi1>, vector<2x256xf32>
      %cst_42 = arith.constant 0.000000e+00 : f32
      %81 = vector.broadcast %cst_42 : f32 to vector<2x256xf32>
      %cst_43 = arith.constant 0.000000e+00 : f32
      %82 = vector.broadcast %cst_43 : f32 to vector<2x256xf32>
      %cst_44 = arith.constant 0.000000e+00 : f32
      %83 = vector.broadcast %cst_44 : f32 to vector<2x256xf32>
      %cst_45 = arith.constant 0.000000e+00 : f32
      %84 = vector.broadcast %cst_45 : f32 to vector<2x256xf32>
      %cst_46 = arith.constant 0.000000e+00 : f32
      %85 = vector.broadcast %cst_46 : f32 to vector<2x51xf32>
      %86 = vector.extract_strided_slice %36 {offsets = [0, 0], sizes = [2, 205], strides = [1, 1]} : vector<2x256xf32> to vector<2x205xf32>
      %87 = tpu.concatenate %85, %86 in 1 : vector<2x51xf32>, vector<2x205xf32> -> vector<2x256xf32>
      %c0_47 = arith.constant 0 : index
      %88 = memref.load %arg2[%c0_47] : memref<98xf32, #tpu.memory_space<smem>>
      %89 = vector.broadcast %88 : f32 to vector<2x256xf32>
      %90 = arith.mulf %89, %87 : vector<2x256xf32>
      %91 = arith.addf %81, %90 : vector<2x256xf32>
      %cst_48 = arith.constant 0.000000e+00 : f32
      %92 = vector.broadcast %cst_48 : f32 to vector<2x50xf32>
      %93 = vector.extract_strided_slice %40 {offsets = [0, 0], sizes = [2, 206], strides = [1, 1]} : vector<2x256xf32> to vector<2x206xf32>
      %94 = tpu.concatenate %92, %93 in 1 : vector<2x50xf32>, vector<2x206xf32> -> vector<2x256xf32>
      %c1_49 = arith.constant 1 : index
      %95 = memref.load %arg2[%c1_49] : memref<98xf32, #tpu.memory_space<smem>>
      %96 = vector.broadcast %95 : f32 to vector<2x256xf32>
      %97 = arith.mulf %96, %94 : vector<2x256xf32>
      %98 = arith.addf %82, %97 : vector<2x256xf32>
      %cst_50 = arith.constant 0.000000e+00 : f32
      %99 = vector.broadcast %cst_50 : f32 to vector<2x49xf32>
      %100 = vector.extract_strided_slice %44 {offsets = [0, 0], sizes = [2, 207], strides = [1, 1]} : vector<2x256xf32> to vector<2x207xf32>
      %101 = tpu.concatenate %99, %100 in 1 : vector<2x49xf32>, vector<2x207xf32> -> vector<2x256xf32>
      %c2_51 = arith.constant 2 : index
      %102 = memref.load %arg2[%c2_51] : memref<98xf32, #tpu.memory_space<smem>>
      %103 = vector.broadcast %102 : f32 to vector<2x256xf32>
      %104 = arith.mulf %103, %101 : vector<2x256xf32>
      %105 = arith.addf %83, %104 : vector<2x256xf32>
      %cst_52 = arith.constant 0.000000e+00 : f32
      %106 = vector.broadcast %cst_52 : f32 to vector<2x48xf32>
      %107 = vector.extract_strided_slice %28 {offsets = [0, 0], sizes = [2, 208], strides = [1, 1]} : vector<2x256xf32> to vector<2x208xf32>
      %108 = tpu.concatenate %106, %107 in 1 : vector<2x48xf32>, vector<2x208xf32> -> vector<2x256xf32>
      %c3_53 = arith.constant 3 : index
      %109 = memref.load %arg2[%c3_53] : memref<98xf32, #tpu.memory_space<smem>>
      %110 = vector.broadcast %109 : f32 to vector<2x256xf32>
      %111 = arith.mulf %110, %108 : vector<2x256xf32>
      %112 = arith.addf %84, %111 : vector<2x256xf32>
      %cst_54 = arith.constant 0.000000e+00 : f32
      %113 = vector.broadcast %cst_54 : f32 to vector<2x47xf32>
      %114 = vector.extract_strided_slice %48 {offsets = [0, 0], sizes = [2, 209], strides = [1, 1]} : vector<2x256xf32> to vector<2x209xf32>
      %115 = tpu.concatenate %113, %114 in 1 : vector<2x47xf32>, vector<2x209xf32> -> vector<2x256xf32>
      %c4 = arith.constant 4 : index
      %116 = memref.load %arg2[%c4] : memref<98xf32, #tpu.memory_space<smem>>
      %117 = vector.broadcast %116 : f32 to vector<2x256xf32>
      %118 = arith.mulf %117, %115 : vector<2x256xf32>
      %119 = arith.addf %91, %118 : vector<2x256xf32>
      %cst_55 = arith.constant 0.000000e+00 : f32
      %120 = vector.broadcast %cst_55 : f32 to vector<2x46xf32>
      %121 = vector.extract_strided_slice %52 {offsets = [0, 0], sizes = [2, 210], strides = [1, 1]} : vector<2x256xf32> to vector<2x210xf32>
      %122 = tpu.concatenate %120, %121 in 1 : vector<2x46xf32>, vector<2x210xf32> -> vector<2x256xf32>
      %c5 = arith.constant 5 : index
      %123 = memref.load %arg2[%c5] : memref<98xf32, #tpu.memory_space<smem>>
      %124 = vector.broadcast %123 : f32 to vector<2x256xf32>
      %125 = arith.mulf %124, %122 : vector<2x256xf32>
      %126 = arith.addf %98, %125 : vector<2x256xf32>
      %cst_56 = arith.constant 0.000000e+00 : f32
      %127 = vector.broadcast %cst_56 : f32 to vector<2x45xf32>
      %128 = vector.extract_strided_slice %56 {offsets = [0, 0], sizes = [2, 211], strides = [1, 1]} : vector<2x256xf32> to vector<2x211xf32>
      %129 = tpu.concatenate %127, %128 in 1 : vector<2x45xf32>, vector<2x211xf32> -> vector<2x256xf32>
      %c6 = arith.constant 6 : index
      %130 = memref.load %arg2[%c6] : memref<98xf32, #tpu.memory_space<smem>>
      %131 = vector.broadcast %130 : f32 to vector<2x256xf32>
      %132 = arith.mulf %131, %129 : vector<2x256xf32>
      %133 = arith.addf %105, %132 : vector<2x256xf32>
      %cst_57 = arith.constant 0.000000e+00 : f32
      %134 = vector.broadcast %cst_57 : f32 to vector<2x35xf32>
      %135 = vector.extract_strided_slice %36 {offsets = [0, 0], sizes = [2, 221], strides = [1, 1]} : vector<2x256xf32> to vector<2x221xf32>
      %136 = tpu.concatenate %134, %135 in 1 : vector<2x35xf32>, vector<2x221xf32> -> vector<2x256xf32>
      %c7 = arith.constant 7 : index
      %137 = memref.load %arg2[%c7] : memref<98xf32, #tpu.memory_space<smem>>
      %138 = vector.broadcast %137 : f32 to vector<2x256xf32>
      %139 = arith.mulf %138, %136 : vector<2x256xf32>
      %140 = arith.addf %112, %139 : vector<2x256xf32>
      %cst_58 = arith.constant 0.000000e+00 : f32
      %141 = vector.broadcast %cst_58 : f32 to vector<2x34xf32>
      %142 = vector.extract_strided_slice %40 {offsets = [0, 0], sizes = [2, 222], strides = [1, 1]} : vector<2x256xf32> to vector<2x222xf32>
      %143 = tpu.concatenate %141, %142 in 1 : vector<2x34xf32>, vector<2x222xf32> -> vector<2x256xf32>
      %c8 = arith.constant 8 : index
      %144 = memref.load %arg2[%c8] : memref<98xf32, #tpu.memory_space<smem>>
      %145 = vector.broadcast %144 : f32 to vector<2x256xf32>
      %146 = arith.mulf %145, %143 : vector<2x256xf32>
      %147 = arith.addf %119, %146 : vector<2x256xf32>
      %cst_59 = arith.constant 0.000000e+00 : f32
      %148 = vector.broadcast %cst_59 : f32 to vector<2x33xf32>
      %149 = vector.extract_strided_slice %44 {offsets = [0, 0], sizes = [2, 223], strides = [1, 1]} : vector<2x256xf32> to vector<2x223xf32>
      %150 = tpu.concatenate %148, %149 in 1 : vector<2x33xf32>, vector<2x223xf32> -> vector<2x256xf32>
      %c9 = arith.constant 9 : index
      %151 = memref.load %arg2[%c9] : memref<98xf32, #tpu.memory_space<smem>>
      %152 = vector.broadcast %151 : f32 to vector<2x256xf32>
      %153 = arith.mulf %152, %150 : vector<2x256xf32>
      %154 = arith.addf %126, %153 : vector<2x256xf32>
      %cst_60 = arith.constant 0.000000e+00 : f32
      %155 = vector.broadcast %cst_60 : f32 to vector<2x32xf32>
      %156 = vector.extract_strided_slice %28 {offsets = [0, 0], sizes = [2, 224], strides = [1, 1]} : vector<2x256xf32> to vector<2x224xf32>
      %157 = tpu.concatenate %155, %156 in 1 : vector<2x32xf32>, vector<2x224xf32> -> vector<2x256xf32>
      %c10 = arith.constant 10 : index
      %158 = memref.load %arg2[%c10] : memref<98xf32, #tpu.memory_space<smem>>
      %159 = vector.broadcast %158 : f32 to vector<2x256xf32>
      %160 = arith.mulf %159, %157 : vector<2x256xf32>
      %161 = arith.addf %133, %160 : vector<2x256xf32>
      %cst_61 = arith.constant 0.000000e+00 : f32
      %162 = vector.broadcast %cst_61 : f32 to vector<2x31xf32>
      %163 = vector.extract_strided_slice %48 {offsets = [0, 0], sizes = [2, 225], strides = [1, 1]} : vector<2x256xf32> to vector<2x225xf32>
      %164 = tpu.concatenate %162, %163 in 1 : vector<2x31xf32>, vector<2x225xf32> -> vector<2x256xf32>
      %c11 = arith.constant 11 : index
      %165 = memref.load %arg2[%c11] : memref<98xf32, #tpu.memory_space<smem>>
      %166 = vector.broadcast %165 : f32 to vector<2x256xf32>
      %167 = arith.mulf %166, %164 : vector<2x256xf32>
      %168 = arith.addf %140, %167 : vector<2x256xf32>
      %cst_62 = arith.constant 0.000000e+00 : f32
      %169 = vector.broadcast %cst_62 : f32 to vector<2x30xf32>
      %170 = vector.extract_strided_slice %52 {offsets = [0, 0], sizes = [2, 226], strides = [1, 1]} : vector<2x256xf32> to vector<2x226xf32>
      %171 = tpu.concatenate %169, %170 in 1 : vector<2x30xf32>, vector<2x226xf32> -> vector<2x256xf32>
      %c12 = arith.constant 12 : index
      %172 = memref.load %arg2[%c12] : memref<98xf32, #tpu.memory_space<smem>>
      %173 = vector.broadcast %172 : f32 to vector<2x256xf32>
      %174 = arith.mulf %173, %171 : vector<2x256xf32>
      %175 = arith.addf %147, %174 : vector<2x256xf32>
      %cst_63 = arith.constant 0.000000e+00 : f32
      %176 = vector.broadcast %cst_63 : f32 to vector<2x29xf32>
      %177 = vector.extract_strided_slice %56 {offsets = [0, 0], sizes = [2, 227], strides = [1, 1]} : vector<2x256xf32> to vector<2x227xf32>
      %178 = tpu.concatenate %176, %177 in 1 : vector<2x29xf32>, vector<2x227xf32> -> vector<2x256xf32>
      %c13 = arith.constant 13 : index
      %179 = memref.load %arg2[%c13] : memref<98xf32, #tpu.memory_space<smem>>
      %180 = vector.broadcast %179 : f32 to vector<2x256xf32>
      %181 = arith.mulf %180, %178 : vector<2x256xf32>
      %182 = arith.addf %154, %181 : vector<2x256xf32>
      %cst_64 = arith.constant 0.000000e+00 : f32
      %183 = vector.broadcast %cst_64 : f32 to vector<2x19xf32>
      %184 = vector.extract_strided_slice %36 {offsets = [0, 0], sizes = [2, 237], strides = [1, 1]} : vector<2x256xf32> to vector<2x237xf32>
      %185 = tpu.concatenate %183, %184 in 1 : vector<2x19xf32>, vector<2x237xf32> -> vector<2x256xf32>
      %c14 = arith.constant 14 : index
      %186 = memref.load %arg2[%c14] : memref<98xf32, #tpu.memory_space<smem>>
      %187 = vector.broadcast %186 : f32 to vector<2x256xf32>
      %188 = arith.mulf %187, %185 : vector<2x256xf32>
      %189 = arith.addf %161, %188 : vector<2x256xf32>
      %cst_65 = arith.constant 0.000000e+00 : f32
      %190 = vector.broadcast %cst_65 : f32 to vector<2x18xf32>
      %191 = vector.extract_strided_slice %40 {offsets = [0, 0], sizes = [2, 238], strides = [1, 1]} : vector<2x256xf32> to vector<2x238xf32>
      %192 = tpu.concatenate %190, %191 in 1 : vector<2x18xf32>, vector<2x238xf32> -> vector<2x256xf32>
      %c15 = arith.constant 15 : index
      %193 = memref.load %arg2[%c15] : memref<98xf32, #tpu.memory_space<smem>>
      %194 = vector.broadcast %193 : f32 to vector<2x256xf32>
      %195 = arith.mulf %194, %192 : vector<2x256xf32>
      %196 = arith.addf %168, %195 : vector<2x256xf32>
      %cst_66 = arith.constant 0.000000e+00 : f32
      %197 = vector.broadcast %cst_66 : f32 to vector<2x17xf32>
      %198 = vector.extract_strided_slice %44 {offsets = [0, 0], sizes = [2, 239], strides = [1, 1]} : vector<2x256xf32> to vector<2x239xf32>
      %199 = tpu.concatenate %197, %198 in 1 : vector<2x17xf32>, vector<2x239xf32> -> vector<2x256xf32>
      %c16 = arith.constant 16 : index
      %200 = memref.load %arg2[%c16] : memref<98xf32, #tpu.memory_space<smem>>
      %201 = vector.broadcast %200 : f32 to vector<2x256xf32>
      %202 = arith.mulf %201, %199 : vector<2x256xf32>
      %203 = arith.addf %175, %202 : vector<2x256xf32>
      %cst_67 = arith.constant 0.000000e+00 : f32
      %204 = vector.broadcast %cst_67 : f32 to vector<2x16xf32>
      %205 = vector.extract_strided_slice %28 {offsets = [0, 0], sizes = [2, 240], strides = [1, 1]} : vector<2x256xf32> to vector<2x240xf32>
      %206 = tpu.concatenate %204, %205 in 1 : vector<2x16xf32>, vector<2x240xf32> -> vector<2x256xf32>
      %c17 = arith.constant 17 : index
      %207 = memref.load %arg2[%c17] : memref<98xf32, #tpu.memory_space<smem>>
      %208 = vector.broadcast %207 : f32 to vector<2x256xf32>
      %209 = arith.mulf %208, %206 : vector<2x256xf32>
      %210 = arith.addf %182, %209 : vector<2x256xf32>
      %cst_68 = arith.constant 0.000000e+00 : f32
      %211 = vector.broadcast %cst_68 : f32 to vector<2x15xf32>
      %212 = vector.extract_strided_slice %48 {offsets = [0, 0], sizes = [2, 241], strides = [1, 1]} : vector<2x256xf32> to vector<2x241xf32>
      %213 = tpu.concatenate %211, %212 in 1 : vector<2x15xf32>, vector<2x241xf32> -> vector<2x256xf32>
      %c18 = arith.constant 18 : index
      %214 = memref.load %arg2[%c18] : memref<98xf32, #tpu.memory_space<smem>>
      %215 = vector.broadcast %214 : f32 to vector<2x256xf32>
      %216 = arith.mulf %215, %213 : vector<2x256xf32>
      %217 = arith.addf %189, %216 : vector<2x256xf32>
      %cst_69 = arith.constant 0.000000e+00 : f32
      %218 = vector.broadcast %cst_69 : f32 to vector<2x14xf32>
      %219 = vector.extract_strided_slice %52 {offsets = [0, 0], sizes = [2, 242], strides = [1, 1]} : vector<2x256xf32> to vector<2x242xf32>
      %220 = tpu.concatenate %218, %219 in 1 : vector<2x14xf32>, vector<2x242xf32> -> vector<2x256xf32>
      %c19 = arith.constant 19 : index
      %221 = memref.load %arg2[%c19] : memref<98xf32, #tpu.memory_space<smem>>
      %222 = vector.broadcast %221 : f32 to vector<2x256xf32>
      %223 = arith.mulf %222, %220 : vector<2x256xf32>
      %224 = arith.addf %196, %223 : vector<2x256xf32>
      %cst_70 = arith.constant 0.000000e+00 : f32
      %225 = vector.broadcast %cst_70 : f32 to vector<2x13xf32>
      %226 = vector.extract_strided_slice %56 {offsets = [0, 0], sizes = [2, 243], strides = [1, 1]} : vector<2x256xf32> to vector<2x243xf32>
      %227 = tpu.concatenate %225, %226 in 1 : vector<2x13xf32>, vector<2x243xf32> -> vector<2x256xf32>
      %c20 = arith.constant 20 : index
      %228 = memref.load %arg2[%c20] : memref<98xf32, #tpu.memory_space<smem>>
      %229 = vector.broadcast %228 : f32 to vector<2x256xf32>
      %230 = arith.mulf %229, %227 : vector<2x256xf32>
      %231 = arith.addf %203, %230 : vector<2x256xf32>
      %cst_71 = arith.constant 0.000000e+00 : f32
      %232 = vector.broadcast %cst_71 : f32 to vector<2x3xf32>
      %233 = vector.extract_strided_slice %36 {offsets = [0, 0], sizes = [2, 253], strides = [1, 1]} : vector<2x256xf32> to vector<2x253xf32>
      %234 = tpu.concatenate %232, %233 in 1 : vector<2x3xf32>, vector<2x253xf32> -> vector<2x256xf32>
      %c21 = arith.constant 21 : index
      %235 = memref.load %arg2[%c21] : memref<98xf32, #tpu.memory_space<smem>>
      %236 = vector.broadcast %235 : f32 to vector<2x256xf32>
      %237 = arith.mulf %236, %234 : vector<2x256xf32>
      %238 = arith.addf %210, %237 : vector<2x256xf32>
      %cst_72 = arith.constant 0.000000e+00 : f32
      %239 = vector.broadcast %cst_72 : f32 to vector<2x2xf32>
      %240 = vector.extract_strided_slice %40 {offsets = [0, 0], sizes = [2, 254], strides = [1, 1]} : vector<2x256xf32> to vector<2x254xf32>
      %241 = tpu.concatenate %239, %240 in 1 : vector<2x2xf32>, vector<2x254xf32> -> vector<2x256xf32>
      %c22 = arith.constant 22 : index
      %242 = memref.load %arg2[%c22] : memref<98xf32, #tpu.memory_space<smem>>
      %243 = vector.broadcast %242 : f32 to vector<2x256xf32>
      %244 = arith.mulf %243, %241 : vector<2x256xf32>
      %245 = arith.addf %217, %244 : vector<2x256xf32>
      %cst_73 = arith.constant 0.000000e+00 : f32
      %246 = vector.broadcast %cst_73 : f32 to vector<2x1xf32>
      %247 = vector.extract_strided_slice %44 {offsets = [0, 0], sizes = [2, 255], strides = [1, 1]} : vector<2x256xf32> to vector<2x255xf32>
      %248 = tpu.concatenate %246, %247 in 1 : vector<2x1xf32>, vector<2x255xf32> -> vector<2x256xf32>
      %c23 = arith.constant 23 : index
      %249 = memref.load %arg2[%c23] : memref<98xf32, #tpu.memory_space<smem>>
      %250 = vector.broadcast %249 : f32 to vector<2x256xf32>
      %251 = arith.mulf %250, %248 : vector<2x256xf32>
      %252 = arith.addf %224, %251 : vector<2x256xf32>
      %c24 = arith.constant 24 : index
      %253 = memref.load %arg2[%c24] : memref<98xf32, #tpu.memory_space<smem>>
      %254 = vector.broadcast %253 : f32 to vector<2x256xf32>
      %255 = arith.mulf %254, %28 : vector<2x256xf32>
      %256 = arith.addf %231, %255 : vector<2x256xf32>
      %257 = vector.extract_strided_slice %48 {offsets = [0, 1], sizes = [2, 255], strides = [1, 1]} : vector<2x256xf32> to vector<2x255xf32>
      %cst_74 = arith.constant 0.000000e+00 : f32
      %258 = vector.broadcast %cst_74 : f32 to vector<2x1xf32>
      %259 = tpu.concatenate %257, %258 in 1 : vector<2x255xf32>, vector<2x1xf32> -> vector<2x256xf32>
      %c25 = arith.constant 25 : index
      %260 = memref.load %arg2[%c25] : memref<98xf32, #tpu.memory_space<smem>>
      %261 = vector.broadcast %260 : f32 to vector<2x256xf32>
      %262 = arith.mulf %261, %259 : vector<2x256xf32>
      %263 = arith.addf %238, %262 : vector<2x256xf32>
      %264 = vector.extract_strided_slice %52 {offsets = [0, 2], sizes = [2, 254], strides = [1, 1]} : vector<2x256xf32> to vector<2x254xf32>
      %cst_75 = arith.constant 0.000000e+00 : f32
      %265 = vector.broadcast %cst_75 : f32 to vector<2x2xf32>
      %266 = tpu.concatenate %264, %265 in 1 : vector<2x254xf32>, vector<2x2xf32> -> vector<2x256xf32>
      %c26 = arith.constant 26 : index
      %267 = memref.load %arg2[%c26] : memref<98xf32, #tpu.memory_space<smem>>
      %268 = vector.broadcast %267 : f32 to vector<2x256xf32>
      %269 = arith.mulf %268, %266 : vector<2x256xf32>
      %270 = arith.addf %245, %269 : vector<2x256xf32>
      %271 = vector.extract_strided_slice %56 {offsets = [0, 3], sizes = [2, 253], strides = [1, 1]} : vector<2x256xf32> to vector<2x253xf32>
      %cst_76 = arith.constant 0.000000e+00 : f32
      %272 = vector.broadcast %cst_76 : f32 to vector<2x3xf32>
      %273 = tpu.concatenate %271, %272 in 1 : vector<2x253xf32>, vector<2x3xf32> -> vector<2x256xf32>
      %c27 = arith.constant 27 : index
      %274 = memref.load %arg2[%c27] : memref<98xf32, #tpu.memory_space<smem>>
      %275 = vector.broadcast %274 : f32 to vector<2x256xf32>
      %276 = arith.mulf %275, %273 : vector<2x256xf32>
      %277 = arith.addf %252, %276 : vector<2x256xf32>
      %278 = vector.extract_strided_slice %36 {offsets = [0, 13], sizes = [2, 243], strides = [1, 1]} : vector<2x256xf32> to vector<2x243xf32>
      %cst_77 = arith.constant 0.000000e+00 : f32
      %279 = vector.broadcast %cst_77 : f32 to vector<2x13xf32>
      %280 = tpu.concatenate %278, %279 in 1 : vector<2x243xf32>, vector<2x13xf32> -> vector<2x256xf32>
      %c28 = arith.constant 28 : index
      %281 = memref.load %arg2[%c28] : memref<98xf32, #tpu.memory_space<smem>>
      %282 = vector.broadcast %281 : f32 to vector<2x256xf32>
      %283 = arith.mulf %282, %280 : vector<2x256xf32>
      %284 = arith.addf %256, %283 : vector<2x256xf32>
      %285 = vector.extract_strided_slice %40 {offsets = [0, 14], sizes = [2, 242], strides = [1, 1]} : vector<2x256xf32> to vector<2x242xf32>
      %cst_78 = arith.constant 0.000000e+00 : f32
      %286 = vector.broadcast %cst_78 : f32 to vector<2x14xf32>
      %287 = tpu.concatenate %285, %286 in 1 : vector<2x242xf32>, vector<2x14xf32> -> vector<2x256xf32>
      %c29 = arith.constant 29 : index
      %288 = memref.load %arg2[%c29] : memref<98xf32, #tpu.memory_space<smem>>
      %289 = vector.broadcast %288 : f32 to vector<2x256xf32>
      %290 = arith.mulf %289, %287 : vector<2x256xf32>
      %291 = arith.addf %263, %290 : vector<2x256xf32>
      %292 = vector.extract_strided_slice %44 {offsets = [0, 15], sizes = [2, 241], strides = [1, 1]} : vector<2x256xf32> to vector<2x241xf32>
      %cst_79 = arith.constant 0.000000e+00 : f32
      %293 = vector.broadcast %cst_79 : f32 to vector<2x15xf32>
      %294 = tpu.concatenate %292, %293 in 1 : vector<2x241xf32>, vector<2x15xf32> -> vector<2x256xf32>
      %c30 = arith.constant 30 : index
      %295 = memref.load %arg2[%c30] : memref<98xf32, #tpu.memory_space<smem>>
      %296 = vector.broadcast %295 : f32 to vector<2x256xf32>
      %297 = arith.mulf %296, %294 : vector<2x256xf32>
      %298 = arith.addf %270, %297 : vector<2x256xf32>
      %299 = vector.extract_strided_slice %28 {offsets = [0, 16], sizes = [2, 240], strides = [1, 1]} : vector<2x256xf32> to vector<2x240xf32>
      %cst_80 = arith.constant 0.000000e+00 : f32
      %300 = vector.broadcast %cst_80 : f32 to vector<2x16xf32>
      %301 = tpu.concatenate %299, %300 in 1 : vector<2x240xf32>, vector<2x16xf32> -> vector<2x256xf32>
      %c31 = arith.constant 31 : index
      %302 = memref.load %arg2[%c31] : memref<98xf32, #tpu.memory_space<smem>>
      %303 = vector.broadcast %302 : f32 to vector<2x256xf32>
      %304 = arith.mulf %303, %301 : vector<2x256xf32>
      %305 = arith.addf %277, %304 : vector<2x256xf32>
      %306 = vector.extract_strided_slice %48 {offsets = [0, 17], sizes = [2, 239], strides = [1, 1]} : vector<2x256xf32> to vector<2x239xf32>
      %cst_81 = arith.constant 0.000000e+00 : f32
      %307 = vector.broadcast %cst_81 : f32 to vector<2x17xf32>
      %308 = tpu.concatenate %306, %307 in 1 : vector<2x239xf32>, vector<2x17xf32> -> vector<2x256xf32>
      %c32 = arith.constant 32 : index
      %309 = memref.load %arg2[%c32] : memref<98xf32, #tpu.memory_space<smem>>
      %310 = vector.broadcast %309 : f32 to vector<2x256xf32>
      %311 = arith.mulf %310, %308 : vector<2x256xf32>
      %312 = arith.addf %284, %311 : vector<2x256xf32>
      %313 = vector.extract_strided_slice %52 {offsets = [0, 18], sizes = [2, 238], strides = [1, 1]} : vector<2x256xf32> to vector<2x238xf32>
      %cst_82 = arith.constant 0.000000e+00 : f32
      %314 = vector.broadcast %cst_82 : f32 to vector<2x18xf32>
      %315 = tpu.concatenate %313, %314 in 1 : vector<2x238xf32>, vector<2x18xf32> -> vector<2x256xf32>
      %c33 = arith.constant 33 : index
      %316 = memref.load %arg2[%c33] : memref<98xf32, #tpu.memory_space<smem>>
      %317 = vector.broadcast %316 : f32 to vector<2x256xf32>
      %318 = arith.mulf %317, %315 : vector<2x256xf32>
      %319 = arith.addf %291, %318 : vector<2x256xf32>
      %320 = vector.extract_strided_slice %56 {offsets = [0, 19], sizes = [2, 237], strides = [1, 1]} : vector<2x256xf32> to vector<2x237xf32>
      %cst_83 = arith.constant 0.000000e+00 : f32
      %321 = vector.broadcast %cst_83 : f32 to vector<2x19xf32>
      %322 = tpu.concatenate %320, %321 in 1 : vector<2x237xf32>, vector<2x19xf32> -> vector<2x256xf32>
      %c34 = arith.constant 34 : index
      %323 = memref.load %arg2[%c34] : memref<98xf32, #tpu.memory_space<smem>>
      %324 = vector.broadcast %323 : f32 to vector<2x256xf32>
      %325 = arith.mulf %324, %322 : vector<2x256xf32>
      %326 = arith.addf %298, %325 : vector<2x256xf32>
      %327 = vector.extract_strided_slice %36 {offsets = [0, 29], sizes = [2, 227], strides = [1, 1]} : vector<2x256xf32> to vector<2x227xf32>
      %cst_84 = arith.constant 0.000000e+00 : f32
      %328 = vector.broadcast %cst_84 : f32 to vector<2x29xf32>
      %329 = tpu.concatenate %327, %328 in 1 : vector<2x227xf32>, vector<2x29xf32> -> vector<2x256xf32>
      %c35 = arith.constant 35 : index
      %330 = memref.load %arg2[%c35] : memref<98xf32, #tpu.memory_space<smem>>
      %331 = vector.broadcast %330 : f32 to vector<2x256xf32>
      %332 = arith.mulf %331, %329 : vector<2x256xf32>
      %333 = arith.addf %305, %332 : vector<2x256xf32>
      %334 = vector.extract_strided_slice %40 {offsets = [0, 30], sizes = [2, 226], strides = [1, 1]} : vector<2x256xf32> to vector<2x226xf32>
      %cst_85 = arith.constant 0.000000e+00 : f32
      %335 = vector.broadcast %cst_85 : f32 to vector<2x30xf32>
      %336 = tpu.concatenate %334, %335 in 1 : vector<2x226xf32>, vector<2x30xf32> -> vector<2x256xf32>
      %c36 = arith.constant 36 : index
      %337 = memref.load %arg2[%c36] : memref<98xf32, #tpu.memory_space<smem>>
      %338 = vector.broadcast %337 : f32 to vector<2x256xf32>
      %339 = arith.mulf %338, %336 : vector<2x256xf32>
      %340 = arith.addf %312, %339 : vector<2x256xf32>
      %341 = vector.extract_strided_slice %44 {offsets = [0, 31], sizes = [2, 225], strides = [1, 1]} : vector<2x256xf32> to vector<2x225xf32>
      %cst_86 = arith.constant 0.000000e+00 : f32
      %342 = vector.broadcast %cst_86 : f32 to vector<2x31xf32>
      %343 = tpu.concatenate %341, %342 in 1 : vector<2x225xf32>, vector<2x31xf32> -> vector<2x256xf32>
      %c37 = arith.constant 37 : index
      %344 = memref.load %arg2[%c37] : memref<98xf32, #tpu.memory_space<smem>>
      %345 = vector.broadcast %344 : f32 to vector<2x256xf32>
      %346 = arith.mulf %345, %343 : vector<2x256xf32>
      %347 = arith.addf %319, %346 : vector<2x256xf32>
      %348 = vector.extract_strided_slice %28 {offsets = [0, 32], sizes = [2, 224], strides = [1, 1]} : vector<2x256xf32> to vector<2x224xf32>
      %cst_87 = arith.constant 0.000000e+00 : f32
      %349 = vector.broadcast %cst_87 : f32 to vector<2x32xf32>
      %350 = tpu.concatenate %348, %349 in 1 : vector<2x224xf32>, vector<2x32xf32> -> vector<2x256xf32>
      %c38 = arith.constant 38 : index
      %351 = memref.load %arg2[%c38] : memref<98xf32, #tpu.memory_space<smem>>
      %352 = vector.broadcast %351 : f32 to vector<2x256xf32>
      %353 = arith.mulf %352, %350 : vector<2x256xf32>
      %354 = arith.addf %326, %353 : vector<2x256xf32>
      %355 = vector.extract_strided_slice %48 {offsets = [0, 33], sizes = [2, 223], strides = [1, 1]} : vector<2x256xf32> to vector<2x223xf32>
      %cst_88 = arith.constant 0.000000e+00 : f32
      %356 = vector.broadcast %cst_88 : f32 to vector<2x33xf32>
      %357 = tpu.concatenate %355, %356 in 1 : vector<2x223xf32>, vector<2x33xf32> -> vector<2x256xf32>
      %c39 = arith.constant 39 : index
      %358 = memref.load %arg2[%c39] : memref<98xf32, #tpu.memory_space<smem>>
      %359 = vector.broadcast %358 : f32 to vector<2x256xf32>
      %360 = arith.mulf %359, %357 : vector<2x256xf32>
      %361 = arith.addf %333, %360 : vector<2x256xf32>
      %362 = vector.extract_strided_slice %52 {offsets = [0, 34], sizes = [2, 222], strides = [1, 1]} : vector<2x256xf32> to vector<2x222xf32>
      %cst_89 = arith.constant 0.000000e+00 : f32
      %363 = vector.broadcast %cst_89 : f32 to vector<2x34xf32>
      %364 = tpu.concatenate %362, %363 in 1 : vector<2x222xf32>, vector<2x34xf32> -> vector<2x256xf32>
      %c40 = arith.constant 40 : index
      %365 = memref.load %arg2[%c40] : memref<98xf32, #tpu.memory_space<smem>>
      %366 = vector.broadcast %365 : f32 to vector<2x256xf32>
      %367 = arith.mulf %366, %364 : vector<2x256xf32>
      %368 = arith.addf %340, %367 : vector<2x256xf32>
      %369 = vector.extract_strided_slice %56 {offsets = [0, 35], sizes = [2, 221], strides = [1, 1]} : vector<2x256xf32> to vector<2x221xf32>
      %cst_90 = arith.constant 0.000000e+00 : f32
      %370 = vector.broadcast %cst_90 : f32 to vector<2x35xf32>
      %371 = tpu.concatenate %369, %370 in 1 : vector<2x221xf32>, vector<2x35xf32> -> vector<2x256xf32>
      %c41 = arith.constant 41 : index
      %372 = memref.load %arg2[%c41] : memref<98xf32, #tpu.memory_space<smem>>
      %373 = vector.broadcast %372 : f32 to vector<2x256xf32>
      %374 = arith.mulf %373, %371 : vector<2x256xf32>
      %375 = arith.addf %347, %374 : vector<2x256xf32>
      %376 = vector.extract_strided_slice %36 {offsets = [0, 45], sizes = [2, 211], strides = [1, 1]} : vector<2x256xf32> to vector<2x211xf32>
      %cst_91 = arith.constant 0.000000e+00 : f32
      %377 = vector.broadcast %cst_91 : f32 to vector<2x45xf32>
      %378 = tpu.concatenate %376, %377 in 1 : vector<2x211xf32>, vector<2x45xf32> -> vector<2x256xf32>
      %c42 = arith.constant 42 : index
      %379 = memref.load %arg2[%c42] : memref<98xf32, #tpu.memory_space<smem>>
      %380 = vector.broadcast %379 : f32 to vector<2x256xf32>
      %381 = arith.mulf %380, %378 : vector<2x256xf32>
      %382 = arith.addf %354, %381 : vector<2x256xf32>
      %383 = vector.extract_strided_slice %40 {offsets = [0, 46], sizes = [2, 210], strides = [1, 1]} : vector<2x256xf32> to vector<2x210xf32>
      %cst_92 = arith.constant 0.000000e+00 : f32
      %384 = vector.broadcast %cst_92 : f32 to vector<2x46xf32>
      %385 = tpu.concatenate %383, %384 in 1 : vector<2x210xf32>, vector<2x46xf32> -> vector<2x256xf32>
      %c43 = arith.constant 43 : index
      %386 = memref.load %arg2[%c43] : memref<98xf32, #tpu.memory_space<smem>>
      %387 = vector.broadcast %386 : f32 to vector<2x256xf32>
      %388 = arith.mulf %387, %385 : vector<2x256xf32>
      %389 = arith.addf %361, %388 : vector<2x256xf32>
      %390 = vector.extract_strided_slice %44 {offsets = [0, 47], sizes = [2, 209], strides = [1, 1]} : vector<2x256xf32> to vector<2x209xf32>
      %cst_93 = arith.constant 0.000000e+00 : f32
      %391 = vector.broadcast %cst_93 : f32 to vector<2x47xf32>
      %392 = tpu.concatenate %390, %391 in 1 : vector<2x209xf32>, vector<2x47xf32> -> vector<2x256xf32>
      %c44 = arith.constant 44 : index
      %393 = memref.load %arg2[%c44] : memref<98xf32, #tpu.memory_space<smem>>
      %394 = vector.broadcast %393 : f32 to vector<2x256xf32>
      %395 = arith.mulf %394, %392 : vector<2x256xf32>
      %396 = arith.addf %368, %395 : vector<2x256xf32>
      %397 = vector.extract_strided_slice %28 {offsets = [0, 48], sizes = [2, 208], strides = [1, 1]} : vector<2x256xf32> to vector<2x208xf32>
      %cst_94 = arith.constant 0.000000e+00 : f32
      %398 = vector.broadcast %cst_94 : f32 to vector<2x48xf32>
      %399 = tpu.concatenate %397, %398 in 1 : vector<2x208xf32>, vector<2x48xf32> -> vector<2x256xf32>
      %c45 = arith.constant 45 : index
      %400 = memref.load %arg2[%c45] : memref<98xf32, #tpu.memory_space<smem>>
      %401 = vector.broadcast %400 : f32 to vector<2x256xf32>
      %402 = arith.mulf %401, %399 : vector<2x256xf32>
      %403 = arith.addf %375, %402 : vector<2x256xf32>
      %404 = vector.extract_strided_slice %48 {offsets = [0, 49], sizes = [2, 207], strides = [1, 1]} : vector<2x256xf32> to vector<2x207xf32>
      %cst_95 = arith.constant 0.000000e+00 : f32
      %405 = vector.broadcast %cst_95 : f32 to vector<2x49xf32>
      %406 = tpu.concatenate %404, %405 in 1 : vector<2x207xf32>, vector<2x49xf32> -> vector<2x256xf32>
      %c46 = arith.constant 46 : index
      %407 = memref.load %arg2[%c46] : memref<98xf32, #tpu.memory_space<smem>>
      %408 = vector.broadcast %407 : f32 to vector<2x256xf32>
      %409 = arith.mulf %408, %406 : vector<2x256xf32>
      %410 = arith.addf %382, %409 : vector<2x256xf32>
      %411 = vector.extract_strided_slice %52 {offsets = [0, 50], sizes = [2, 206], strides = [1, 1]} : vector<2x256xf32> to vector<2x206xf32>
      %cst_96 = arith.constant 0.000000e+00 : f32
      %412 = vector.broadcast %cst_96 : f32 to vector<2x50xf32>
      %413 = tpu.concatenate %411, %412 in 1 : vector<2x206xf32>, vector<2x50xf32> -> vector<2x256xf32>
      %c47 = arith.constant 47 : index
      %414 = memref.load %arg2[%c47] : memref<98xf32, #tpu.memory_space<smem>>
      %415 = vector.broadcast %414 : f32 to vector<2x256xf32>
      %416 = arith.mulf %415, %413 : vector<2x256xf32>
      %417 = arith.addf %389, %416 : vector<2x256xf32>
      %418 = vector.extract_strided_slice %56 {offsets = [0, 51], sizes = [2, 205], strides = [1, 1]} : vector<2x256xf32> to vector<2x205xf32>
      %cst_97 = arith.constant 0.000000e+00 : f32
      %419 = vector.broadcast %cst_97 : f32 to vector<2x51xf32>
      %420 = tpu.concatenate %418, %419 in 1 : vector<2x205xf32>, vector<2x51xf32> -> vector<2x256xf32>
      %c48 = arith.constant 48 : index
      %421 = memref.load %arg2[%c48] : memref<98xf32, #tpu.memory_space<smem>>
      %422 = vector.broadcast %421 : f32 to vector<2x256xf32>
      %423 = arith.mulf %422, %420 : vector<2x256xf32>
      %424 = arith.addf %396, %423 : vector<2x256xf32>
      %cst_98 = arith.constant 0.000000e+00 : f32
      %425 = vector.broadcast %cst_98 : f32 to vector<2x51xf32>
      %426 = vector.extract_strided_slice %60 {offsets = [0, 0], sizes = [2, 205], strides = [1, 1]} : vector<2x256xf32> to vector<2x205xf32>
      %427 = tpu.concatenate %425, %426 in 1 : vector<2x51xf32>, vector<2x205xf32> -> vector<2x256xf32>
      %c49 = arith.constant 49 : index
      %428 = memref.load %arg2[%c49] : memref<98xf32, #tpu.memory_space<smem>>
      %429 = vector.broadcast %428 : f32 to vector<2x256xf32>
      %430 = arith.mulf %429, %427 : vector<2x256xf32>
      %431 = arith.addf %403, %430 : vector<2x256xf32>
      %cst_99 = arith.constant 0.000000e+00 : f32
      %432 = vector.broadcast %cst_99 : f32 to vector<2x50xf32>
      %433 = vector.extract_strided_slice %64 {offsets = [0, 0], sizes = [2, 206], strides = [1, 1]} : vector<2x256xf32> to vector<2x206xf32>
      %434 = tpu.concatenate %432, %433 in 1 : vector<2x50xf32>, vector<2x206xf32> -> vector<2x256xf32>
      %c50 = arith.constant 50 : index
      %435 = memref.load %arg2[%c50] : memref<98xf32, #tpu.memory_space<smem>>
      %436 = vector.broadcast %435 : f32 to vector<2x256xf32>
      %437 = arith.mulf %436, %434 : vector<2x256xf32>
      %438 = arith.addf %410, %437 : vector<2x256xf32>
      %cst_100 = arith.constant 0.000000e+00 : f32
      %439 = vector.broadcast %cst_100 : f32 to vector<2x49xf32>
      %440 = vector.extract_strided_slice %68 {offsets = [0, 0], sizes = [2, 207], strides = [1, 1]} : vector<2x256xf32> to vector<2x207xf32>
      %441 = tpu.concatenate %439, %440 in 1 : vector<2x49xf32>, vector<2x207xf32> -> vector<2x256xf32>
      %c51 = arith.constant 51 : index
      %442 = memref.load %arg2[%c51] : memref<98xf32, #tpu.memory_space<smem>>
      %443 = vector.broadcast %442 : f32 to vector<2x256xf32>
      %444 = arith.mulf %443, %441 : vector<2x256xf32>
      %445 = arith.addf %417, %444 : vector<2x256xf32>
      %cst_101 = arith.constant 0.000000e+00 : f32
      %446 = vector.broadcast %cst_101 : f32 to vector<2x48xf32>
      %447 = vector.extract_strided_slice %29 {offsets = [0, 0], sizes = [2, 208], strides = [1, 1]} : vector<2x256xf32> to vector<2x208xf32>
      %448 = tpu.concatenate %446, %447 in 1 : vector<2x48xf32>, vector<2x208xf32> -> vector<2x256xf32>
      %c52 = arith.constant 52 : index
      %449 = memref.load %arg2[%c52] : memref<98xf32, #tpu.memory_space<smem>>
      %450 = vector.broadcast %449 : f32 to vector<2x256xf32>
      %451 = arith.mulf %450, %448 : vector<2x256xf32>
      %452 = arith.addf %424, %451 : vector<2x256xf32>
      %cst_102 = arith.constant 0.000000e+00 : f32
      %453 = vector.broadcast %cst_102 : f32 to vector<2x47xf32>
      %454 = vector.extract_strided_slice %72 {offsets = [0, 0], sizes = [2, 209], strides = [1, 1]} : vector<2x256xf32> to vector<2x209xf32>
      %455 = tpu.concatenate %453, %454 in 1 : vector<2x47xf32>, vector<2x209xf32> -> vector<2x256xf32>
      %c53 = arith.constant 53 : index
      %456 = memref.load %arg2[%c53] : memref<98xf32, #tpu.memory_space<smem>>
      %457 = vector.broadcast %456 : f32 to vector<2x256xf32>
      %458 = arith.mulf %457, %455 : vector<2x256xf32>
      %459 = arith.addf %431, %458 : vector<2x256xf32>
      %cst_103 = arith.constant 0.000000e+00 : f32
      %460 = vector.broadcast %cst_103 : f32 to vector<2x46xf32>
      %461 = vector.extract_strided_slice %76 {offsets = [0, 0], sizes = [2, 210], strides = [1, 1]} : vector<2x256xf32> to vector<2x210xf32>
      %462 = tpu.concatenate %460, %461 in 1 : vector<2x46xf32>, vector<2x210xf32> -> vector<2x256xf32>
      %c54 = arith.constant 54 : index
      %463 = memref.load %arg2[%c54] : memref<98xf32, #tpu.memory_space<smem>>
      %464 = vector.broadcast %463 : f32 to vector<2x256xf32>
      %465 = arith.mulf %464, %462 : vector<2x256xf32>
      %466 = arith.addf %438, %465 : vector<2x256xf32>
      %cst_104 = arith.constant 0.000000e+00 : f32
      %467 = vector.broadcast %cst_104 : f32 to vector<2x45xf32>
      %468 = vector.extract_strided_slice %80 {offsets = [0, 0], sizes = [2, 211], strides = [1, 1]} : vector<2x256xf32> to vector<2x211xf32>
      %469 = tpu.concatenate %467, %468 in 1 : vector<2x45xf32>, vector<2x211xf32> -> vector<2x256xf32>
      %c55 = arith.constant 55 : index
      %470 = memref.load %arg2[%c55] : memref<98xf32, #tpu.memory_space<smem>>
      %471 = vector.broadcast %470 : f32 to vector<2x256xf32>
      %472 = arith.mulf %471, %469 : vector<2x256xf32>
      %473 = arith.addf %445, %472 : vector<2x256xf32>
      %cst_105 = arith.constant 0.000000e+00 : f32
      %474 = vector.broadcast %cst_105 : f32 to vector<2x35xf32>
      %475 = vector.extract_strided_slice %60 {offsets = [0, 0], sizes = [2, 221], strides = [1, 1]} : vector<2x256xf32> to vector<2x221xf32>
      %476 = tpu.concatenate %474, %475 in 1 : vector<2x35xf32>, vector<2x221xf32> -> vector<2x256xf32>
      %c56 = arith.constant 56 : index
      %477 = memref.load %arg2[%c56] : memref<98xf32, #tpu.memory_space<smem>>
      %478 = vector.broadcast %477 : f32 to vector<2x256xf32>
      %479 = arith.mulf %478, %476 : vector<2x256xf32>
      %480 = arith.addf %452, %479 : vector<2x256xf32>
      %cst_106 = arith.constant 0.000000e+00 : f32
      %481 = vector.broadcast %cst_106 : f32 to vector<2x34xf32>
      %482 = vector.extract_strided_slice %64 {offsets = [0, 0], sizes = [2, 222], strides = [1, 1]} : vector<2x256xf32> to vector<2x222xf32>
      %483 = tpu.concatenate %481, %482 in 1 : vector<2x34xf32>, vector<2x222xf32> -> vector<2x256xf32>
      %c57 = arith.constant 57 : index
      %484 = memref.load %arg2[%c57] : memref<98xf32, #tpu.memory_space<smem>>
      %485 = vector.broadcast %484 : f32 to vector<2x256xf32>
      %486 = arith.mulf %485, %483 : vector<2x256xf32>
      %487 = arith.addf %459, %486 : vector<2x256xf32>
      %cst_107 = arith.constant 0.000000e+00 : f32
      %488 = vector.broadcast %cst_107 : f32 to vector<2x33xf32>
      %489 = vector.extract_strided_slice %68 {offsets = [0, 0], sizes = [2, 223], strides = [1, 1]} : vector<2x256xf32> to vector<2x223xf32>
      %490 = tpu.concatenate %488, %489 in 1 : vector<2x33xf32>, vector<2x223xf32> -> vector<2x256xf32>
      %c58 = arith.constant 58 : index
      %491 = memref.load %arg2[%c58] : memref<98xf32, #tpu.memory_space<smem>>
      %492 = vector.broadcast %491 : f32 to vector<2x256xf32>
      %493 = arith.mulf %492, %490 : vector<2x256xf32>
      %494 = arith.addf %466, %493 : vector<2x256xf32>
      %cst_108 = arith.constant 0.000000e+00 : f32
      %495 = vector.broadcast %cst_108 : f32 to vector<2x32xf32>
      %496 = vector.extract_strided_slice %29 {offsets = [0, 0], sizes = [2, 224], strides = [1, 1]} : vector<2x256xf32> to vector<2x224xf32>
      %497 = tpu.concatenate %495, %496 in 1 : vector<2x32xf32>, vector<2x224xf32> -> vector<2x256xf32>
      %c59 = arith.constant 59 : index
      %498 = memref.load %arg2[%c59] : memref<98xf32, #tpu.memory_space<smem>>
      %499 = vector.broadcast %498 : f32 to vector<2x256xf32>
      %500 = arith.mulf %499, %497 : vector<2x256xf32>
      %501 = arith.addf %473, %500 : vector<2x256xf32>
      %cst_109 = arith.constant 0.000000e+00 : f32
      %502 = vector.broadcast %cst_109 : f32 to vector<2x31xf32>
      %503 = vector.extract_strided_slice %72 {offsets = [0, 0], sizes = [2, 225], strides = [1, 1]} : vector<2x256xf32> to vector<2x225xf32>
      %504 = tpu.concatenate %502, %503 in 1 : vector<2x31xf32>, vector<2x225xf32> -> vector<2x256xf32>
      %c60 = arith.constant 60 : index
      %505 = memref.load %arg2[%c60] : memref<98xf32, #tpu.memory_space<smem>>
      %506 = vector.broadcast %505 : f32 to vector<2x256xf32>
      %507 = arith.mulf %506, %504 : vector<2x256xf32>
      %508 = arith.addf %480, %507 : vector<2x256xf32>
      %cst_110 = arith.constant 0.000000e+00 : f32
      %509 = vector.broadcast %cst_110 : f32 to vector<2x30xf32>
      %510 = vector.extract_strided_slice %76 {offsets = [0, 0], sizes = [2, 226], strides = [1, 1]} : vector<2x256xf32> to vector<2x226xf32>
      %511 = tpu.concatenate %509, %510 in 1 : vector<2x30xf32>, vector<2x226xf32> -> vector<2x256xf32>
      %c61 = arith.constant 61 : index
      %512 = memref.load %arg2[%c61] : memref<98xf32, #tpu.memory_space<smem>>
      %513 = vector.broadcast %512 : f32 to vector<2x256xf32>
      %514 = arith.mulf %513, %511 : vector<2x256xf32>
      %515 = arith.addf %487, %514 : vector<2x256xf32>
      %cst_111 = arith.constant 0.000000e+00 : f32
      %516 = vector.broadcast %cst_111 : f32 to vector<2x29xf32>
      %517 = vector.extract_strided_slice %80 {offsets = [0, 0], sizes = [2, 227], strides = [1, 1]} : vector<2x256xf32> to vector<2x227xf32>
      %518 = tpu.concatenate %516, %517 in 1 : vector<2x29xf32>, vector<2x227xf32> -> vector<2x256xf32>
      %c62 = arith.constant 62 : index
      %519 = memref.load %arg2[%c62] : memref<98xf32, #tpu.memory_space<smem>>
      %520 = vector.broadcast %519 : f32 to vector<2x256xf32>
      %521 = arith.mulf %520, %518 : vector<2x256xf32>
      %522 = arith.addf %494, %521 : vector<2x256xf32>
      %cst_112 = arith.constant 0.000000e+00 : f32
      %523 = vector.broadcast %cst_112 : f32 to vector<2x19xf32>
      %524 = vector.extract_strided_slice %60 {offsets = [0, 0], sizes = [2, 237], strides = [1, 1]} : vector<2x256xf32> to vector<2x237xf32>
      %525 = tpu.concatenate %523, %524 in 1 : vector<2x19xf32>, vector<2x237xf32> -> vector<2x256xf32>
      %c63 = arith.constant 63 : index
      %526 = memref.load %arg2[%c63] : memref<98xf32, #tpu.memory_space<smem>>
      %527 = vector.broadcast %526 : f32 to vector<2x256xf32>
      %528 = arith.mulf %527, %525 : vector<2x256xf32>
      %529 = arith.addf %501, %528 : vector<2x256xf32>
      %cst_113 = arith.constant 0.000000e+00 : f32
      %530 = vector.broadcast %cst_113 : f32 to vector<2x18xf32>
      %531 = vector.extract_strided_slice %64 {offsets = [0, 0], sizes = [2, 238], strides = [1, 1]} : vector<2x256xf32> to vector<2x238xf32>
      %532 = tpu.concatenate %530, %531 in 1 : vector<2x18xf32>, vector<2x238xf32> -> vector<2x256xf32>
      %c64 = arith.constant 64 : index
      %533 = memref.load %arg2[%c64] : memref<98xf32, #tpu.memory_space<smem>>
      %534 = vector.broadcast %533 : f32 to vector<2x256xf32>
      %535 = arith.mulf %534, %532 : vector<2x256xf32>
      %536 = arith.addf %508, %535 : vector<2x256xf32>
      %cst_114 = arith.constant 0.000000e+00 : f32
      %537 = vector.broadcast %cst_114 : f32 to vector<2x17xf32>
      %538 = vector.extract_strided_slice %68 {offsets = [0, 0], sizes = [2, 239], strides = [1, 1]} : vector<2x256xf32> to vector<2x239xf32>
      %539 = tpu.concatenate %537, %538 in 1 : vector<2x17xf32>, vector<2x239xf32> -> vector<2x256xf32>
      %c65 = arith.constant 65 : index
      %540 = memref.load %arg2[%c65] : memref<98xf32, #tpu.memory_space<smem>>
      %541 = vector.broadcast %540 : f32 to vector<2x256xf32>
      %542 = arith.mulf %541, %539 : vector<2x256xf32>
      %543 = arith.addf %515, %542 : vector<2x256xf32>
      %cst_115 = arith.constant 0.000000e+00 : f32
      %544 = vector.broadcast %cst_115 : f32 to vector<2x16xf32>
      %545 = vector.extract_strided_slice %29 {offsets = [0, 0], sizes = [2, 240], strides = [1, 1]} : vector<2x256xf32> to vector<2x240xf32>
      %546 = tpu.concatenate %544, %545 in 1 : vector<2x16xf32>, vector<2x240xf32> -> vector<2x256xf32>
      %c66 = arith.constant 66 : index
      %547 = memref.load %arg2[%c66] : memref<98xf32, #tpu.memory_space<smem>>
      %548 = vector.broadcast %547 : f32 to vector<2x256xf32>
      %549 = arith.mulf %548, %546 : vector<2x256xf32>
      %550 = arith.addf %522, %549 : vector<2x256xf32>
      %cst_116 = arith.constant 0.000000e+00 : f32
      %551 = vector.broadcast %cst_116 : f32 to vector<2x15xf32>
      %552 = vector.extract_strided_slice %72 {offsets = [0, 0], sizes = [2, 241], strides = [1, 1]} : vector<2x256xf32> to vector<2x241xf32>
      %553 = tpu.concatenate %551, %552 in 1 : vector<2x15xf32>, vector<2x241xf32> -> vector<2x256xf32>
      %c67 = arith.constant 67 : index
      %554 = memref.load %arg2[%c67] : memref<98xf32, #tpu.memory_space<smem>>
      %555 = vector.broadcast %554 : f32 to vector<2x256xf32>
      %556 = arith.mulf %555, %553 : vector<2x256xf32>
      %557 = arith.addf %529, %556 : vector<2x256xf32>
      %cst_117 = arith.constant 0.000000e+00 : f32
      %558 = vector.broadcast %cst_117 : f32 to vector<2x14xf32>
      %559 = vector.extract_strided_slice %76 {offsets = [0, 0], sizes = [2, 242], strides = [1, 1]} : vector<2x256xf32> to vector<2x242xf32>
      %560 = tpu.concatenate %558, %559 in 1 : vector<2x14xf32>, vector<2x242xf32> -> vector<2x256xf32>
      %c68 = arith.constant 68 : index
      %561 = memref.load %arg2[%c68] : memref<98xf32, #tpu.memory_space<smem>>
      %562 = vector.broadcast %561 : f32 to vector<2x256xf32>
      %563 = arith.mulf %562, %560 : vector<2x256xf32>
      %564 = arith.addf %536, %563 : vector<2x256xf32>
      %cst_118 = arith.constant 0.000000e+00 : f32
      %565 = vector.broadcast %cst_118 : f32 to vector<2x13xf32>
      %566 = vector.extract_strided_slice %80 {offsets = [0, 0], sizes = [2, 243], strides = [1, 1]} : vector<2x256xf32> to vector<2x243xf32>
      %567 = tpu.concatenate %565, %566 in 1 : vector<2x13xf32>, vector<2x243xf32> -> vector<2x256xf32>
      %c69 = arith.constant 69 : index
      %568 = memref.load %arg2[%c69] : memref<98xf32, #tpu.memory_space<smem>>
      %569 = vector.broadcast %568 : f32 to vector<2x256xf32>
      %570 = arith.mulf %569, %567 : vector<2x256xf32>
      %571 = arith.addf %543, %570 : vector<2x256xf32>
      %cst_119 = arith.constant 0.000000e+00 : f32
      %572 = vector.broadcast %cst_119 : f32 to vector<2x3xf32>
      %573 = vector.extract_strided_slice %60 {offsets = [0, 0], sizes = [2, 253], strides = [1, 1]} : vector<2x256xf32> to vector<2x253xf32>
      %574 = tpu.concatenate %572, %573 in 1 : vector<2x3xf32>, vector<2x253xf32> -> vector<2x256xf32>
      %c70 = arith.constant 70 : index
      %575 = memref.load %arg2[%c70] : memref<98xf32, #tpu.memory_space<smem>>
      %576 = vector.broadcast %575 : f32 to vector<2x256xf32>
      %577 = arith.mulf %576, %574 : vector<2x256xf32>
      %578 = arith.addf %550, %577 : vector<2x256xf32>
      %cst_120 = arith.constant 0.000000e+00 : f32
      %579 = vector.broadcast %cst_120 : f32 to vector<2x2xf32>
      %580 = vector.extract_strided_slice %64 {offsets = [0, 0], sizes = [2, 254], strides = [1, 1]} : vector<2x256xf32> to vector<2x254xf32>
      %581 = tpu.concatenate %579, %580 in 1 : vector<2x2xf32>, vector<2x254xf32> -> vector<2x256xf32>
      %c71 = arith.constant 71 : index
      %582 = memref.load %arg2[%c71] : memref<98xf32, #tpu.memory_space<smem>>
      %583 = vector.broadcast %582 : f32 to vector<2x256xf32>
      %584 = arith.mulf %583, %581 : vector<2x256xf32>
      %585 = arith.addf %557, %584 : vector<2x256xf32>
      %cst_121 = arith.constant 0.000000e+00 : f32
      %586 = vector.broadcast %cst_121 : f32 to vector<2x1xf32>
      %587 = vector.extract_strided_slice %68 {offsets = [0, 0], sizes = [2, 255], strides = [1, 1]} : vector<2x256xf32> to vector<2x255xf32>
      %588 = tpu.concatenate %586, %587 in 1 : vector<2x1xf32>, vector<2x255xf32> -> vector<2x256xf32>
      %c72 = arith.constant 72 : index
      %589 = memref.load %arg2[%c72] : memref<98xf32, #tpu.memory_space<smem>>
      %590 = vector.broadcast %589 : f32 to vector<2x256xf32>
      %591 = arith.mulf %590, %588 : vector<2x256xf32>
      %592 = arith.addf %564, %591 : vector<2x256xf32>
      %c73 = arith.constant 73 : index
      %593 = memref.load %arg2[%c73] : memref<98xf32, #tpu.memory_space<smem>>
      %594 = vector.broadcast %593 : f32 to vector<2x256xf32>
      %595 = arith.mulf %594, %29 : vector<2x256xf32>
      %596 = arith.addf %571, %595 : vector<2x256xf32>
      %597 = vector.extract_strided_slice %72 {offsets = [0, 1], sizes = [2, 255], strides = [1, 1]} : vector<2x256xf32> to vector<2x255xf32>
      %cst_122 = arith.constant 0.000000e+00 : f32
      %598 = vector.broadcast %cst_122 : f32 to vector<2x1xf32>
      %599 = tpu.concatenate %597, %598 in 1 : vector<2x255xf32>, vector<2x1xf32> -> vector<2x256xf32>
      %c74 = arith.constant 74 : index
      %600 = memref.load %arg2[%c74] : memref<98xf32, #tpu.memory_space<smem>>
      %601 = vector.broadcast %600 : f32 to vector<2x256xf32>
      %602 = arith.mulf %601, %599 : vector<2x256xf32>
      %603 = arith.addf %578, %602 : vector<2x256xf32>
      %604 = vector.extract_strided_slice %76 {offsets = [0, 2], sizes = [2, 254], strides = [1, 1]} : vector<2x256xf32> to vector<2x254xf32>
      %cst_123 = arith.constant 0.000000e+00 : f32
      %605 = vector.broadcast %cst_123 : f32 to vector<2x2xf32>
      %606 = tpu.concatenate %604, %605 in 1 : vector<2x254xf32>, vector<2x2xf32> -> vector<2x256xf32>
      %c75 = arith.constant 75 : index
      %607 = memref.load %arg2[%c75] : memref<98xf32, #tpu.memory_space<smem>>
      %608 = vector.broadcast %607 : f32 to vector<2x256xf32>
      %609 = arith.mulf %608, %606 : vector<2x256xf32>
      %610 = arith.addf %585, %609 : vector<2x256xf32>
      %611 = vector.extract_strided_slice %80 {offsets = [0, 3], sizes = [2, 253], strides = [1, 1]} : vector<2x256xf32> to vector<2x253xf32>
      %cst_124 = arith.constant 0.000000e+00 : f32
      %612 = vector.broadcast %cst_124 : f32 to vector<2x3xf32>
      %613 = tpu.concatenate %611, %612 in 1 : vector<2x253xf32>, vector<2x3xf32> -> vector<2x256xf32>
      %c76 = arith.constant 76 : index
      %614 = memref.load %arg2[%c76] : memref<98xf32, #tpu.memory_space<smem>>
      %615 = vector.broadcast %614 : f32 to vector<2x256xf32>
      %616 = arith.mulf %615, %613 : vector<2x256xf32>
      %617 = arith.addf %592, %616 : vector<2x256xf32>
      %618 = vector.extract_strided_slice %60 {offsets = [0, 13], sizes = [2, 243], strides = [1, 1]} : vector<2x256xf32> to vector<2x243xf32>
      %cst_125 = arith.constant 0.000000e+00 : f32
      %619 = vector.broadcast %cst_125 : f32 to vector<2x13xf32>
      %620 = tpu.concatenate %618, %619 in 1 : vector<2x243xf32>, vector<2x13xf32> -> vector<2x256xf32>
      %c77 = arith.constant 77 : index
      %621 = memref.load %arg2[%c77] : memref<98xf32, #tpu.memory_space<smem>>
      %622 = vector.broadcast %621 : f32 to vector<2x256xf32>
      %623 = arith.mulf %622, %620 : vector<2x256xf32>
      %624 = arith.addf %596, %623 : vector<2x256xf32>
      %625 = vector.extract_strided_slice %64 {offsets = [0, 14], sizes = [2, 242], strides = [1, 1]} : vector<2x256xf32> to vector<2x242xf32>
      %cst_126 = arith.constant 0.000000e+00 : f32
      %626 = vector.broadcast %cst_126 : f32 to vector<2x14xf32>
      %627 = tpu.concatenate %625, %626 in 1 : vector<2x242xf32>, vector<2x14xf32> -> vector<2x256xf32>
      %c78 = arith.constant 78 : index
      %628 = memref.load %arg2[%c78] : memref<98xf32, #tpu.memory_space<smem>>
      %629 = vector.broadcast %628 : f32 to vector<2x256xf32>
      %630 = arith.mulf %629, %627 : vector<2x256xf32>
      %631 = arith.addf %603, %630 : vector<2x256xf32>
      %632 = vector.extract_strided_slice %68 {offsets = [0, 15], sizes = [2, 241], strides = [1, 1]} : vector<2x256xf32> to vector<2x241xf32>
      %cst_127 = arith.constant 0.000000e+00 : f32
      %633 = vector.broadcast %cst_127 : f32 to vector<2x15xf32>
      %634 = tpu.concatenate %632, %633 in 1 : vector<2x241xf32>, vector<2x15xf32> -> vector<2x256xf32>
      %c79 = arith.constant 79 : index
      %635 = memref.load %arg2[%c79] : memref<98xf32, #tpu.memory_space<smem>>
      %636 = vector.broadcast %635 : f32 to vector<2x256xf32>
      %637 = arith.mulf %636, %634 : vector<2x256xf32>
      %638 = arith.addf %610, %637 : vector<2x256xf32>
      %639 = vector.extract_strided_slice %29 {offsets = [0, 16], sizes = [2, 240], strides = [1, 1]} : vector<2x256xf32> to vector<2x240xf32>
      %cst_128 = arith.constant 0.000000e+00 : f32
      %640 = vector.broadcast %cst_128 : f32 to vector<2x16xf32>
      %641 = tpu.concatenate %639, %640 in 1 : vector<2x240xf32>, vector<2x16xf32> -> vector<2x256xf32>
      %c80 = arith.constant 80 : index
      %642 = memref.load %arg2[%c80] : memref<98xf32, #tpu.memory_space<smem>>
      %643 = vector.broadcast %642 : f32 to vector<2x256xf32>
      %644 = arith.mulf %643, %641 : vector<2x256xf32>
      %645 = arith.addf %617, %644 : vector<2x256xf32>
      %646 = vector.extract_strided_slice %72 {offsets = [0, 17], sizes = [2, 239], strides = [1, 1]} : vector<2x256xf32> to vector<2x239xf32>
      %cst_129 = arith.constant 0.000000e+00 : f32
      %647 = vector.broadcast %cst_129 : f32 to vector<2x17xf32>
      %648 = tpu.concatenate %646, %647 in 1 : vector<2x239xf32>, vector<2x17xf32> -> vector<2x256xf32>
      %c81 = arith.constant 81 : index
      %649 = memref.load %arg2[%c81] : memref<98xf32, #tpu.memory_space<smem>>
      %650 = vector.broadcast %649 : f32 to vector<2x256xf32>
      %651 = arith.mulf %650, %648 : vector<2x256xf32>
      %652 = arith.addf %624, %651 : vector<2x256xf32>
      %653 = vector.extract_strided_slice %76 {offsets = [0, 18], sizes = [2, 238], strides = [1, 1]} : vector<2x256xf32> to vector<2x238xf32>
      %cst_130 = arith.constant 0.000000e+00 : f32
      %654 = vector.broadcast %cst_130 : f32 to vector<2x18xf32>
      %655 = tpu.concatenate %653, %654 in 1 : vector<2x238xf32>, vector<2x18xf32> -> vector<2x256xf32>
      %c82 = arith.constant 82 : index
      %656 = memref.load %arg2[%c82] : memref<98xf32, #tpu.memory_space<smem>>
      %657 = vector.broadcast %656 : f32 to vector<2x256xf32>
      %658 = arith.mulf %657, %655 : vector<2x256xf32>
      %659 = arith.addf %631, %658 : vector<2x256xf32>
      %660 = vector.extract_strided_slice %80 {offsets = [0, 19], sizes = [2, 237], strides = [1, 1]} : vector<2x256xf32> to vector<2x237xf32>
      %cst_131 = arith.constant 0.000000e+00 : f32
      %661 = vector.broadcast %cst_131 : f32 to vector<2x19xf32>
      %662 = tpu.concatenate %660, %661 in 1 : vector<2x237xf32>, vector<2x19xf32> -> vector<2x256xf32>
      %c83 = arith.constant 83 : index
      %663 = memref.load %arg2[%c83] : memref<98xf32, #tpu.memory_space<smem>>
      %664 = vector.broadcast %663 : f32 to vector<2x256xf32>
      %665 = arith.mulf %664, %662 : vector<2x256xf32>
      %666 = arith.addf %638, %665 : vector<2x256xf32>
      %667 = vector.extract_strided_slice %60 {offsets = [0, 29], sizes = [2, 227], strides = [1, 1]} : vector<2x256xf32> to vector<2x227xf32>
      %cst_132 = arith.constant 0.000000e+00 : f32
      %668 = vector.broadcast %cst_132 : f32 to vector<2x29xf32>
      %669 = tpu.concatenate %667, %668 in 1 : vector<2x227xf32>, vector<2x29xf32> -> vector<2x256xf32>
      %c84 = arith.constant 84 : index
      %670 = memref.load %arg2[%c84] : memref<98xf32, #tpu.memory_space<smem>>
      %671 = vector.broadcast %670 : f32 to vector<2x256xf32>
      %672 = arith.mulf %671, %669 : vector<2x256xf32>
      %673 = arith.addf %645, %672 : vector<2x256xf32>
      %674 = vector.extract_strided_slice %64 {offsets = [0, 30], sizes = [2, 226], strides = [1, 1]} : vector<2x256xf32> to vector<2x226xf32>
      %cst_133 = arith.constant 0.000000e+00 : f32
      %675 = vector.broadcast %cst_133 : f32 to vector<2x30xf32>
      %676 = tpu.concatenate %674, %675 in 1 : vector<2x226xf32>, vector<2x30xf32> -> vector<2x256xf32>
      %c85 = arith.constant 85 : index
      %677 = memref.load %arg2[%c85] : memref<98xf32, #tpu.memory_space<smem>>
      %678 = vector.broadcast %677 : f32 to vector<2x256xf32>
      %679 = arith.mulf %678, %676 : vector<2x256xf32>
      %680 = arith.addf %652, %679 : vector<2x256xf32>
      %681 = vector.extract_strided_slice %68 {offsets = [0, 31], sizes = [2, 225], strides = [1, 1]} : vector<2x256xf32> to vector<2x225xf32>
      %cst_134 = arith.constant 0.000000e+00 : f32
      %682 = vector.broadcast %cst_134 : f32 to vector<2x31xf32>
      %683 = tpu.concatenate %681, %682 in 1 : vector<2x225xf32>, vector<2x31xf32> -> vector<2x256xf32>
      %c86 = arith.constant 86 : index
      %684 = memref.load %arg2[%c86] : memref<98xf32, #tpu.memory_space<smem>>
      %685 = vector.broadcast %684 : f32 to vector<2x256xf32>
      %686 = arith.mulf %685, %683 : vector<2x256xf32>
      %687 = arith.addf %659, %686 : vector<2x256xf32>
      %688 = vector.extract_strided_slice %29 {offsets = [0, 32], sizes = [2, 224], strides = [1, 1]} : vector<2x256xf32> to vector<2x224xf32>
      %cst_135 = arith.constant 0.000000e+00 : f32
      %689 = vector.broadcast %cst_135 : f32 to vector<2x32xf32>
      %690 = tpu.concatenate %688, %689 in 1 : vector<2x224xf32>, vector<2x32xf32> -> vector<2x256xf32>
      %c87 = arith.constant 87 : index
      %691 = memref.load %arg2[%c87] : memref<98xf32, #tpu.memory_space<smem>>
      %692 = vector.broadcast %691 : f32 to vector<2x256xf32>
      %693 = arith.mulf %692, %690 : vector<2x256xf32>
      %694 = arith.addf %666, %693 : vector<2x256xf32>
      %695 = vector.extract_strided_slice %72 {offsets = [0, 33], sizes = [2, 223], strides = [1, 1]} : vector<2x256xf32> to vector<2x223xf32>
      %cst_136 = arith.constant 0.000000e+00 : f32
      %696 = vector.broadcast %cst_136 : f32 to vector<2x33xf32>
      %697 = tpu.concatenate %695, %696 in 1 : vector<2x223xf32>, vector<2x33xf32> -> vector<2x256xf32>
      %c88 = arith.constant 88 : index
      %698 = memref.load %arg2[%c88] : memref<98xf32, #tpu.memory_space<smem>>
      %699 = vector.broadcast %698 : f32 to vector<2x256xf32>
      %700 = arith.mulf %699, %697 : vector<2x256xf32>
      %701 = arith.addf %673, %700 : vector<2x256xf32>
      %702 = vector.extract_strided_slice %76 {offsets = [0, 34], sizes = [2, 222], strides = [1, 1]} : vector<2x256xf32> to vector<2x222xf32>
      %cst_137 = arith.constant 0.000000e+00 : f32
      %703 = vector.broadcast %cst_137 : f32 to vector<2x34xf32>
      %704 = tpu.concatenate %702, %703 in 1 : vector<2x222xf32>, vector<2x34xf32> -> vector<2x256xf32>
      %c89 = arith.constant 89 : index
      %705 = memref.load %arg2[%c89] : memref<98xf32, #tpu.memory_space<smem>>
      %706 = vector.broadcast %705 : f32 to vector<2x256xf32>
      %707 = arith.mulf %706, %704 : vector<2x256xf32>
      %708 = arith.addf %680, %707 : vector<2x256xf32>
      %709 = vector.extract_strided_slice %80 {offsets = [0, 35], sizes = [2, 221], strides = [1, 1]} : vector<2x256xf32> to vector<2x221xf32>
      %cst_138 = arith.constant 0.000000e+00 : f32
      %710 = vector.broadcast %cst_138 : f32 to vector<2x35xf32>
      %711 = tpu.concatenate %709, %710 in 1 : vector<2x221xf32>, vector<2x35xf32> -> vector<2x256xf32>
      %c90 = arith.constant 90 : index
      %712 = memref.load %arg2[%c90] : memref<98xf32, #tpu.memory_space<smem>>
      %713 = vector.broadcast %712 : f32 to vector<2x256xf32>
      %714 = arith.mulf %713, %711 : vector<2x256xf32>
      %715 = arith.addf %687, %714 : vector<2x256xf32>
      %716 = vector.extract_strided_slice %60 {offsets = [0, 45], sizes = [2, 211], strides = [1, 1]} : vector<2x256xf32> to vector<2x211xf32>
      %cst_139 = arith.constant 0.000000e+00 : f32
      %717 = vector.broadcast %cst_139 : f32 to vector<2x45xf32>
      %718 = tpu.concatenate %716, %717 in 1 : vector<2x211xf32>, vector<2x45xf32> -> vector<2x256xf32>
      %c91 = arith.constant 91 : index
      %719 = memref.load %arg2[%c91] : memref<98xf32, #tpu.memory_space<smem>>
      %720 = vector.broadcast %719 : f32 to vector<2x256xf32>
      %721 = arith.mulf %720, %718 : vector<2x256xf32>
      %722 = arith.addf %694, %721 : vector<2x256xf32>
      %723 = vector.extract_strided_slice %64 {offsets = [0, 46], sizes = [2, 210], strides = [1, 1]} : vector<2x256xf32> to vector<2x210xf32>
      %cst_140 = arith.constant 0.000000e+00 : f32
      %724 = vector.broadcast %cst_140 : f32 to vector<2x46xf32>
      %725 = tpu.concatenate %723, %724 in 1 : vector<2x210xf32>, vector<2x46xf32> -> vector<2x256xf32>
      %c92 = arith.constant 92 : index
      %726 = memref.load %arg2[%c92] : memref<98xf32, #tpu.memory_space<smem>>
      %727 = vector.broadcast %726 : f32 to vector<2x256xf32>
      %728 = arith.mulf %727, %725 : vector<2x256xf32>
      %729 = arith.addf %701, %728 : vector<2x256xf32>
      %730 = vector.extract_strided_slice %68 {offsets = [0, 47], sizes = [2, 209], strides = [1, 1]} : vector<2x256xf32> to vector<2x209xf32>
      %cst_141 = arith.constant 0.000000e+00 : f32
      %731 = vector.broadcast %cst_141 : f32 to vector<2x47xf32>
      %732 = tpu.concatenate %730, %731 in 1 : vector<2x209xf32>, vector<2x47xf32> -> vector<2x256xf32>
      %c93 = arith.constant 93 : index
      %733 = memref.load %arg2[%c93] : memref<98xf32, #tpu.memory_space<smem>>
      %734 = vector.broadcast %733 : f32 to vector<2x256xf32>
      %735 = arith.mulf %734, %732 : vector<2x256xf32>
      %736 = arith.addf %708, %735 : vector<2x256xf32>
      %737 = vector.extract_strided_slice %29 {offsets = [0, 48], sizes = [2, 208], strides = [1, 1]} : vector<2x256xf32> to vector<2x208xf32>
      %cst_142 = arith.constant 0.000000e+00 : f32
      %738 = vector.broadcast %cst_142 : f32 to vector<2x48xf32>
      %739 = tpu.concatenate %737, %738 in 1 : vector<2x208xf32>, vector<2x48xf32> -> vector<2x256xf32>
      %c94 = arith.constant 94 : index
      %740 = memref.load %arg2[%c94] : memref<98xf32, #tpu.memory_space<smem>>
      %741 = vector.broadcast %740 : f32 to vector<2x256xf32>
      %742 = arith.mulf %741, %739 : vector<2x256xf32>
      %743 = arith.addf %715, %742 : vector<2x256xf32>
      %744 = vector.extract_strided_slice %72 {offsets = [0, 49], sizes = [2, 207], strides = [1, 1]} : vector<2x256xf32> to vector<2x207xf32>
      %cst_143 = arith.constant 0.000000e+00 : f32
      %745 = vector.broadcast %cst_143 : f32 to vector<2x49xf32>
      %746 = tpu.concatenate %744, %745 in 1 : vector<2x207xf32>, vector<2x49xf32> -> vector<2x256xf32>
      %c95 = arith.constant 95 : index
      %747 = memref.load %arg2[%c95] : memref<98xf32, #tpu.memory_space<smem>>
      %748 = vector.broadcast %747 : f32 to vector<2x256xf32>
      %749 = arith.mulf %748, %746 : vector<2x256xf32>
      %750 = arith.addf %722, %749 : vector<2x256xf32>
      %751 = vector.extract_strided_slice %76 {offsets = [0, 50], sizes = [2, 206], strides = [1, 1]} : vector<2x256xf32> to vector<2x206xf32>
      %cst_144 = arith.constant 0.000000e+00 : f32
      %752 = vector.broadcast %cst_144 : f32 to vector<2x50xf32>
      %753 = tpu.concatenate %751, %752 in 1 : vector<2x206xf32>, vector<2x50xf32> -> vector<2x256xf32>
      %c96 = arith.constant 96 : index
      %754 = memref.load %arg2[%c96] : memref<98xf32, #tpu.memory_space<smem>>
      %755 = vector.broadcast %754 : f32 to vector<2x256xf32>
      %756 = arith.mulf %755, %753 : vector<2x256xf32>
      %757 = arith.addf %729, %756 : vector<2x256xf32>
      %758 = vector.extract_strided_slice %80 {offsets = [0, 51], sizes = [2, 205], strides = [1, 1]} : vector<2x256xf32> to vector<2x205xf32>
      %cst_145 = arith.constant 0.000000e+00 : f32
      %759 = vector.broadcast %cst_145 : f32 to vector<2x51xf32>
      %760 = tpu.concatenate %758, %759 in 1 : vector<2x205xf32>, vector<2x51xf32> -> vector<2x256xf32>
      %c97 = arith.constant 97 : index
      %761 = memref.load %arg2[%c97] : memref<98xf32, #tpu.memory_space<smem>>
      %762 = vector.broadcast %761 : f32 to vector<2x256xf32>
      %763 = arith.mulf %762, %760 : vector<2x256xf32>
      %764 = arith.addf %736, %763 : vector<2x256xf32>
      %765 = arith.addf %757, %764 : vector<2x256xf32>
      %766 = arith.addf %743, %750 : vector<2x256xf32>
      %767 = arith.addf %765, %766 : vector<2x256xf32>
      %768 = arith.negf %767 : vector<2x256xf32>
      %769 = math.exp %768 : vector<2x256xf32>
      %cst_146 = arith.constant 1.000000e+00 : f32
      %770 = vector.broadcast %cst_146 : f32 to vector<2x256xf32>
      %771 = arith.addf %770, %769 : vector<2x256xf32>
      %772 = arith.divf %770, %771 : vector<2x256xf32>
      %c0_147 = arith.constant 0 : index
      %c0_148 = arith.constant 0 : index
      %c0_149 = arith.constant 0 : index
      %773 = vector.load %arg4[%c0_147, %c0_148, %c0_149] : memref<2x1x256xf32, #tpu.memory_space<vmem>>, vector<2x1x256xf32>
      %774 = vector.shape_cast %773 : vector<2x1x256xf32> to vector<2x256xf32>
      %775 = vector.shape_cast %772 : vector<2x256xf32> to vector<2x1x256xf32>
      tpu.vector_store %arg4[%c0_147, %c0_148, %c0_149], %775 {strides = array<i32>} : memref<2x1x256xf32, #tpu.memory_space<vmem>>, vector<2x1x256xf32>,
    } else {
    }
    return
  }
  func.func @transform_0(%arg0: i32, %arg1: i32) -> i32 {
    %c0_i32 = arith.constant 0 : i32
    %c0_i32_0 = arith.constant 0 : i32
    return %c0_i32 : i32
  }
  func.func @transform_1(%arg0: i32, %arg1: i32) -> (i32, i32, i32) {
    %c0_i32 = arith.constant 0 : i32
    %c0_i32_0 = arith.constant 0 : i32
    return %arg0, %arg1, %c0_i32 : i32, i32, i32
  }
  func.func @transform_2(%arg0: i32, %arg1: i32) -> (i32, i32, i32) {
    %c0_i32 = arith.constant 0 : i32
    %c0_i32_0 = arith.constant 0 : i32
    %c0_i32_1 = arith.constant 0 : i32
    return %arg0, %c0_i32, %c0_i32_0 : i32, i32, i32
  }
}

</mosaic_0001>

<bundles_post_ra>
// kernel: tpu_custom_call.1
= control target key start
LH: loop header
LB: loop body
LE: loop exit
PB: predicated region body
PF: predicated region fallthrough
CT: control target
= control target key end

     0   :  { %s3725_s0 = inlined_call_operand.hbm [shape: f32[98], index: 0, kind: input, shape index: {}]   ;;  %s3726_s1 = inlined_call_operand.hbm [shape: f32[2,4,256], index: 1, kind: input, shape index: {}]   ;;  %s3727_s2 = inlined_call_operand.hbm [shape: f32[2,1,256], index: 2, kind: output, shape index: {}]  }
   0x1   :  { %3888 = sst [smem:[#allocation64_spill]] %s3727_s2 }
   0x2   :  { %7 = vsyncpa [#allocation7], 0 }
   0x3   :  { %8 = vsyncpa [#allocation5], 0 }
   0x4   :  { %9 = vsyncpa [#allocation6], 0  ;;  %s1851_s11 = scalar_lea.hbm %s3725_s0, 16 }
   0x5   :  { %p1852_p0 = scmp.ne.s32.totalorder %s3725_s0, %s1851_s11  ;;  %p1855_p1 = scmp.lt.u32.totalorder %s1851_s11, %s3725_s0 }
   0x7   :  { %p1857_p2 = pnand %p1855_p1, %p1852_p0 }
   0x9   :  { %1860 = shalt.err (!%p1857_p2)
}
   0xa   :  { %s1911_s16 = smov [#allocation4]   ;;  %s1912_s19 = smov [#allocation8]  }
   0xb   :  { %17 = dma.hbm_to_smem %s3725_s0, 16, %s1911_s16, [#allocation7]  }
   0xc   :  { %s23_s20 = sshll.u32 %s1912_s19, 4  ;;  %s1861_s23 = scalar_lea.hbm %s3726_s1, 256  ;;  %s24_s20 = int_to_ptr.vmem [resolvable:$true] %s23_s20 }
   0xd   :  { %p1862_p3 = scmp.ne.s32.totalorder %s3726_s1, %s1861_s23  ;;  %p1865_p4 = scmp.lt.u32.totalorder %s1861_s23, %s3726_s1 }
   0xf   :  { %p1867_p5 = pnand %p1865_p4, %p1862_p3 }
  0x11   :  { %1870 = shalt.err (!%p1867_p5)
}
  0x12   :  { %s1871_s28 = scalar_lea.vmem %s24_s20, 256  ;;  %p1876_p7 = scmp.lt.s32.totalorder %s24_s20, %s24_s20 }
  0x13   :  { %p1872_p6 = scmp.ne.s32.totalorder %s24_s20, %s1871_s28  ;;  %p1877_p8 = scmp.lt.s32.totalorder %s1871_s28, %s1871_s28 }
  0x15   :  { %p1878_p9 = por %p1877_p8, %p1876_p7 }
  0x17   :  { %p1879_p10 = pnand %p1878_p9, %p1872_p6 }
  0x19   :  { %1882 = shalt.err (!%p1879_p10)
}
  0x1a   :  { %s1913_s0 = smov 128   ;;  %s1914_s29 = smov 8  }
  0x1b   :  { %29 = dma.hbm_to_vmem [thread:$0]  %s3726_s1, 256, %s24_s20, [#allocation5], %s1913_s0, %s1913_s0, %s1914_s29  }
  0x1c   :  { %1905 = dma.done.wait [#allocation7], 16  }
  0x1d   :  { %1906 = vsyncadd [#allocation7], 4294967280 }
  0x1e   :  { %1907 = dma.done.wait [#allocation5], 256  }
  0x1f   :  { %1908 = vsyncadd [#allocation5], 4294967040 }
  0x20   :  { %36 = sfence }
  0x21   :  { %v37_v0 = vld [vmem:[#allocation8] ss:$4 sm:$0x3]  ;;  %v39_v1 = vld [vmem:[#allocation8 + $0x8] ss:$4 sm:$0x3]  ;;  %v3764_v12 = vlaneseq }
  0x22   :  { %v41_v2 = vld [vmem:[#allocation8 + $0x1] ss:$4 sm:$0x3]  ;;  %v43_v3 = vld [vmem:[#allocation8 + $0x9] ss:$4 sm:$0x3] }
  0x23   :  { %v44_v4 = vadd.f32 %v41_v2, %v37_v0  ;;  %v45_v5 = vadd.f32 %v43_v3, %v39_v1  ;;  %v46_v6 = vmax.f32 %v37_v0, %v41_v2  ;;  %v47_v7 = vmax.f32 %v39_v1, %v43_v3  ;;  %v49_v8 = vld [vmem:[#allocation8 + $0x2] ss:$4 sm:$0x3]  ;;  %v51_v9 = vld [vmem:[#allocation8 + $0xa] ss:$4 sm:$0x3] }
  0x24   :  { %v57_v10 = vld [vmem:[#allocation8 + $0x3] ss:$4 sm:$0x3]  ;;  %v59_v11 = vld [vmem:[#allocation8 + $0xb] ss:$4 sm:$0x3] }
  0x25   :  { %v52_v13 = vadd.f32 %v49_v8, %v44_v4  ;;  %v53_v14 = vadd.f32 %v51_v9, %v45_v5  ;;  %v54_v15 = vmax.f32 %v46_v6, %v49_v8  ;;  %v55_v16 = vmax.f32 %v47_v7, %v51_v9  ;;  %s1919_s1 = smov 48   ;;  %s1920_s4 = smov 50  }
  0x26   :  { %v1915_v21 = vmov 0.0   ;;  %v1916_v22 = vmov -inf   ;;  %v1917_v23 = vmov 1935823168   ;;  %v2009_v25 = vshrl.u32 %v3764_v12, 7  ;;  %s1921_s5 = smov 51  }
  0x27   :  { %v60_v17 = vadd.f32 %v57_v10, %v52_v13  ;;  %v61_v18 = vadd.f32 %v59_v11, %v53_v14  ;;  %v62_v19 = vmax.f32 %v54_v15, %v57_v10  ;;  %v63_v20 = vmax.f32 %v55_v16, %v59_v11  ;;  %68 = vst [vmem:[#allocation2] sm:$0xf] %v1915_v21  ;;  %s1922_s6 = smov 49   ;;  %s1923_s7 = smov 47  }
  0x28   :  { %69 = vst [vmem:[#allocation3] sm:$0xf] %v1916_v22  ;;  %v75_v24 = vunpack.c.l.s4 %v1917_v23  ;;  %3889 = vst [vmem:[#allocation13_spill] sm:$0xff] %v2009_v25  ;;  %v1918_v36 = vmov 1983009808   ;;  %v105_v38 = vand.u32 127, %v3764_v12 }
  0x29   :  { %v73_v26 = vcombine.low %v60_v17, %v61_v18  ;;  %v87_v28 = vcombine.low %v62_v19, %v63_v20  ;;  %v113_v37 = vunpack.c.l.s4 %v1918_v36  ;;  %s1924_s8 = smov 46   ;;  %s1925_s9 = smov 45   ;;  %vm222_vm12 = vcmask 392192  }
  0x2a   :  { %v76_v27 = vunpack.c.0.s8 %v75_v24  ;;  %v2013_v40 = vand.u32 15, %v105_v38  ;;  %v106_v43 = vadd.s32 128, %v105_v38  ;;  %s1926_s10 = smov 35   ;;  %s1927_s11 = smov 34   ;;  %vm190_vm13 = vcmask 408576  }
  0x2b   :  { %v114_v39 = vunpack.c.0.s8 %v113_v37  ;;  %s1928_s12 = smov 33   ;;  %s3804_s13 = smov 32   ;;  %vm173_vm14 = vcmask 416768   ;;  %vm207_vm15 = vcmask 400384  }
  0x2c   :  { %v79_v29 = vsub.s32 %v76_v27, %v2009_v25  ;;  %vm124_vm0 = vcmp.lt.s32.totalorder %v2013_v40, 14  ;;  %vm109_vm1 = vcmp.lt.s32.totalorder %v2013_v40, 13  ;;  %v2026_v46 = vand.u32 15, %v106_v43  ;;  %s1930_s14 = smov 31   ;;  %s3809_s15 = smov 30  }
  0x2d   :  { %v2016_v41 = vsub.s32 %v114_v39, %v2009_v25  ;;  %vm128_vm2 = vcmp.lt.s32.totalorder %v2013_v40, 15  ;;  %vm132_vm4 = vcmp.ge.s32.totalorder %v2013_v40, 1  ;;  %vm136_vm6 = vcmp.ge.s32.totalorder %v2013_v40, 2  ;;  %s3807_s16 = smov 29   ;;  %s3805_s17 = smov 19  }
  0x2e   :  { %v70_v30 = vld [vmem:[#allocation2] sm:$0xf]  ;;  %v80_v31 = vrot.slane %v73_v26, %v79_v29  ;;  %v94_v33 = vrot.slane %v87_v28, %v79_v29  ;;  %vm125_vm3 = vcmp.lt.s32.totalorder %v2026_v46, 14  ;;  %vm129_vm5 = vcmp.lt.s32.totalorder %v2026_v46, 15  ;;  %s3800_s18 = smov 18   ;;  %s3797_s19 = smov 17  }
  0x2f   :  { %v84_v32 = vld [vmem:[#allocation3] sm:$0xf]  ;;  %3890 = vst [vmem:[#allocation14_spill] sm:$0xff] %v2016_v41  ;;  %vm133_vm7 = vcmp.ge.s32.totalorder %v2026_v46, 1  ;;  %vm140_vm8 = vcmp.ge.s32.totalorder %v2013_v40, 3  ;;  %vm137_vm9 = vcmp.ge.s32.totalorder %v2026_v46, 2 }
  0x30   :  { %v82_v34 = vadd.f32 %v80_v31, %v70_v30  ;;  %v96_v35 = vmax.f32 %v84_v32, %v94_v33  ;;  %vm141_vm10 = vcmp.ge.s32.totalorder %v2026_v46, 3  ;;  %vm110_vm11 = vcmp.lt.s32.totalorder %v2026_v46, 13  ;;  %s3795_s20 = smov 16   ;;  %s3793_s21 = smov 15  }
  0x31   :  { %s3791_s22 = smov 14   ;;  %s3789_s23 = smov 13  }
  0x32   :  { %83 = vst [vmem:[#allocation2] sm:$0xf] %v82_v34  ;;  %97 = vst [vmem:[#allocation3] sm:$0xf] %v96_v35  ;;  %s3786_s24 = smov 3   ;;  %s3784_s25 = smov 2  }
  0x33   :  { %s3782_s26 = smov 1   ;;  %s3780_s27 = smov 127  }
  0x34   :  { %s3778_s28 = smov 126   ;;  %s3776_s0 = smov 125  }
  0x35   :  { %s3728_s29 = smov 115   ;;  %s3730_s30 = smov 114  }
  0x36   :  { %s3732_s3 = smov 113   ;;  %s2601_s2 = sld [smem:[#allocation4 + $0x1e]] }
  0x39   :  { %v101_v42 = vld [vmem:[#allocation2] sm:$0xf]  ;;  %v2350_v32 = vld.sshfl [vmem:[#allocation3] sm:$0x33 pattern:$0x76325410] }
  0x3a   :  { %v2018_v44 = vmul.f32 0.25, %v101_v42  ;;  %v2368_v36 = vcombine.high %v2350_v32, %v2350_v32  ;;  %v2379_v38 = vsel %vm109_vm1, %v2350_v32, 0.0  ;;  %v2459_v12 = vsel %vm136_vm6, %v2350_v32, 0.0 }
  0x3b   :  { %3905 = vst [vmem:[#allocation29_spill] sm:$0xff] %v2459_v12 }
  0x3c   :  { %v2023_v45 = vrot.slane %v2018_v44, %v2016_v41  ;;  %v2386_v42 = vsel %vm110_vm11, %v2368_v36, 0.0 }
  0x3d   :  { %3893 = vst [vmem:[#allocation17_spill] sm:$0xff] %v2386_v42 }
  0x3e   :  { %218 = vrot.lane.b32.xlu0 %v2023_v45, %s1919_s1  ;;  %v2033_v47 = vsel %vm124_vm0, %v2023_v45, 0.0  ;;  %v2040_v48 = vsel %vm109_vm1, %v2023_v45, 0.0  ;;  %v2044_v49 = vcombine.high %v2023_v45, %v2023_v45  ;;  %v2055_v50 = vsel %vm128_vm2, %v2023_v45, 0.0 }
  0x3f   :  { %186 = vrot.lane.b32.xlu1 %v2033_v47, %s1920_s4  ;;  %v2071_v52 = vsel %vm132_vm4, %v2023_v45, 0.0  ;;  %v2087_v54 = vsel %vm136_vm6, %v2023_v45, 0.0  ;;  %v2103_v56 = vsel %vm140_vm8, %v2023_v45, 0.0  ;;  %vm256_vm1 = vcmask 375808  }
  0x40   :  { %v2060_v51 = vsel %vm125_vm3, %v2044_v49, 0.0  ;;  %v2076_v53 = vsel %vm129_vm5, %v2044_v49, 0.0  ;;  %v2092_v55 = vsel %vm133_vm7, %v2044_v49, 0.0  ;;  %v2108_v57 = vsel %vm137_vm9, %v2044_v49, 0.0 }
  0x41   :  { %v2118_v58 = vsel %vm141_vm10, %v2044_v49, 0.0  ;;  %v2128_v59 = vsel %vm110_vm11, %v2044_v49, 0.0  ;;  %vm3850_vm6 = vcmask 261120   ;;  %vm3855_vm11 = vcmask 146432  }
  0x42   :  { %169 = vrot.lane.b32.xlu0 %v2040_v48, %s1921_s5 }
  0x43   :  { %220 = vrot.lane.b32.xlu1 %v2044_v49, %s1919_s1 }
  0x46   :  { %203 = vrot.lane.b32.xlu0 %v2055_v50, %s1922_s6 }
  0x47   :  { %188 = vrot.lane.b32.xlu1 %v2060_v51, %s1920_s4 }
  0x4a   :  { %235 = vrot.lane.b32.xlu0 %v2071_v52, %s1923_s7 }
  0x4b   :  { %205 = vrot.lane.b32.xlu1 %v2076_v53, %s1922_s6 }
  0x4e   :  { %252 = vrot.lane.b32.xlu0 %v2087_v54, %s1924_s8 }
  0x4f   :  { %237 = vrot.lane.b32.xlu1 %v2092_v55, %s1923_s7 }
  0x52   :  { %269 = vrot.lane.b32.xlu0 %v2103_v56, %s1925_s9 }
  0x53   :  { %254 = vrot.lane.b32.xlu1 %v2108_v57, %s1924_s8 }
  0x56   :  { %284 = vrot.lane.b32.xlu0 %v2040_v48, %s1926_s10 }
  0x57   :  { %271 = vrot.lane.b32.xlu1 %v2118_v58, %s1925_s9 }
  0x5a   :  { %171 = vrot.lane.b32.xlu0 %v2128_v59, %s1921_s5 }
  0x5b   :  { %286 = vrot.lane.b32.xlu1 %v2128_v59, %s1926_s10 }
  0x5e   :  { %299 = vrot.lane.b32.xlu0 %v2033_v47, %s1927_s11 }
  0x5f   :  { %301 = vrot.lane.b32.xlu1 %v2060_v51, %s1927_s11 }
  0x62   :  { %314 = vrot.lane.b32.xlu0 %v2055_v50, %s1928_s12 }
  0x63   :  { %316 = vrot.lane.b32.xlu1 %v2076_v53, %s1928_s12 }
  0x66   :  { %329 = vrot.lane.b32.xlu0 %v2023_v45, %s3804_s13 }
  0x67   :  { %331 = vrot.lane.b32.xlu1 %v2044_v49, %s3804_s13 }
  0x6a   :  { %344 = vrot.lane.b32.xlu0 %v2071_v52, %s1930_s14 }
  0x6b   :  { %346 = vrot.lane.b32.xlu1 %v2092_v55, %s1930_s14 }
  0x6e   :  { %359 = vrot.lane.b32.xlu0 %v2087_v54, %s3809_s15 }
  0x6f   :  { %361 = vrot.lane.b32.xlu1 %v2108_v57, %s3809_s15  ;;  %s2594_s15 = sld [smem:[#allocation4 + $0x1d]] }
  0x72   :  { %374 = vrot.lane.b32.xlu0 %v2103_v56, %s3807_s16 }
  0x73   :  { %376 = vrot.lane.b32.xlu1 %v2118_v58, %s3807_s16  ;;  %s2592_s16 = sld [smem:[#allocation4 + $0x1c]] }
  0x76   :  { %389 = vrot.lane.b32.xlu0 %v2040_v48, %s3805_s17 }
  0x77   :  { %391 = vrot.lane.b32.xlu1 %v2128_v59, %s3805_s17  ;;  %s2585_s17 = sld [smem:[#allocation4 + $0x1b]] }
  0x7a   :  { %404 = vrot.lane.b32.xlu0 %v2033_v47, %s3800_s18 }
  0x7b   :  { %406 = vrot.lane.b32.xlu1 %v2060_v51, %s3800_s18  ;;  %s2578_s18 = sld [smem:[#allocation4 + $0x19]] }
  0x7e   :  { %419 = vrot.lane.b32.xlu0 %v2055_v50, %s3797_s19 }
  0x7f   :  { %421 = vrot.lane.b32.xlu1 %v2076_v53, %s3797_s19  ;;  %s2571_s19 = sld [smem:[#allocation4 + $0x16]] }
  0x82   :  { %434 = vrot.lane.b32.xlu0 %v2023_v45, %s3795_s20 }
  0x83   :  { %436 = vrot.lane.b32.xlu1 %v2044_v49, %s3795_s20  ;;  %s2569_s20 = sld [smem:[#allocation4 + $0x15]] }
  0x85   :  { %3925 = sst [smem:[#allocation49_spill]] %s2571_s19 }
  0x86   :  { %449 = vrot.lane.b32.xlu0 %v2071_v52, %s3793_s21 }
  0x87   :  { %451 = vrot.lane.b32.xlu1 %v2092_v55, %s3793_s21  ;;  %s2565_s21 = sld [smem:[#allocation4 + $0x14]] }
  0x8a   :  { %464 = vrot.lane.b32.xlu0 %v2087_v54, %s3791_s22 }
  0x8b   :  { %466 = vrot.lane.b32.xlu1 %v2108_v57, %s3791_s22  ;;  %s2558_s22 = sld [smem:[#allocation4 + $0x12]] }
  0x8e   :  { %479 = vrot.lane.b32.xlu0 %v2103_v56, %s3789_s23 }
  0x8f   :  { %481 = vrot.lane.b32.xlu1 %v2118_v58, %s3789_s23  ;;  %s2556_s23 = sld [smem:[#allocation4 + $0x11]] }
  0x92   :  { %494 = vrot.lane.b32.xlu0 %v2040_v48, %s3786_s24 }
  0x93   :  { %496 = vrot.lane.b32.xlu1 %v2128_v59, %s3786_s24  ;;  %s2552_s24 = sld [smem:[#allocation4 + $0x10]] }
  0x96   :  { %509 = vrot.lane.b32.xlu0 %v2033_v47, %s3784_s25 }
  0x97   :  { %511 = vrot.lane.b32.xlu1 %v2060_v51, %s3784_s25  ;;  %s2550_s25 = sld [smem:[#allocation4 + $0xf]] }
  0x9a   :  { %524 = vrot.lane.b32.xlu0 %v2055_v50, %s3782_s26 }
  0x9b   :  { %526 = vrot.lane.b32.xlu1 %v2076_v53, %s3782_s26  ;;  %s2546_s26 = sld [smem:[#allocation4 + $0xe]] }
  0x9e   :  { %555 = vrot.lane.b32.xlu0 %v2071_v52, %s3780_s27 }
  0x9f   :  { %557 = vrot.lane.b32.xlu1 %v2092_v55, %s3780_s27  ;;  %s2544_s27 = sld [smem:[#allocation4 + $0xd]] }
  0xa2   :  { %570 = vrot.lane.b32.xlu0 %v2087_v54, %s3778_s28 }
  0xa3   :  { %572 = vrot.lane.b32.xlu1 %v2108_v57, %s3778_s28  ;;  %s2540_s28 = sld [smem:[#allocation4 + $0xc]] }
  0xa6   :  { %585 = vrot.lane.b32.xlu0 %v2103_v56, %s3776_s0 }
  0xa7   :  { %587 = vrot.lane.b32.xlu1 %v2118_v58, %s3776_s0  ;;  %s2534_s0 = sld [smem:[#allocation4 + $0xa]] }
  0xa9   :  { %3922 = sst [smem:[#allocation46_spill]] %s2540_s28  ;;  %s2637_s28 = sld [smem:[#allocation4 + $0x23]] }
  0xaa   :  { %600 = vrot.lane.b32.xlu0 %v2040_v48, %s3728_s29 }
  0xab   :  { %602 = vrot.lane.b32.xlu1 %v2128_v59, %s3728_s29  ;;  %s3734_s29 = smov 112  }
  0xae   :  { %615 = vrot.lane.b32.xlu0 %v2033_v47, %s3730_s30 }
  0xaf   :  { %617 = vrot.lane.b32.xlu1 %v2060_v51, %s3730_s30  ;;  %s3736_s30 = smov 111   ;;  %3937 = sst [smem:[#allocation60_spill]] %s2637_s28 }
  0xb0   :  { %v2218_v60 = vpop.permute.xlu0 %218  ;;  %s2755_s28 = sld [smem:[#allocation4 + $0x29]] }
  0xb1   :  { %v2220_v61 = vpop.permute.xlu1 %186 }
  0xb2   :  { %630 = vrot.lane.b32.xlu0 %v2055_v50, %s3732_s3 }
  0xb3   :  { %632 = vrot.lane.b32.xlu1 %v2076_v53, %s3732_s3  ;;  %s3738_s3 = smov 110  }
  0xb4   :  { %v2226_v62 = vpop.permute.xlu0 %169 }
  0xb5   :  { %v2228_v63 = vpop.permute.xlu1 %220 }
  0xb6   :  { %645 = vrot.lane.b32.xlu0 %v2023_v45, %s3734_s29 }
  0xb7   :  { %647 = vrot.lane.b32.xlu1 %v2044_v49, %s3734_s29  ;;  %s3740_s29 = smov 109  }
  0xb8   :  { %v2234_v0 = vpop.permute.xlu0 %203 }
  0xb9   :  { %v2236_v1 = vpop.permute.xlu1 %188 }
  0xba   :  { %660 = vrot.lane.b32.xlu0 %v2071_v52, %s3736_s30 }
  0xbb   :  { %662 = vrot.lane.b32.xlu1 %v2092_v55, %s3736_s30  ;;  %s3742_s30 = smov 99  }
  0xbc   :  { %v2242_v2 = vpop.permute.xlu0 %235 }
  0xbd   :  { %v2244_v3 = vpop.permute.xlu1 %205 }
  0xbe   :  { %675 = vrot.lane.b32.xlu0 %v2087_v54, %s3738_s3 }
  0xbf   :  { %677 = vrot.lane.b32.xlu1 %v2108_v57, %s3738_s3  ;;  %s3744_s3 = smov 98  }
  0xc0   :  { %v2250_v4 = vpop.permute.xlu0 %252 }
  0xc1   :  { %v2252_v5 = vpop.permute.xlu1 %237 }
  0xc2   :  { %690 = vrot.lane.b32.xlu0 %v2103_v56, %s3740_s29 }
  0xc3   :  { %692 = vrot.lane.b32.xlu1 %v2118_v58, %s3740_s29  ;;  %s3746_s29 = smov 97  }
  0xc4   :  { %v2258_v6 = vpop.permute.xlu0 %269 }
  0xc5   :  { %v2260_v7 = vpop.permute.xlu1 %254 }
  0xc6   :  { %705 = vrot.lane.b32.xlu0 %v2040_v48, %s3742_s30 }
  0xc7   :  { %707 = vrot.lane.b32.xlu1 %v2128_v59, %s3742_s30  ;;  %s3748_s30 = smov 96  }
  0xc8   :  { %v2266_v8 = vpop.permute.xlu0 %284 }
  0xc9   :  { %v2268_v9 = vpop.permute.xlu1 %271 }
  0xca   :  { %720 = vrot.lane.b32.xlu0 %v2033_v47, %s3744_s3 }
  0xcb   :  { %722 = vrot.lane.b32.xlu1 %v2060_v51, %s3744_s3  ;;  %s3750_s3 = smov 95  }
  0xcc   :  { %v2274_v10 = vpop.permute.xlu0 %171 }
  0xcd   :  { %v2276_v11 = vpop.permute.xlu1 %286 }
  0xce   :  { %735 = vrot.lane.b32.xlu0 %v2055_v50, %s3746_s29 }
  0xcf   :  { %737 = vrot.lane.b32.xlu1 %v2076_v53, %s3746_s29  ;;  %s3752_s29 = smov 94  }
  0xd0   :  { %v2282_v13 = vpop.permute.xlu0 %299 }
  0xd1   :  { %v2284_v14 = vpop.permute.xlu1 %301 }
  0xd2   :  { %750 = vrot.lane.b32.xlu0 %v2023_v45, %s3748_s30 }
  0xd3   :  { %752 = vrot.lane.b32.xlu1 %v2044_v49, %s3748_s30  ;;  %s3754_s30 = smov 93  }
  0xd4   :  { %v2290_v15 = vpop.permute.xlu0 %314 }
  0xd5   :  { %v2292_v16 = vpop.permute.xlu1 %316 }
  0xd6   :  { %765 = vrot.lane.b32.xlu0 %v2071_v52, %s3750_s3 }
  0xd7   :  { %767 = vrot.lane.b32.xlu1 %v2092_v55, %s3750_s3  ;;  %s3756_s3 = smov 83  }
  0xd8   :  { %v2298_v17 = vpop.permute.xlu0 %329 }
  0xd9   :  { %v2300_v18 = vpop.permute.xlu1 %331 }
  0xda   :  { %780 = vrot.lane.b32.xlu0 %v2087_v54, %s3752_s29 }
  0xdb   :  { %782 = vrot.lane.b32.xlu1 %v2108_v57, %s3752_s29  ;;  %s3758_s29 = smov 82  }
  0xdc   :  { %v2306_v19 = vpop.permute.xlu0 %344 }
  0xdd   :  { %v2308_v20 = vpop.permute.xlu1 %346 }
  0xde   :  { %795 = vrot.lane.b32.xlu0 %v2103_v56, %s3754_s30 }
  0xdf   :  { %797 = vrot.lane.b32.xlu1 %v2118_v58, %s3754_s30  ;;  %s3760_s30 = smov 81  }
  0xe0   :  { %v2314_v21 = vpop.permute.xlu0 %359 }
  0xe1   :  { %v2316_v22 = vpop.permute.xlu1 %361 }
  0xe2   :  { %810 = vrot.lane.b32.xlu0 %v2040_v48, %s3756_s3  ;;  %v2404_v48 = vsel %vm125_vm3, %v2368_v36, 0.0  ;;  %vm3856_vm3 = vcmask 285696  }
  0xe3   :  { %812 = vrot.lane.b32.xlu1 %v2128_v59, %s3756_s3  ;;  %s3774_s3 = smov 80  }
  0xe4   :  { %v2322_v23 = vpop.permute.xlu0 %374 }
  0xe5   :  { %v2324_v24 = vpop.permute.xlu1 %376 }
  0xe6   :  { %825 = vrot.lane.b32.xlu0 %v2033_v47, %s3758_s29 }
  0xe7   :  { %827 = vrot.lane.b32.xlu1 %v2060_v51, %s3758_s29  ;;  %s3762_s29 = smov 79  }
  0xe8   :  { %v2330_v26 = vpop.permute.xlu0 %389 }
  0xe9   :  { %v2332_v27 = vpop.permute.xlu1 %391 }
  0xea   :  { %840 = vrot.lane.b32.xlu0 %v2055_v50, %s3760_s30  ;;  %v2415_v50 = vsel %vm128_vm2, %v2350_v32, 0.0  ;;  %vm3866_vm2 = vcmask 367616  }
  0xeb   :  { %842 = vrot.lane.b32.xlu1 %v2076_v53, %s3760_s30  ;;  %s3771_s30 = smov 78  }
  0xec   :  { %v2338_v28 = vpop.permute.xlu0 %404 }
  0xed   :  { %v2340_v29 = vpop.permute.xlu1 %406 }
  0xee   :  { %855 = vrot.lane.b32.xlu0 %v2023_v45, %s3774_s3  ;;  %v2397_v45 = vsel %vm124_vm0, %v2350_v32, 0.0  ;;  %vm239_vm0 = vcmask 384000  }
  0xef   :  { %857 = vrot.lane.b32.xlu1 %v2044_v49, %s3774_s3  ;;  %s2532_s3 = sld [smem:[#allocation4 + $0x9]] }
  0xf0   :  { %v2346_v30 = vpop.permute.xlu0 %419 }
  0xf1   :  { %v2348_v31 = vpop.permute.xlu1 %421 }
  0xf2   :  { %870 = vrot.lane.b32.xlu0 %v2071_v52, %s3762_s29  ;;  %v2422_v52 = vsel %vm129_vm5, %v2368_v36, 0.0  ;;  %vm3849_vm5 = vcmask 269312  }
  0xf3   :  { %872 = vrot.lane.b32.xlu1 %v2092_v55, %s3762_s29  ;;  %s3769_s29 = smov 77  }
  0xf4   :  { %v2356_v33 = vpop.permute.xlu0 %434 }
  0xf5   :  { %v2358_v34 = vpop.permute.xlu1 %436  ;;  %3921 = sst [smem:[#allocation45_spill]] %s2532_s3  ;;  %s2629_s3 = sld [smem:[#allocation4 + $0x22]] }
  0xf6   :  { %885 = vrot.lane.b32.xlu0 %v2087_v54, %s3771_s30 }
  0xf7   :  { %887 = vrot.lane.b32.xlu1 %v2108_v57, %s3771_s30  ;;  %s2528_s30 = sld [smem:[#allocation4 + $0x8]] }
  0xf8   :  { %v2364_v35 = vpop.permute.xlu0 %449 }
  0xf9   :  { %v2370_v37 = vpop.permute.xlu1 %451 }
  0xfa   :  { %3891 = vst [vmem:[#allocation15_spill] sm:$0xff] %v2370_v37  ;;  %900 = vrot.lane.b32.xlu0 %v2103_v56, %s3769_s29  ;;  %v2441_v56 = vsel %vm132_vm4, %v2350_v32, 0.0  ;;  %vm3848_vm4 = vcmask 277504  }
  0xfb   :  { %902 = vrot.lane.b32.xlu1 %v2118_v58, %s3769_s29  ;;  %3901 = vst [vmem:[#allocation25_spill] sm:$0xff] %v2441_v56  ;;  %v2448_v58 = vsel %vm133_vm7, %v2368_v36, 0.0  ;;  %s2526_s29 = sld [smem:[#allocation4 + $0x7]]  ;;  %vm3851_vm7 = vcmask 252928  }
  0xfc   :  { %v2381_v39 = vpop.permute.xlu0 %464  ;;  %3903 = vst [vmem:[#allocation27_spill] sm:$0xff] %v2448_v58 }
  0xfd   :  { %3892 = vst [vmem:[#allocation16_spill] sm:$0xff] %v2381_v39  ;;  %v2388_v43 = vpop.permute.xlu1 %466  ;;  %3919 = sst [smem:[#allocation43_spill]] %s2528_s30  ;;  %s3935_s30 = smov 30  }
  0xfe   :  { %3894 = vst [vmem:[#allocation18_spill] sm:$0xff] %v2388_v43  ;;  %917 = vrot.lane.b32.xlu0 %v2379_v38, %s1921_s5  ;;  %v194_v43 = vsel %vm190_vm13, 0.0, %v2220_v61 }
  0xff   :  { %919 = vrot.lane.b32.xlu1 %v2386_v42, %s1921_s5  ;;  %s2508_s5 = sld [smem:[#allocation4 + $0x2]] }
 0x100   :  { %v2399_v47 = vpop.permute.xlu0 %479 }
 0x101   :  { %3895 = vst [vmem:[#allocation19_spill] sm:$0xff] %v2399_v47  ;;  %v2406_v49 = vpop.permute.xlu1 %481 }
 0x102   :  { %3896 = vst [vmem:[#allocation20_spill] sm:$0xff] %v2406_v49  ;;  %933 = vrot.lane.b32.xlu0 %v2397_v45, %s1920_s4 }
 0x103   :  { %935 = vrot.lane.b32.xlu1 %v2404_v48, %s1920_s4  ;;  %s2504_s4 = sld [smem:[#allocation4 + $0x1]] }
 0x104   :  { %v2417_v51 = vpop.permute.xlu0 %494 }
 0x105   :  { %3897 = vst [vmem:[#allocation21_spill] sm:$0xff] %v2417_v51  ;;  %v2424_v53 = vpop.permute.xlu1 %496  ;;  %v223_v51 = vsel %vm222_vm12, %v2218_v60, %v2228_v63 }
 0x106   :  { %3898 = vst [vmem:[#allocation22_spill] sm:$0xff] %v2424_v53  ;;  %949 = vrot.lane.b32.xlu0 %v2415_v50, %s1922_s6 }
 0x107   :  { %951 = vrot.lane.b32.xlu1 %v2422_v52, %s1922_s6  ;;  %s2510_s6 = sld [smem:[#allocation4 + $0x18]] }
 0x108   :  { %v2430_v54 = vpop.permute.xlu0 %509 }
 0x109   :  { %3899 = vst [vmem:[#allocation23_spill] sm:$0xff] %v2430_v54  ;;  %v2432_v55 = vpop.permute.xlu1 %511  ;;  %3915 = sst [smem:[#allocation39_spill]] %s2504_s4  ;;  %s2603_s4 = sld [smem:[#allocation4 + $0x1f]] }
 0x10a   :  { %3900 = vst [vmem:[#allocation24_spill] sm:$0xff] %v2432_v55  ;;  %963 = vrot.lane.b32.xlu0 %v2350_v32, %s1919_s1  ;;  %s3940_s19 = sld [smem:[#allocation39_spill]] }
 0x10b   :  { %965 = vrot.lane.b32.xlu1 %v2368_v36, %s1919_s1  ;;  %s2502_s1 = sld [smem:[#allocation4 + $0x3]] }
 0x10c   :  { %v2443_v57 = vpop.permute.xlu0 %524 }
 0x10d   :  { %3902 = vst [vmem:[#allocation26_spill] sm:$0xff] %v2443_v57  ;;  %v2450_v59 = vpop.permute.xlu1 %526  ;;  %v2466_v57 = vsel %vm137_vm9, %v2368_v36, 0.0  ;;  %vm3854_vm9 = vcmask 236544  }
 0x10e   :  { %3904 = vst [vmem:[#allocation28_spill] sm:$0xff] %v2450_v59  ;;  %979 = vrot.lane.b32.xlu0 %v2441_v56, %s1923_s7  ;;  %3907 = vst [vmem:[#allocation31_spill] sm:$0xff] %v2466_v57  ;;  %v2477_v59 = vsel %vm140_vm8, %v2350_v32, 0.0  ;;  %vm3852_vm8 = vcmask 244736  }
 0x10f   :  { %981 = vrot.lane.b32.xlu1 %v2448_v58, %s1923_s7  ;;  %s2514_s7 = sld [smem:[#allocation4 + $0x4]]  ;;  %3929 = sst [smem:[#allocation53_spill]] %s2603_s4 }
 0x110   :  { %v2461_v25 = vpop.permute.xlu0 %555 }
 0x111   :  { %3906 = vst [vmem:[#allocation30_spill] sm:$0xff] %v2461_v25  ;;  %v2468_v55 = vpop.permute.xlu1 %557  ;;  %v2484_v25 = vsel %vm141_vm10, %v2368_v36, 0.0  ;;  %v3947_v47 = vstv %s2502_s1  ;;  %vm3853_vm10 = vcmask 154624  }
 0x112   :  { %3908 = vst [vmem:[#allocation32_spill] sm:$0xff] %v2468_v55  ;;  %995 = vrot.lane.b32.xlu0 %v2459_v12, %s1924_s8  ;;  %3910 = vst [vmem:[#allocation34_spill] sm:$0xff] %v2484_v25 }
 0x113   :  { %997 = vrot.lane.b32.xlu1 %v2466_v57, %s1924_s8  ;;  %s2516_s8 = sld [smem:[#allocation4]] }
 0x114   :  { %v2479_v54 = vpop.permute.xlu0 %570 }
 0x115   :  { %3909 = vst [vmem:[#allocation33_spill] sm:$0xff] %v2479_v54  ;;  %v2486_v53 = vpop.permute.xlu1 %572 }
 0x116   :  { %3911 = vst [vmem:[#allocation35_spill] sm:$0xff] %v2486_v53  ;;  %1011 = vrot.lane.b32.xlu0 %v2477_v59, %s1925_s9 }
 0x117   :  { %1013 = vrot.lane.b32.xlu1 %v2484_v25, %s1925_s9  ;;  %s2520_s9 = sld [smem:[#allocation4 + $0x5]] }
 0x118   :  { %v2492_v55 = vpop.permute.xlu0 %585 }
 0x119   :  { %3912 = vst [vmem:[#allocation36_spill] sm:$0xff] %v2492_v55  ;;  %v2494_v40 = vpop.permute.xlu1 %587  ;;  %v540_v55 = vstv %s2510_s6  ;;  %s2576_s6 = sld [smem:[#allocation4 + $0x17]] }
 0x11a   :  { %3913 = vst [vmem:[#allocation37_spill] sm:$0xff] %v2494_v40  ;;  %1025 = vrot.lane.b32.xlu0 %v2379_v38, %s1926_s10 }
 0x11b   :  { %1027 = vrot.lane.b32.xlu1 %v2386_v42, %s1926_s10  ;;  %s2522_s10 = sld [smem:[#allocation4 + $0x6]] }
 0x11c   :  { %v2500_v46 = vpop.permute.xlu0 %600 }
 0x11d   :  { %3914 = vst [vmem:[#allocation38_spill] sm:$0xff] %v2500_v46  ;;  %v2506_v54 = vpop.permute.xlu1 %602 }
 0x11e   :  { %3916 = vst [vmem:[#allocation40_spill] sm:$0xff] %v2506_v54  ;;  %1039 = vrot.lane.b32.xlu0 %v2397_v45, %s1927_s11 }
 0x11f   :  { %1041 = vrot.lane.b32.xlu1 %v2404_v48, %s1927_s11  ;;  %s2538_s11 = sld [smem:[#allocation4 + $0xb]]  ;;  %3927 = sst [smem:[#allocation51_spill]] %s2576_s6 }
 0x120   :  { %v2524_v46 = vpop.permute.xlu0 %615  ;;  %s2661_s6 = sld [smem:[#allocation4 + $0x24]] }
 0x121   :  { %3917 = sst [smem:[#allocation41_spill]] %s2522_s10  ;;  %3918 = vst [vmem:[#allocation42_spill] sm:$0xff] %v2524_v46  ;;  %v2530_v54 = vpop.permute.xlu1 %617 }
 0x122   :  { %3920 = vst [vmem:[#allocation44_spill] sm:$0xff] %v2530_v54  ;;  %1053 = vrot.lane.b32.xlu0 %v2415_v50, %s1928_s12  ;;  %s2617_s10 = sld [smem:[#allocation4 + $0x21]] }
 0x123   :  { %1055 = vrot.lane.b32.xlu1 %v2422_v52, %s1928_s12  ;;  %s2563_s12 = sld [smem:[#allocation4 + $0x13]]  ;;  %s3949_s4 = sld [smem:[#allocation41_spill]] }
 0x124   :  { %v2548_v46 = vpop.permute.xlu0 %630 }
 0x125   :  { %3923 = vst [vmem:[#allocation47_spill] sm:$0xff] %v2548_v46  ;;  %v2554_v54 = vpop.permute.xlu1 %632 }
 0x126   :  { %3924 = vst [vmem:[#allocation48_spill] sm:$0xff] %v2554_v54  ;;  %1067 = vrot.lane.b32.xlu0 %v2350_v32, %s3804_s13  ;;  %v541_v54 = vmul.f32 %v540_v55, %v2018_v44  ;;  %v211_v44 = vsel %vm207_vm15, 0.0, %v2234_v0 }
 0x127   :  { %1069 = vrot.lane.b32.xlu1 %v2368_v36, %s3804_s13  ;;  %s2583_s13 = sld [smem:[#allocation4 + $0x1a]] }
 0x128   :  { %v2573_v46 = vpop.permute.xlu0 %645  ;;  %v2611_v39 = vrot.slane %v541_v54, %v2016_v41  ;;  %3934 = sst [smem:[#allocation58_spill]] %s2617_s10  ;;  %v226_v41 = vsel %vm222_vm12, 0.0, %v2218_v60  ;;  %v3942_v54 = vstv %s2502_s1  ;;  %v3944_v60 = vstv %s3940_s19  ;;  %s3946_s10 = smov 19  }
 0x129   :  { %3926 = vst [vmem:[#allocation50_spill] sm:$0xff] %v2573_v46  ;;  %v2580_v40 = vpop.permute.xlu1 %647  ;;  %v197_v63 = vmul.f32 %v3944_v60, %v194_v43  ;;  %v2698_v43 = vmul.f32 %v3947_v47, %v223_v51  ;;  %v208_v47 = vsel %vm207_vm15, %v2234_v0, %v2244_v3  ;;  %v257_v51 = vsel %vm256_vm1, %v2250_v4, %v2260_v7  ;;  %s2718_s1 = sld [smem:[#allocation4 + $0x27]]  ;;  %s3953_s19 = smov 18  }
 0x12a   :  { %3928 = vst [vmem:[#allocation52_spill] sm:$0xff] %v2580_v40  ;;  %1081 = vrot.lane.b32.xlu0 %v2441_v56, %s1930_s14  ;;  %3931 = vst [vmem:[#allocation55_spill] sm:$0xff] %v2611_v39  ;;  %v2673_v39 = vmul.f32 %v3942_v54, %v226_v41  ;;  %v243_v41 = vsel %vm239_vm0, 0.0, %v2242_v2  ;;  %v3945_v54 = vstv %s2516_s8  ;;  %v274_v0 = vsel %vm3866_vm2, %v2258_v6, %v2268_v9 }
 0x12b   :  { %1083 = vrot.lane.b32.xlu1 %v2448_v58, %s1930_s14  ;;  %s2613_s14 = sld [smem:[#allocation4 + $0x20]]  ;;  %v3951_v7 = vstv %s2520_s9  ;;  %s3962_s9 = smov 17  }
 0x12c   :  { %v2605_v46 = vpop.permute.xlu0 %660 }
 0x12d   :  { %3930 = vst [vmem:[#allocation54_spill] sm:$0xff] %v2605_v46  ;;  %v2615_v40 = vpop.permute.xlu1 %662 }
 0x12e   :  { %3933 = vst [vmem:[#allocation57_spill] sm:$0xff] %v2615_v40  ;;  %1095 = vrot.lane.b32.xlu0 %v2459_v12, %s3935_s30  ;;  %v177_v40 = vsel %vm173_vm14, 0.0, %v2226_v62 }
 0x12f   :  { %1097 = vrot.lane.b32.xlu1 %v2466_v57, %s3935_s30  ;;  %s3939_s30 = smov 29   ;;  %v180_v55 = vmul.f32 %v3945_v54, %v177_v40  ;;  %v3948_v40 = vstv %s2508_s5  ;;  %s3958_s5 = sld [smem:[#allocation43_spill]] }
 0x130   :  { %v2635_v46 = vpop.permute.xlu0 %675  ;;  %v214_v54 = vmul.f32 %v3948_v40, %v211_v44  ;;  %v292_v44 = vsel %vm3856_vm3, 0.0, %v2266_v8  ;;  %v3954_v9 = vmov %v3948_v40  ;;  %v3955_v40 = vmov %v3951_v7 }
 0x131   :  { %3932 = sst [smem:[#allocation56_spill]] %s2613_s14  ;;  %3936 = vst [vmem:[#allocation59_spill] sm:$0xff] %v2635_v46  ;;  %v2644_v49 = vpop.permute.xlu1 %677  ;;  %v191_v46 = vsel %vm190_vm13, %v2220_v61, %v2236_v1  ;;  %s2694_s14 = sld [smem:[#allocation4 + $0x26]]  ;;  %v260_v61 = vsel %vm256_vm1, 0.0, %v2250_v4  ;;  %v277_v1 = vsel %vm3866_vm2, 0.0, %v2258_v6  ;;  %v240_v4 = vsel %vm239_vm0, %v2242_v2, %v2252_v5 }
 0x132   :  { %3938 = vst [vmem:[#allocation61_spill] sm:$0xff] %v2644_v49  ;;  %1109 = vrot.lane.b32.xlu0 %v2477_v59, %s3939_s30  ;;  %v174_v6 = vsel %vm173_vm14, %v2226_v62, %v2274_v10  ;;  %v264_v53 = vmul.f32 %v3955_v40, %v257_v51  ;;  %v289_v2 = vsel %vm3856_vm3, %v2266_v8, %v2276_v11  ;;  %v3959_v11 = vstv %s2514_s7 }
 0x133   :  { %1111 = vrot.lane.b32.xlu1 %v2484_v25, %s3939_s30  ;;  %s2681_s30 = sld [smem:[#allocation4 + $0x25]]  ;;  %v304_v51 = vsel %vm3848_vm4, %v2282_v13, %v2284_v14  ;;  %v3961_v5 = vstv %s2526_s29  ;;  %vm3865_vm3 = vcmask 1039360   ;;  %vm3884_vm2 = vcmask 809984   ;;  %v4036_v14 = vld [vmem:[#allocation42_spill] sm:$0xff] }
 0x134   :  { %v2669_v49 = vpop.permute.xlu0 %690 }
 0x135   :  { %3941 = vst [vmem:[#allocation62_spill] sm:$0xff] %v2669_v49  ;;  %v2679_v37 = vpop.permute.xlu1 %692  ;;  %v198_v49 = vmul.f32 %v3944_v60, %v191_v46  ;;  %v3952_v46 = vstv %s3949_s4  ;;  %v215_v60 = vmul.f32 %v3954_v9, %v208_v47  ;;  %v307_v47 = vsel %vm3848_vm4, 0.0, %v2282_v13  ;;  %s2775_s4 = sld [smem:[#allocation4 + $0x2a]] }
 0x136   :  { %3943 = vst [vmem:[#allocation63_spill] sm:$0xff] %v2679_v37  ;;  %1123 = vrot.lane.b32.xlu0 %v2379_v38, %s3946_s10  ;;  %v3950_v37 = vstv %s2514_s7  ;;  %v3956_v62 = vmov %v3952_v46  ;;  %v3960_v9 = vstv %s2516_s8  ;;  %v296_v13 = vmul.f32 %v3961_v5, %v289_v2  ;;  %s2782_s7 = sld [smem:[#allocation4 + $0x2b]]  ;;  %s2799_s8 = sld [smem:[#allocation4 + $0x2c]]  ;;  %v4032_v5 = vld [vmem:[#allocation38_spill] sm:$0xff] }
 0x137   :  { %1125 = vrot.lane.b32.xlu1 %v2386_v42, %s3946_s10  ;;  %v246_v42 = vmul.f32 %v3950_v37, %v243_v41  ;;  %s2731_s10 = sld [smem:[#allocation4 + $0x28]]  ;;  %v263_v37 = vmul.f32 %v3951_v7, %v260_v61  ;;  %v280_v41 = vmul.f32 %v3952_v46, %v277_v1  ;;  %v281_v10 = vmul.f32 %v3956_v62, %v274_v0 }
 0x138   :  { %v2715_v25 = vpop.permute.xlu0 %705  ;;  %v3957_v61 = vstv %s2526_s29  ;;  %v247_v7 = vmul.f32 %v3959_v11, %v240_v4  ;;  %v181_v0 = vmul.f32 %v3960_v9, %v174_v6  ;;  %v322_v11 = vsel %vm3849_vm5, 0.0, %v2290_v15  ;;  %s3965_s29 = sld [smem:[#allocation45_spill]] }
 0x139   :  { %v2729_v3 = vpop.permute.xlu1 %707  ;;  %v295_v1 = vmul.f32 %v3957_v61, %v292_v44  ;;  %v248_v46 = vadd.f32 %v246_v42, %v180_v55  ;;  %v265_v62 = vadd.f32 %v263_v37, %v197_v63  ;;  %v282_v61 = vadd.f32 %v280_v41, %v214_v54 }
 0x13a   :  { %1137 = vrot.lane.b32.xlu0 %v2397_v45, %s3953_s19  ;;  %v3963_v42 = vstv %s3958_s5  ;;  %v319_v63 = vsel %vm3849_vm5, %v2290_v15, %v2292_v16  ;;  %v266_v54 = vadd.f32 %v264_v53, %v198_v49  ;;  %v283_v37 = vadd.f32 %v281_v10, %v215_v60  ;;  %s2820_s5 = sld [smem:[#allocation4 + $0x2d]] }
 0x13b   :  { %1139 = vrot.lane.b32.xlu1 %v2404_v48, %s3953_s19  ;;  %v310_v55 = vmul.f32 %v3963_v42, %v307_v47  ;;  %v3964_v4 = vmov %v3963_v42  ;;  %v297_v41 = vadd.f32 %v295_v1, %v2673_v39  ;;  %vm3861_vm4 = vcmask 138240   ;;  %s3968_s19 = smov 16  }
 0x13c   :  { %v2766_v8 = vpop.permute.xlu0 %720  ;;  %v311_v6 = vmul.f32 %v3964_v4, %v304_v51  ;;  %v249_v47 = vadd.f32 %v247_v7, %v181_v0  ;;  %v337_v51 = vsel %vm3850_vm6, 0.0, %v2298_v17  ;;  %v334_v15 = vsel %vm3850_vm6, %v2298_v17, %v2300_v18 }
 0x13d   :  { %v2772_v40 = vpop.permute.xlu1 %722  ;;  %vm3857_vm5 = vcmask 130048   ;;  %v352_v1 = vsel %vm3851_vm7, 0.0, %v2306_v19  ;;  %v349_v7 = vsel %vm3851_vm7, %v2306_v19, %v2308_v20  ;;  %v298_v17 = vadd.f32 %v296_v13, %v2698_v43 }
 0x13e   :  { %1151 = vrot.lane.b32.xlu0 %v2415_v50, %s3962_s9  ;;  %v3966_v49 = vstv %s3965_s29  ;;  %v312_v18 = vadd.f32 %v310_v55, %v248_v46  ;;  %v313_v9 = vadd.f32 %v311_v6, %v249_v47  ;;  %vm3859_vm6 = vcmask 121856   ;;  %s3971_s29 = sld [smem:[#allocation46_spill]] }
 0x13f   :  { %1153 = vrot.lane.b32.xlu1 %v2422_v52, %s3962_s9  ;;  %v325_v53 = vmul.f32 %v3966_v49, %v322_v11  ;;  %v3967_v60 = vmov %v3966_v49  ;;  %s2826_s9 = sld [smem:[#allocation4 + $0x2e]]  ;;  %v3969_v19 = vstv %s2534_s0  ;;  %v367_v11 = vsel %vm3852_vm8, 0.0, %v2314_v21  ;;  %s2848_s0 = sld [smem:[#allocation4 + $0x2f]] }
 0x140   :  { %v2796_v2 = vpop.permute.xlu0 %735  ;;  %v326_v10 = vmul.f32 %v3967_v60, %v319_v63  ;;  %v340_v20 = vmul.f32 %v3969_v19, %v337_v51  ;;  %v3970_v42 = vmov %v3969_v19  ;;  %v364_v43 = vsel %vm3852_vm8, %v2314_v21, %v2316_v22 }
 0x141   :  { %v2806_v16 = vpop.permute.xlu1 %737  ;;  %v341_v4 = vmul.f32 %v3970_v42, %v334_v15  ;;  %vm3858_vm7 = vcmask 105472   ;;  %v3972_v13 = vstv %s2538_s11  ;;  %v382_v47 = vsel %vm3854_vm9, 0.0, %v2322_v23  ;;  %s2872_s11 = sld [smem:[#allocation4 + $0x30]] }
 0x142   :  { %1165 = vrot.lane.b32.xlu0 %v2350_v32, %s3968_s19  ;;  %v355_v55 = vmul.f32 %v3972_v13, %v352_v1  ;;  %v3973_v6 = vmov %v3972_v13  ;;  %v327_v49 = vadd.f32 %v325_v53, %v265_v62  ;;  %v328_v21 = vadd.f32 %v326_v10, %v266_v54 }
 0x143   :  { %1167 = vrot.lane.b32.xlu1 %v2368_v36, %s3968_s19  ;;  %v356_v63 = vmul.f32 %v3973_v6, %v349_v7  ;;  %v379_v22 = vsel %vm3854_vm9, %v2322_v23, %v2324_v24  ;;  %vm3860_vm8 = vcmask 113664   ;;  %s3974_s19 = smov 15   ;;  %v397_v13 = vsel %vm3853_vm10, 0.0, %v2330_v26 }
 0x144   :  { %v2837_v46 = vpop.permute.xlu0 %750  ;;  %v3975_v1 = vstv %s3971_s29  ;;  %v394_v62 = vsel %vm3853_vm10, %v2330_v26, %v2332_v27  ;;  %v342_v23 = vadd.f32 %v340_v20, %v282_v61  ;;  %v343_v24 = vadd.f32 %v341_v4, %v283_v37  ;;  %s2880_s29 = sld [smem:[#allocation4 + $0x31]] }
 0x145   :  { %v2845_v51 = vpop.permute.xlu1 %752  ;;  %v370_v7 = vmul.f32 %v3975_v1, %v367_v11  ;;  %v3976_v19 = vmov %v3975_v1  ;;  %v3977_v54 = vstv %s2544_s27  ;;  %v358_v6 = vadd.f32 %v356_v63, %v298_v17  ;;  %s3981_s27 = smov 14  }
 0x146   :  { %1179 = vrot.lane.b32.xlu0 %v2441_v56, %s3974_s19  ;;  %v371_v42 = vmul.f32 %v3976_v19, %v364_v43  ;;  %v385_v53 = vmul.f32 %v3977_v54, %v382_v47  ;;  %v357_v43 = vadd.f32 %v355_v55, %v297_v41  ;;  %v3978_v1 = vmov %v3977_v54 }
 0x147   :  { %1181 = vrot.lane.b32.xlu1 %v2448_v58, %s3974_s19  ;;  %v386_v19 = vmul.f32 %v3978_v1, %v379_v22  ;;  %v412_v26 = vsel %vm3855_vm11, 0.0, %v2338_v28  ;;  %vm3863_vm10 = vcmask 23552   ;;  %v3979_v61 = vstv %s2546_s26  ;;  %s2897_s26 = sld [smem:[#allocation4 + $0x32]]  ;;  %s2908_s19 = sld [smem:[#allocation4 + $0x33]] }
 0x148   :  { %v2869_v10 = vpop.permute.xlu0 %765  ;;  %v400_v37 = vmul.f32 %v3979_v61, %v397_v13  ;;  %v3980_v20 = vmov %v3979_v61  ;;  %v409_v41 = vsel %vm3855_vm11, %v2338_v28, %v2340_v29  ;;  %vm3862_vm9 = vcmask 15360  }
 0x149   :  { %v2878_v27 = vpop.permute.xlu1 %767  ;;  %v401_v4 = vmul.f32 %v3980_v20, %v394_v62  ;;  %v372_v55 = vadd.f32 %v370_v7, %v312_v18  ;;  %v373_v63 = vadd.f32 %v371_v42, %v313_v9  ;;  %v427_v47 = vsel %vm3861_vm4, 0.0, %v2346_v30 }
 0x14a   :  { %1193 = vrot.lane.b32.xlu0 %v2459_v12, %s3981_s27  ;;  %v387_v28 = vadd.f32 %v385_v53, %v327_v49  ;;  %v3982_v29 = vstv %s2550_s25  ;;  %v424_v62 = vsel %vm3861_vm4, %v2346_v30, %v2348_v31  ;;  %v442_v18 = vsel %vm3857_vm5, 0.0, %v2356_v33  ;;  %s3985_s25 = smov 13   ;;  %v3994_v31 = vld [vmem:[#allocation16_spill] sm:$0xff] }
 0x14b   :  { %1195 = vrot.lane.b32.xlu1 %v2466_v57, %s3981_s27  ;;  %v415_v13 = vmul.f32 %v3982_v29, %v412_v26  ;;  %vm3864_vm11 = vcmask 7168   ;;  %v388_v7 = vadd.f32 %v386_v19, %v328_v21  ;;  %v3983_v42 = vmov %v3982_v29  ;;  %s2924_s27 = sld [smem:[#allocation4 + $0x34]] }
 0x14c   :  { %v2906_v9 = vpop.permute.xlu0 %780  ;;  %v416_v54 = vmul.f32 %v3983_v42, %v409_v41  ;;  %v439_v49 = vsel %vm3857_vm5, %v2356_v33, %v2358_v34  ;;  %v402_v53 = vadd.f32 %v400_v37, %v342_v23  ;;  %v403_v1 = vadd.f32 %v401_v4, %v343_v24  ;;  %v3988_v41 = vld [vmem:[#allocation15_spill] sm:$0xff]  ;;  %v3990_v4 = vld [vmem:[#allocation34_spill] sm:$0xff] }
 0x14d   :  { %v2915_v30 = vpop.permute.xlu1 %782  ;;  %v3984_v26 = vstv %s2552_s24  ;;  %v457_v21 = vsel %vm3859_vm6, 0.0, %v2364_v35  ;;  %v3987_v19 = vstv %s2556_s23  ;;  %v454_v23 = vsel %vm3859_vm6, %v2364_v35, %v3988_v41  ;;  %v3989_v24 = vld [vmem:[#allocation19_spill] sm:$0xff]  ;;  %s2952_s23 = sld [smem:[#allocation4 + $0x35]]  ;;  %s2954_s24 = sld [smem:[#allocation4 + $0x36]] }
 0x14e   :  { %v430_v61 = vmul.f32 %v3984_v26, %v427_v47  ;;  %1207 = vrot.lane.b32.xlu0 %v2477_v59, %s3985_s25  ;;  %v3986_v33 = vmov %v3984_v26  ;;  %v445_v20 = vmul.f32 %v3987_v19, %v442_v18  ;;  %v487_v37 = vsel %vm3858_vm7, 0.0, %v3989_v24  ;;  %v3992_v26 = vld [vmem:[#allocation20_spill] sm:$0xff] }
 0x14f   :  { %v431_v34 = vmul.f32 %v3986_v33, %v424_v62  ;;  %vm3880_vm5 = vcmask 1031168   ;;  %1209 = vrot.lane.b32.xlu1 %v3990_v4, %s3985_s25  ;;  %v417_v47 = vadd.f32 %v415_v13, %v357_v43  ;;  %v3991_v29 = vmov %v3987_v19  ;;  %s3998_s25 = smov 3  }
 0x150   :  { %v446_v42 = vmul.f32 %v3991_v29, %v439_v49  ;;  %v484_v62 = vsel %vm3858_vm7, %v3989_v24, %v3992_v26  ;;  %v2942_v18 = vpop.permute.xlu0 %795  ;;  %v418_v35 = vadd.f32 %v416_v54, %v358_v6  ;;  %v3993_v19 = vstv %s2558_s22  ;;  %v3996_v29 = vld [vmem:[#allocation18_spill] sm:$0xff]  ;;  %s2977_s22 = sld [smem:[#allocation4 + $0x37]] }
 0x151   :  { %v460_v41 = vmul.f32 %v3993_v19, %v457_v21  ;;  %v472_v22 = vsel %vm3860_vm8, 0.0, %v3994_v31  ;;  %v2949_v60 = vpop.permute.xlu1 %797  ;;  %v432_v13 = vadd.f32 %v430_v61, %v372_v55  ;;  %v3995_v49 = vmov %v3993_v19  ;;  %v4000_v55 = vld [vmem:[#allocation17_spill] sm:$0xff] }
 0x152   :  { %v461_v24 = vmul.f32 %v3995_v49, %v454_v23  ;;  %v469_v6 = vsel %vm3860_vm8, %v3994_v31, %v3996_v29  ;;  %v3997_v54 = vstv %s2565_s21  ;;  %vm3867_vm7 = vcmask 1022976   ;;  %1221 = vrot.lane.b32.xlu0 %v2379_v38, %s3998_s25  ;;  %v4002_v31 = vld [vmem:[#allocation21_spill] sm:$0xff]  ;;  %s4006_s21 = sld [smem:[#allocation49_spill]] }
 0x153   :  { %v490_v21 = vmul.f32 %v3997_v54, %v487_v37  ;;  %v433_v26 = vadd.f32 %v431_v34, %v373_v63  ;;  %v447_v19 = vadd.f32 %v445_v20, %v387_v28  ;;  %v3999_v43 = vmov %v3997_v54  ;;  %1223 = vrot.lane.b32.xlu1 %v4000_v55, %s3998_s25  ;;  %v4007_v63 = vld [vmem:[#allocation24_spill] sm:$0xff]  ;;  %s4011_s25 = sld [smem:[#allocation51_spill]] }
 0x154   :  { %v491_v33 = vmul.f32 %v3999_v43, %v484_v62  ;;  %vm3868_vm6 = vcmask 941056   ;;  %v448_v23 = vadd.f32 %v446_v42, %v388_v7  ;;  %v4001_v49 = vstv %s2563_s12  ;;  %v2974_v29 = vpop.permute.xlu0 %810  ;;  %v4004_v62 = vld [vmem:[#allocation22_spill] sm:$0xff]  ;;  %v4005_v42 = vld [vmem:[#allocation23_spill] sm:$0xff]  ;;  %s4008_s12 = smov 2  }
 0x155   :  { %v475_v17 = vmul.f32 %v4001_v49, %v472_v22  ;;  %v502_v37 = vsel %vm3863_vm10, 0.0, %v4002_v31  ;;  %vm3873_vm8 = vcmask 932864   ;;  %v462_v28 = vadd.f32 %v460_v41, %v402_v53  ;;  %v2986_v43 = vpop.permute.xlu1 %812 }
 0x156   :  { %v4003_v34 = vmov %v4001_v49  ;;  %v499_v7 = vsel %vm3863_vm10, %v4002_v31, %v4004_v62  ;;  %v517_v22 = vsel %vm3862_vm9, 0.0, %v4005_v42  ;;  %vm3874_vm4 = vcmask 924672   ;;  %1235 = vrot.lane.b32.xlu0 %v2397_v45, %s4008_s12  ;;  %v4010_v62 = vld [vmem:[#allocation26_spill] sm:$0xff] }
 0x157   :  { %v476_v20 = vmul.f32 %v4003_v34, %v469_v6  ;;  %v463_v54 = vadd.f32 %v461_v24, %v403_v1  ;;  %v492_v49 = vadd.f32 %v490_v21, %v432_v13  ;;  %v514_v53 = vsel %vm3862_vm9, %v4005_v42, %v4007_v63  ;;  %v4012_v1 = vld [vmem:[#allocation28_spill] sm:$0xff]  ;;  %1237 = vrot.lane.b32.xlu1 %v2404_v48, %s4008_s12 }
 0x158   :  { %v493_v6 = vadd.f32 %v491_v33, %v433_v26  ;;  %v4009_v31 = vstv %s2569_s20  ;;  %v532_v61 = vsel %vm3864_vm11, 0.0, %v4010_v62  ;;  %v529_v13 = vsel %vm3864_vm11, %v4010_v62, %v4012_v1  ;;  %v4015_v42 = vld [vmem:[#allocation32_spill] sm:$0xff]  ;;  %v3010_v41 = vpop.permute.xlu0 %825  ;;  %s4023_s20 = smov 1  }
 0x159   :  { %v505_v34 = vmul.f32 %v4009_v31, %v502_v37  ;;  %vm3875_vm9 = vcmask 916480   ;;  %v477_v24 = vadd.f32 %v475_v17, %v417_v47  ;;  %v4013_v21 = vmov %v4009_v31  ;;  %v4016_v37 = vld [vmem:[#allocation30_spill] sm:$0xff]  ;;  %4017 = vst [vmem:[#allocation15_spill] sm:$0xff] %v3010_v41  ;;  %v3014_v1 = vpop.permute.xlu1 %827 }
 0x15a   :  { %v506_v63 = vmul.f32 %v4013_v21, %v499_v7  ;;  %v4014_v33 = vstv %s4006_s21  ;;  %v560_v31 = vsel %vm3865_vm3, %v4016_v37, %v4015_v42  ;;  %vm3882_vm10 = vcmask 908288   ;;  %v4022_v37 = vld [vmem:[#allocation33_spill] sm:$0xff]  ;;  %1249 = vrot.lane.b32.xlu0 %v2415_v50, %s4023_s20  ;;  %s4067_s21 = sld [smem:[#allocation60_spill]] }
 0x15b   :  { %v520_v26 = vmul.f32 %v4014_v33, %v517_v22  ;;  %v478_v11 = vadd.f32 %v476_v20, %v418_v35  ;;  %v4018_v15 = vmov %v4014_v33  ;;  %v4019_v17 = vstv %s4011_s25  ;;  %v4021_v33 = vld [vmem:[#allocation35_spill] sm:$0xff]  ;;  %1251 = vrot.lane.b32.xlu1 %v2422_v52, %s4023_s20  ;;  %s4069_s25 = smov 115   ;;  %s4146_s20 = smov 83  }
 0x15c   :  { %v521_v62 = vmul.f32 %v4018_v15, %v514_v53  ;;  %v535_v47 = vmul.f32 %v4019_v17, %v532_v61  ;;  %v4020_v7 = vmov %v4019_v17  ;;  %v563_v21 = vsel %vm3865_vm3, %v4015_v42, 0.0  ;;  %v4024_v15 = vld [vmem:[#allocation55_spill] sm:$0xff]  ;;  %v3041_v0 = vpop.permute.xlu0 %840 }
 0x15d   :  { %v536_v22 = vmul.f32 %v4020_v7, %v529_v13  ;;  %v575_v35 = vsel %vm3880_vm5, %v4022_v37, %v4021_v33  ;;  %vm3881_vm11 = vcmask 900096   ;;  %v4025_v20 = vcombine.high %v4024_v15, %v4024_v15 }
 0x15e   :  { %v507_v53 = vadd.f32 %v505_v34, %v447_v19  ;;  %v4026_v13 = vstv %s2578_s18  ;;  %v553_v7 = vadd.f32 %v4024_v15, %v492_v49  ;;  %v508_v42 = vadd.f32 %v506_v63, %v448_v23  ;;  %v4031_v15 = vld [vmem:[#allocation40_spill] sm:$0xff]  ;;  %s4033_s18 = smov 127  }
 0x15f   :  { %v3032_v61 = vadd.f32 %v4025_v20, %v493_v6  ;;  %v566_v17 = vmul.f32 %v4026_v13, %v560_v31  ;;  %v522_v39 = vadd.f32 %v520_v26, %v462_v28  ;;  %v578_v37 = vsel %vm3880_vm5, %v4021_v33, 0.0  ;;  %v4029_v31 = vld [vmem:[#allocation37_spill] sm:$0xff]  ;;  %v3053_v28 = vpop.permute.xlu1 %842  ;;  %1279 = vrot.lane.b32.xlu0 %v2441_v56, %s4033_s18  ;;  %1281 = vrot.lane.b32.xlu1 %v2448_v58, %s4033_s18  ;;  %s3430_s18 = sld [smem:[#allocation4 + $0x40]] }
 0x160   :  { %vm3883_vm3 = vcmask 891904   ;;  %v4027_v6 = vmov %v4026_v13  ;;  %v4028_v19 = vstv %s2583_s13  ;;  %v4030_v13 = vld [vmem:[#allocation36_spill] sm:$0xff]  ;;  %v593_v23 = vsel %vm3867_vm7, %v4029_v31, 0.0  ;;  %v4044_v56 = vld [vmem:[#allocation52_spill] sm:$0xff]  ;;  %s4046_s13 = sld [smem:[#allocation53_spill]] }
 0x161   :  { %v567_v20 = vmul.f32 %v4027_v6, %v563_v21  ;;  %v581_v34 = vmul.f32 %v4028_v19, %v575_v35  ;;  %v590_v49 = vsel %vm3867_vm7, %v4030_v13, %v4029_v31  ;;  %v523_v63 = vadd.f32 %v521_v62, %v463_v54  ;;  %v4035_v13 = vld [vmem:[#allocation44_spill] sm:$0xff] }
 0x162   :  { %v537_v26 = vadd.f32 %v535_v47, %v477_v24  ;;  %v538_v33 = vadd.f32 %v536_v22, %v478_v11  ;;  %v605_v21 = vsel %vm3868_vm6, %v4032_v5, %v4031_v15  ;;  %v568_v35 = vadd.f32 %v566_v17, %v507_v53  ;;  %v4039_v22 = vld [vmem:[#allocation48_spill] sm:$0xff]  ;;  %v4040_v53 = vld [vmem:[#allocation47_spill] sm:$0xff] }
 0x163   :  { %v4034_v6 = vmov %v4028_v19  ;;  %v608_v31 = vsel %vm3868_vm6, %v4031_v15, 0.0  ;;  %v620_v11 = vsel %vm3873_vm8, %v4036_v14, %v4035_v13  ;;  %vm3885_vm7 = vcmask 801792  }
 0x164   :  { %v582_v19 = vmul.f32 %v4034_v6, %v578_v37  ;;  %v4037_v5 = vstv %s2585_s17  ;;  %v623_v47 = vsel %vm3873_vm8, %v4035_v13, 0.0  ;;  %v635_v17 = vsel %vm3874_vm4, %v4040_v53, %v4039_v22  ;;  %v3078_v37 = vpop.permute.xlu0 %855  ;;  %v4045_v53 = vld [vmem:[#allocation50_spill] sm:$0xff]  ;;  %s4047_s17 = smov 126  }
 0x165   :  { %v596_v54 = vmul.f32 %v4037_v5, %v590_v49  ;;  %v4038_v24 = vmov %v4037_v5  ;;  %vm739_vm6 = vcmask 793600   ;;  %v569_v14 = vadd.f32 %v567_v20, %v508_v42  ;;  %1293 = vrot.lane.b32.xlu0 %v2459_v12, %s4047_s17  ;;  %1295 = vrot.lane.b32.xlu1 %v2466_v57, %s4047_s17  ;;  %v4058_v12 = vld [vmem:[#allocation59_spill] sm:$0xff]  ;;  %s3439_s17 = sld [smem:[#allocation4 + $0x41]] }
 0x166   :  { %v597_v62 = vmul.f32 %v4038_v24, %v593_v23  ;;  %v583_v15 = vadd.f32 %v581_v34, %v522_v39  ;;  %v4041_v6 = vstv %s2592_s16  ;;  %v638_v49 = vsel %vm3874_vm4, %v4039_v22, 0.0  ;;  %v3084_v23 = vpop.permute.xlu1 %857  ;;  %v4050_v22 = vld [vmem:[#allocation57_spill] sm:$0xff]  ;;  %s4052_s16 = sld [smem:[#allocation56_spill]] }
 0x167   :  { %v611_v44 = vmul.f32 %v4041_v6, %v605_v21  ;;  %v4042_v5 = vmov %v4041_v6  ;;  %v4043_v24 = vstv %s2594_s15  ;;  %v650_v41 = vsel %vm3875_vm9, %v4045_v53, %v4044_v56  ;;  %s4059_s15 = sld [smem:[#allocation58_spill]] }
 0x168   :  { %v612_v13 = vmul.f32 %v4042_v5, %v608_v31  ;;  %v626_v58 = vmul.f32 %v4043_v24, %v620_v11  ;;  %v653_v39 = vsel %vm3875_vm9, %v4044_v56, 0.0  ;;  %vm754_vm8 = vcmask 785408   ;;  %v4051_v11 = vld [vmem:[#allocation54_spill] sm:$0xff] }
 0x169   :  { %v584_v42 = vadd.f32 %v582_v19, %v523_v63  ;;  %v4048_v20 = vmov %v4043_v24  ;;  %v4049_v21 = vstv %s2601_s2  ;;  %v665_v6 = vsel %vm3882_vm10, %v4051_v11, %v4050_v22  ;;  %v3110_v19 = vpop.permute.xlu0 %870  ;;  %v4057_v11 = vld [vmem:[#allocation61_spill] sm:$0xff]  ;;  %s4061_s2 = smov 125  }
 0x16a   :  { %v627_v34 = vmul.f32 %v4048_v20, %v623_v47  ;;  %v641_v31 = vmul.f32 %v4049_v21, %v635_v17  ;;  %vm3886_vm4 = vcmask 777216   ;;  %vm904_vm9 = vcmask 629760   ;;  %4054 = vst [vmem:[#allocation19_spill] sm:$0xff] %v3110_v19  ;;  %1307 = vrot.lane.b32.xlu0 %v2477_v59, %s4061_s2  ;;  %v4064_v19 = vld [vmem:[#allocation62_spill] sm:$0xff]  ;;  %1309 = vrot.lane.b32.xlu1 %v3990_v4, %s4061_s2  ;;  %s4155_s2 = smov 80  }
 0x16b   :  { %v598_v56 = vadd.f32 %v596_v54, %v537_v26  ;;  %v599_v5 = vadd.f32 %v597_v62, %v538_v33  ;;  %v4053_v24 = vmov %v4049_v21  ;;  %v668_v63 = vsel %vm3882_vm10, %v4050_v22, 0.0  ;;  %v3121_v33 = vpop.permute.xlu1 %872 }
 0x16c   :  { %v642_v53 = vmul.f32 %v4053_v24, %v638_v49  ;;  %v4055_v47 = vstv %s4046_s13  ;;  %v680_v57 = vsel %vm3881_vm11, %v4058_v12, %v4057_v11  ;;  %v683_v26 = vsel %vm3881_vm11, %v4057_v11, 0.0  ;;  %s4149_s13 = smov 82  }
 0x16d   :  { %v656_v17 = vmul.f32 %v4055_v47, %v650_v41  ;;  %v4056_v20 = vmov %v4055_v47  ;;  %vm3887_vm5 = vcmask 769024   ;;  %v613_v54 = vadd.f32 %v611_v44, %v553_v7 }
 0x16e   :  { %v657_v21 = vmul.f32 %v4056_v20, %v653_v39  ;;  %v614_v62 = vadd.f32 %v612_v13, %v3032_v61  ;;  %v628_v49 = vadd.f32 %v626_v58, %v568_v35  ;;  %v4060_v22 = vstv %s4052_s16  ;;  %v4063_v20 = vld [vmem:[#allocation63_spill] sm:$0xff]  ;;  %1321 = vrot.lane.b32.xlu0 %v2379_v38, %s4069_s25  ;;  %1323 = vrot.lane.b32.xlu1 %v4000_v55, %s4069_s25  ;;  %s4152_s16 = smov 81   ;;  %s4158_s25 = smov 79  }
 0x16f   :  { %v671_v41 = vmul.f32 %v4060_v22, %v665_v6  ;;  %v629_v39 = vadd.f32 %v627_v34, %v569_v14  ;;  %v643_v24 = vadd.f32 %v641_v31, %v583_v15  ;;  %v4062_v47 = vmov %v4060_v22  ;;  %v3144_v15 = vpop.permute.xlu0 %885  ;;  %v3148_v6 = vpop.permute.xlu1 %887 }
 0x170   :  { %v672_v12 = vmul.f32 %v4062_v47, %v668_v63  ;;  %v695_v11 = vsel %vm3883_vm3, %v4064_v19, %v4063_v20  ;;  %vm799_vm11 = vcmask 760832   ;;  %v4065_v44 = vstv %s4059_s15  ;;  %s3448_s15 = sld [smem:[#allocation4 + $0x42]] }
 0x171   :  { %v686_v58 = vmul.f32 %v4065_v44, %v680_v57  ;;  %v4066_v61 = vmov %v4065_v44  ;;  %v698_v35 = vsel %vm3883_vm3, %v4063_v20, 0.0  ;;  %v710_v14 = vsel %vm3884_vm2, %v2715_v25, %v2729_v3 }
 0x172   :  { %v687_v7 = vmul.f32 %v4066_v61, %v683_v26  ;;  %vm814_vm10 = vcmask 678912   ;;  %v644_v13 = vadd.f32 %v642_v53, %v584_v42  ;;  %v658_v34 = vadd.f32 %v656_v17, %v598_v56 }
 0x173   :  { %v659_v31 = vadd.f32 %v657_v21, %v599_v5  ;;  %v713_v57 = vsel %vm3884_vm2, %v2729_v3, 0.0  ;;  %v673_v63 = vadd.f32 %v671_v41, %v613_v54  ;;  %v4068_v19 = vstv %s2629_s3  ;;  %v901_v41 = vpop.permute.xlu0 %900  ;;  %s4076_s3 = smov 114  }
 0x174   :  { %v701_v26 = vmul.f32 %v4068_v19, %v695_v11  ;;  %v725_v25 = vsel %vm3885_vm7, %v2766_v8, %v2772_v40  ;;  %v728_v42 = vsel %vm3885_vm7, %v2772_v40, 0.0  ;;  %vm844_vm3 = vcmask 662528   ;;  %1335 = vrot.lane.b32.xlu0 %v2397_v45, %s4076_s3  ;;  %1337 = vrot.lane.b32.xlu1 %v2404_v48, %s4076_s3  ;;  %s3466_s3 = sld [smem:[#allocation4 + $0x44]] }
 0x175   :  { %v674_v3 = vadd.f32 %v672_v12, %v614_v62  ;;  %v4070_v56 = vmov %v4068_v19  ;;  %v4071_v53 = vstv %s4067_s21  ;;  %v740_v21 = vsel %vm739_vm6, %v2796_v2, %v2806_v16  ;;  %s3457_s21 = sld [smem:[#allocation4 + $0x43]] }
 0x176   :  { %v702_v5 = vmul.f32 %v4070_v56, %v698_v35  ;;  %v716_v17 = vmul.f32 %v4071_v53, %v710_v14  ;;  %vm859_vm2 = vcmask 654336   ;;  %v688_v8 = vadd.f32 %v686_v58, %v628_v49 }
 0x177   :  { %v689_v40 = vadd.f32 %v687_v7, %v629_v39  ;;  %v4072_v54 = vmov %v4071_v53  ;;  %v743_v62 = vsel %vm739_vm6, %v2806_v16, 0.0  ;;  %v4073_v47 = vstv %s2661_s6  ;;  %v903_v39 = vpop.permute.xlu1 %902  ;;  %s4082_s6 = smov 113  }
 0x178   :  { %v717_v22 = vmul.f32 %v4072_v54, %v713_v57  ;;  %v731_v12 = vmul.f32 %v4073_v47, %v725_v25  ;;  %v4074_v20 = vmov %v4073_v47  ;;  %v755_v2 = vsel %vm754_vm8, %v2837_v46, %v2845_v51  ;;  %v918_v25 = vpop.permute.xlu0 %917  ;;  %1349 = vrot.lane.b32.xlu0 %v2415_v50, %s4082_s6  ;;  %1351 = vrot.lane.b32.xlu1 %v2422_v52, %s4082_s6  ;;  %s4161_s6 = smov 78  }
 0x179   :  { %v732_v11 = vmul.f32 %v4074_v20, %v728_v42  ;;  %v758_v49 = vsel %vm754_vm8, %v2845_v51, 0.0  ;;  %vm829_vm7 = vcmask 670720   ;;  %v703_v44 = vadd.f32 %v701_v26, %v643_v24 }
 0x17a   :  { %v4075_v58 = vstv %s2681_s30  ;;  %v770_v16 = vsel %vm3886_vm4, %v2869_v10, %v2878_v27  ;;  %v905_v7 = vsel %vm904_vm9, %v901_v41, %v903_v39  ;;  %v704_v35 = vadd.f32 %v702_v5, %v644_v13  ;;  %s4105_s30 = smov 110  }
 0x17b   :  { %v746_v61 = vmul.f32 %v4075_v58, %v740_v21  ;;  %v718_v46 = vadd.f32 %v716_v17, %v658_v34  ;;  %v4077_v14 = vmov %v4075_v58  ;;  %v773_v24 = vsel %vm3886_vm4, %v2878_v27, 0.0  ;;  %v920_v17 = vpop.permute.xlu1 %919 }
 0x17c   :  { %v747_v51 = vmul.f32 %v4077_v14, %v743_v62  ;;  %v4078_v57 = vstv %s2694_s14  ;;  %v785_v13 = vsel %vm3887_vm5, %v2906_v9, %v2915_v30  ;;  %v788_v34 = vsel %vm3887_vm5, %v2915_v30, 0.0  ;;  %s4088_s14 = smov 112  }
 0x17d   :  { %v761_v19 = vmul.f32 %v4078_v57, %v755_v2  ;;  %v4079_v10 = vmov %v4078_v57  ;;  %v719_v42 = vadd.f32 %v717_v22, %v659_v31  ;;  %v733_v56 = vadd.f32 %v731_v12, %v673_v63  ;;  %1363 = vrot.lane.b32.xlu0 %v2350_v32, %s4088_s14  ;;  %1365 = vrot.lane.b32.xlu1 %v2368_v36, %s4088_s14  ;;  %s1752_s14 = sld [smem:[#allocation4 + $0x45]] }
 0x17e   :  { %v762_v26 = vmul.f32 %v4079_v10, %v758_v49  ;;  %v734_v27 = vadd.f32 %v732_v11, %v674_v3  ;;  %v4080_v5 = vstv %s2718_s1  ;;  %v748_v21 = vadd.f32 %v746_v61, %v688_v8  ;;  %v934_v11 = vpop.permute.xlu0 %933  ;;  %s4114_s1 = smov 109  }
 0x17f   :  { %v776_v53 = vmul.f32 %v4080_v5, %v770_v16  ;;  %v4081_v54 = vmov %v4080_v5  ;;  %v800_v41 = vsel %vm799_vm11, %v2942_v18, %v2949_v60  ;;  %vm874_vm4 = vcmask 646144  }
 0x180   :  { %v777_v62 = vmul.f32 %v4081_v54, %v773_v24  ;;  %v3212_v9 = vsel %vm173_vm14, %v918_v25, %v920_v17  ;;  %v4083_v30 = vstv %s2731_s10  ;;  %v803_v8 = vsel %vm799_vm11, %v2949_v60, 0.0  ;;  %s3338_s10 = sld [smem:[#allocation4 + $0x38]] }
 0x181   :  { %v791_v31 = vmul.f32 %v4083_v30, %v785_v13  ;;  %v4084_v63 = vmov %v4083_v30  ;;  %v815_v18 = vsel %vm814_vm10, %v2974_v29, %v2986_v43  ;;  %v749_v22 = vadd.f32 %v747_v51, %v689_v40  ;;  %v936_v40 = vpop.permute.xlu1 %935 }
 0x182   :  { %v792_v3 = vmul.f32 %v4084_v63, %v788_v34  ;;  %v763_v47 = vadd.f32 %v761_v19, %v703_v44  ;;  %v764_v12 = vadd.f32 %v762_v26, %v704_v35  ;;  %v818_v20 = vsel %vm814_vm10, %v2986_v43, 0.0 }
 0x183   :  { %v3229_v2 = vadd.f32 %v776_v53, %v718_v46  ;;  %v4085_v49 = vstv %s2755_s28  ;;  %v845_v60 = vsel %vm844_vm3, %v3041_v0, %v3053_v28  ;;  %v848_v29 = vsel %vm844_vm3, %v3053_v28, 0.0  ;;  %s4095_s28 = smov 111  }
 0x184   :  { %v806_v58 = vmul.f32 %v4085_v49, %v800_v41  ;;  %v4086_v44 = vmov %v4085_v49  ;;  %v4087_v16 = vstv %s2775_s4  ;;  %v860_v35 = vsel %vm859_vm2, %v3078_v37, %v3084_v23  ;;  %v4090_v37 = vld [vmem:[#allocation15_spill] sm:$0xff]  ;;  %s4121_s4 = smov 99  }
 0x185   :  { %v807_v61 = vmul.f32 %v4086_v44, %v803_v8  ;;  %v821_v43 = vmul.f32 %v4087_v16, %v815_v18  ;;  %vm889_vm5 = vcmask 637952   ;;  %v3246_v46 = vsel %vm190_vm13, %v934_v11, %v936_v40  ;;  %v952_v54 = vpop.permute.xlu1 %951  ;;  %v4102_v40 = vld [vmem:[#allocation19_spill] sm:$0xff] }
 0x186   :  { %v3250_v0 = vadd.f32 %v777_v62, %v719_v42  ;;  %v793_v28 = vadd.f32 %v791_v31, %v733_v56  ;;  %v794_v14 = vadd.f32 %v792_v3, %v734_v27  ;;  %v4089_v51 = vmov %v4087_v16  ;;  %v950_v42 = vpop.permute.xlu0 %949 }
 0x187   :  { %v822_v24 = vmul.f32 %v4089_v51, %v818_v20  ;;  %v830_v57 = vsel %vm829_vm7, %v4090_v37, %v3014_v1  ;;  %v4091_v19 = vstv %s2799_s8  ;;  %v908_v34 = vsel %vm904_vm9, %v903_v39, 0.0  ;;  %v4096_v39 = vld [vmem:[#allocation25_spill] sm:$0xff]  ;;  %s4127_s8 = smov 98  }
 0x188   :  { %v851_v10 = vmul.f32 %v4091_v19, %v845_v60  ;;  %v4092_v26 = vmov %v4091_v19  ;;  %v808_v56 = vadd.f32 %v806_v58, %v748_v21  ;;  %v833_v27 = vsel %vm829_vm7, %v3014_v1, 0.0  ;;  %1377 = vrot.lane.b32.xlu0 %v4096_v39, %s4095_s28  ;;  %v4106_v37 = vld [vmem:[#allocation29_spill] sm:$0xff] }
 0x189   :  { %v852_v13 = vmul.f32 %v4092_v26, %v848_v29  ;;  %v863_v5 = vsel %vm859_vm2, %v3084_v23, 0.0  ;;  %v4093_v53 = vstv %s2820_s5  ;;  %v809_v62 = vadd.f32 %v807_v61, %v749_v22  ;;  %v4099_v22 = vld [vmem:[#allocation27_spill] sm:$0xff]  ;;  %v966_v16 = vpop.permute.xlu1 %965  ;;  %s3374_s5 = sld [smem:[#allocation4 + $0x3a]] }
 0x18a   :  { %v866_v17 = vmul.f32 %v4093_v53, %v860_v35  ;;  %v823_v41 = vadd.f32 %v821_v43, %v763_v47  ;;  %v4094_v30 = vstv %s2872_s11  ;;  %v3273_v63 = vsel %vm207_vm15, %v950_v42, %v952_v54  ;;  %1379 = vrot.lane.b32.xlu1 %v4099_v22, %s4095_s28  ;;  %s4134_s11 = smov 96   ;;  %s4164_s28 = smov 77  }
 0x18b   :  { %v911_v31 = vmul.f32 %v4094_v30, %v905_v7  ;;  %v824_v21 = vadd.f32 %v822_v24, %v764_v12  ;;  %v4097_v3 = vstv %s2782_s7  ;;  %v4098_v8 = vmov %v4094_v30  ;;  %v964_v12 = vpop.permute.xlu0 %963  ;;  %s3361_s7 = sld [smem:[#allocation4 + $0x39]] }
 0x18c   :  { %v836_v1 = vmul.f32 %v4097_v3, %v830_v57  ;;  %v912_v23 = vmul.f32 %v4098_v8, %v908_v34  ;;  %v924_v18 = vsel %vm173_vm14, 0.0, %v918_v25  ;;  %v4100_v47 = vmov %v4097_v3  ;;  %1391 = vrot.lane.b32.xlu0 %v4106_v37, %s4105_s30  ;;  %v4109_v34 = vld [vmem:[#allocation31_spill] sm:$0xff] }
 0x18d   :  { %v837_v7 = vmul.f32 %v4100_v47, %v833_v27  ;;  %v853_v20 = vadd.f32 %v851_v10, %v793_v28  ;;  %v854_v49 = vadd.f32 %v852_v13, %v794_v14  ;;  %v4101_v58 = vmov %v4093_v53  ;;  %v982_v3 = vpop.permute.xlu1 %981 }
 0x18e   :  { %v867_v60 = vmul.f32 %v4101_v58, %v863_v5  ;;  %v868_v29 = vadd.f32 %v866_v17, %v808_v56  ;;  %v875_v44 = vsel %vm874_vm4, %v4102_v40, %v3121_v33  ;;  %v878_v25 = vsel %vm874_vm4, %v3121_v33, 0.0  ;;  %1393 = vrot.lane.b32.xlu1 %v4109_v34, %s4105_s30  ;;  %s1753_s30 = sld [smem:[#allocation4 + $0x46]] }
 0x18f   :  { %v970_v61 = vsel %vm222_vm12, 0.0, %v964_v12  ;;  %v913_v43 = vadd.f32 %v911_v31, %v853_v20  ;;  %v4103_v35 = vstv %s2880_s29  ;;  %v4104_v14 = vstv %s2924_s27  ;;  %v980_v30 = vpop.permute.xlu0 %979  ;;  %s3394_s29 = sld [smem:[#allocation4 + $0x3c]]  ;;  %s4140_s27 = smov 94  }
 0x190   :  { %v927_v28 = vmul.f32 %v4103_v35, %v924_v18  ;;  %v973_v51 = vmul.f32 %v4104_v14, %v970_v61  ;;  %v967_v24 = vsel %vm222_vm12, %v964_v12, %v966_v16  ;;  %v914_v57 = vadd.f32 %v912_v23, %v854_v49  ;;  %1405 = vrot.lane.b32.xlu0 %v2477_v59, %s4114_s1 }
 0x191   :  { %v4107_v19 = vmov %v4103_v35  ;;  %v940_v33 = vsel %vm190_vm13, 0.0, %v934_v11  ;;  %v4108_v26 = vmov %v4104_v14  ;;  %v869_v56 = vadd.f32 %v867_v60, %v809_v62 }
 0x192   :  { %v928_v10 = vmul.f32 %v4107_v19, %v3212_v9  ;;  %v974_v13 = vmul.f32 %v4108_v26, %v967_v24  ;;  %v4110_v27 = vstv %s2826_s9  ;;  %v3313_v54 = vadd.f32 %v973_v51, %v913_v43  ;;  %1407 = vrot.lane.b32.xlu1 %v3990_v4, %s4114_s1  ;;  %v998_v51 = vpop.permute.xlu1 %997  ;;  %s4131_s9 = smov 97   ;;  %s1754_s1 = sld [smem:[#allocation4 + $0x47]] }
 0x193   :  { %v881_v5 = vmul.f32 %v4110_v27, %v875_v44  ;;  %v4111_v53 = vmov %v4110_v27  ;;  %v890_v9 = vsel %vm889_vm5, %v3144_v15, %v3148_v6  ;;  %v893_v11 = vsel %vm889_vm5, %v3148_v6, 0.0 }
 0x194   :  { %v882_v17 = vmul.f32 %v4111_v53, %v878_v25  ;;  %v3320_v31 = vadd.f32 %v974_v13, %v914_v57  ;;  %v986_v62 = vsel %vm239_vm0, 0.0, %v980_v30  ;;  %v929_v8 = vadd.f32 %v927_v28, %v868_v29  ;;  %1419 = vrot.lane.b32.xlu0 %v2379_v38, %s4121_s4 }
 0x195   :  { %v4112_v23 = vstv %s2897_s26  ;;  %v4113_v47 = vstv %s2952_s23  ;;  %v983_v49 = vsel %vm239_vm0, %v980_v30, %v982_v3  ;;  %v930_v15 = vadd.f32 %v928_v10, %v869_v56  ;;  %s4137_s26 = smov 95   ;;  %s3412_s23 = sld [smem:[#allocation4 + $0x3e]] }
 0x196   :  { %v943_v18 = vmul.f32 %v4112_v23, %v940_v33  ;;  %v989_v20 = vmul.f32 %v4113_v47, %v986_v62  ;;  %v4115_v6 = vmov %v4112_v23  ;;  %v956_v60 = vsel %vm207_vm15, 0.0, %v950_v42  ;;  %1421 = vrot.lane.b32.xlu1 %v4000_v55, %s4121_s4  ;;  %s1757_s4 = sld [smem:[#allocation4 + $0x4a]] }
 0x197   :  { %v944_v58 = vmul.f32 %v4115_v6, %v3246_v46  ;;  %v4116_v12 = vmov %v4113_v47  ;;  %v838_v40 = vadd.f32 %v836_v1, %v3229_v2  ;;  %v883_v44 = vadd.f32 %v881_v5, %v823_v41  ;;  %v996_v46 = vpop.permute.xlu0 %995 }
 0x198   :  { %v990_v29 = vmul.f32 %v4116_v12, %v983_v49  ;;  %v4117_v25 = vstv %s2848_s0  ;;  %v991_v16 = vadd.f32 %v989_v20, %v929_v8  ;;  %v884_v43 = vadd.f32 %v882_v17, %v824_v21  ;;  %1433 = vrot.lane.b32.xlu0 %v2397_v45, %s4127_s8  ;;  %s3383_s0 = sld [smem:[#allocation4 + $0x3b]] }
 0x199   :  { %v896_v61 = vmul.f32 %v4117_v25, %v890_v9  ;;  %v4118_v35 = vmov %v4117_v25  ;;  %v1002_v14 = vsel %vm256_vm1, 0.0, %v996_v46  ;;  %v945_v24 = vadd.f32 %v943_v18, %v883_v44 }
 0x19a   :  { %v897_v42 = vmul.f32 %v4118_v35, %v893_v11  ;;  %v992_v28 = vadd.f32 %v990_v29, %v930_v15  ;;  %v4119_v57 = vstv %s2908_s19  ;;  %v4120_v10 = vstv %s2954_s24  ;;  %1435 = vrot.lane.b32.xlu1 %v2404_v48, %s4127_s8  ;;  %s3403_s19 = sld [smem:[#allocation4 + $0x3d]]  ;;  %s4143_s24 = smov 93  }
 0x19b   :  { %v959_v19 = vmul.f32 %v4119_v57, %v956_v60  ;;  %v1005_v33 = vmul.f32 %v4120_v10, %v1002_v14  ;;  %v999_v2 = vsel %vm256_vm1, %v996_v46, %v998_v51  ;;  %v839_v41 = vadd.f32 %v837_v7, %v3250_v0  ;;  %v1012_v53 = vpop.permute.xlu0 %1011  ;;  %v1014_v7 = vpop.permute.xlu1 %1013  ;;  %s1758_s8 = sld [smem:[#allocation4 + $0x4b]] }
 0x19c   :  { %v946_v21 = vadd.f32 %v944_v58, %v884_v43  ;;  %v4122_v1 = vmov %v4119_v57  ;;  %v4123_v13 = vmov %v4120_v10  ;;  %v898_v27 = vadd.f32 %v896_v61, %v838_v40  ;;  %1447 = vrot.lane.b32.xlu0 %v2415_v50, %s4131_s9 }
 0x19d   :  { %v960_v26 = vmul.f32 %v4122_v1, %v3273_v63  ;;  %v1006_v56 = vmul.f32 %v4123_v13, %v999_v2  ;;  %v1007_v5 = vadd.f32 %v1005_v33, %v945_v24  ;;  %v899_v17 = vadd.f32 %v897_v42, %v839_v41 }
 0x19e   :  { %vm4124_vm12 = vcmask 367616   ;;  %v961_v9 = vadd.f32 %v959_v19, %v898_v27  ;;  %v4125_v11 = vstv %s2977_s22  ;;  %v1034_v18 = vstv %s3338_s10  ;;  %1449 = vrot.lane.b32.xlu1 %v2422_v52, %s4131_s9  ;;  %s3421_s22 = sld [smem:[#allocation4 + $0x3f]]  ;;  %s1755_s10 = sld [smem:[#allocation4 + $0x48]] }
 0x19f   :  { %v1008_v30 = vadd.f32 %v1006_v56, %v946_v21  ;;  %v1018_v0 = vsel %vm4124_vm12, 0.0, %v1012_v53  ;;  %vm4126_vm13 = vmmov %vm4124_vm12  ;;  %v962_v3 = vadd.f32 %v960_v26, %v899_v17  ;;  %v4128_v8 = vmov %v4125_v11  ;;  %v1026_v20 = vpop.permute.xlu0 %1025  ;;  %v1028_v6 = vpop.permute.xlu1 %1027  ;;  %s3498_s9 = sld [smem:[#allocation4 + $0x4d]] }
 0x1a0   :  { %v1021_v63 = vmul.f32 %v4125_v11, %v1018_v0  ;;  %v1015_v62 = vsel %vm4126_vm13, %v1012_v53, %v1014_v7  ;;  %vm4129_vm14 = vcmask 285696   ;;  %v1048_v29 = vstv %s3361_s7  ;;  %1461 = vrot.lane.b32.xlu0 %v2350_v32, %s4134_s11  ;;  %s1756_s7 = sld [smem:[#allocation4 + $0x49]] }
 0x1a1   :  { %v1022_v23 = vmul.f32 %v4128_v8, %v1015_v62  ;;  %v1032_v15 = vsel %vm4129_vm14, 0.0, %v1026_v20  ;;  %vm4130_vm15 = vmmov %vm4129_vm14  ;;  %vm4132_vm0 = vcmask 277504   ;;  %v1062_v14 = vstv %s3374_s5  ;;  %s1759_s5 = sld [smem:[#allocation4 + $0x4c]] }
 0x1a2   :  { %v1023_v47 = vadd.f32 %v1021_v63, %v961_v9  ;;  %v1035_v58 = vmul.f32 %v1034_v18, %v1032_v15  ;;  %v1029_v60 = vsel %vm4130_vm15, %v1026_v20, %v1028_v6  ;;  %vm4133_vm1 = vmmov %vm4132_vm0  ;;  %1463 = vrot.lane.b32.xlu1 %v2368_v36, %s4134_s11  ;;  %vm4135_vm12 = vcmask 269312   ;;  %s1762_s11 = sld [smem:[#allocation4 + $0x4f]] }
 0x1a3   :  { %v1024_v49 = vadd.f32 %v1022_v23, %v962_v3  ;;  %v1036_v12 = vmul.f32 %v1034_v18, %v1029_v60  ;;  %v1040_v44 = vpop.permute.xlu0 %1039  ;;  %v1042_v46 = vpop.permute.xlu1 %1041  ;;  %vm4136_vm13 = vmmov %vm4135_vm12  ;;  %v1076_v2 = vstv %s3383_s0  ;;  %vm4138_vm14 = vcmask 261120   ;;  %s1761_s0 = sld [smem:[#allocation4 + $0x4e]] }
 0x1a4   :  { %v1037_v40 = vadd.f32 %v1035_v58, %v3313_v54  ;;  %v1046_v61 = vsel %vm4132_vm0, 0.0, %v1040_v44  ;;  %v1043_v35 = vsel %vm4133_vm1, %v1040_v44, %v1042_v46  ;;  %1475 = vrot.lane.b32.xlu0 %v4096_v39, %s4137_s26  ;;  %vm4139_vm15 = vmmov %vm4138_vm14  ;;  %v1090_v27 = vstv %s3394_s29  ;;  %s3546_s29 = sld [smem:[#allocation4 + $0x50]] }
 0x1a5   :  { %v1038_v25 = vadd.f32 %v1036_v12, %v3320_v31  ;;  %v1049_v43 = vmul.f32 %v1048_v29, %v1046_v61  ;;  %v1050_v42 = vmul.f32 %v1048_v29, %v1043_v35  ;;  %vm4141_vm0 = vcmask 252928  }
 0x1a6   :  { %1477 = vrot.lane.b32.xlu1 %v4099_v22, %s4137_s26  ;;  %vm4142_vm1 = vmmov %vm4141_vm0  ;;  %v1104_v63 = vstv %s3403_s19  ;;  %v1118_v15 = vstv %s3412_s23  ;;  %s3548_s26 = sld [smem:[#allocation4 + $0x51]]  ;;  %s3550_s19 = sld [smem:[#allocation4 + $0x52]] }
 0x1a7   :  { %v1051_v54 = vadd.f32 %v1049_v43, %v991_v16  ;;  %v1054_v51 = vpop.permute.xlu0 %1053  ;;  %v1052_v31 = vadd.f32 %v1050_v42, %v992_v28  ;;  %v1056_v57 = vpop.permute.xlu1 %1055  ;;  %s3554_s23 = sld [smem:[#allocation4 + $0x54]] }
 0x1a8   :  { %v1060_v24 = vsel %vm4135_vm12, 0.0, %v1054_v51  ;;  %v1057_v10 = vsel %vm4136_vm13, %v1054_v51, %v1056_v57  ;;  %1489 = vrot.lane.b32.xlu0 %v4106_v37, %s4140_s27  ;;  %vm4144_vm12 = vcmask 244736  }
 0x1a9   :  { %v1063_v19 = vmul.f32 %v1062_v14, %v1060_v24  ;;  %v1064_v33 = vmul.f32 %v1062_v14, %v1057_v10  ;;  %vm4145_vm13 = vmmov %vm4144_vm12 }
 0x1aa   :  { %1491 = vrot.lane.b32.xlu1 %v4109_v34, %s4140_s27  ;;  %s3552_s27 = sld [smem:[#allocation4 + $0x53]] }
 0x1ab   :  { %v1065_v16 = vadd.f32 %v1063_v19, %v1007_v5  ;;  %v1068_v41 = vpop.permute.xlu0 %1067  ;;  %v1066_v28 = vadd.f32 %v1064_v33, %v1008_v30  ;;  %v1070_v1 = vpop.permute.xlu1 %1069 }
 0x1ac   :  { %v1074_v21 = vsel %vm4138_vm14, 0.0, %v1068_v41  ;;  %v1071_v13 = vsel %vm4139_vm15, %v1068_v41, %v1070_v1  ;;  %1503 = vrot.lane.b32.xlu0 %v2477_v59, %s4143_s24  ;;  %vm4147_vm14 = vcmask 236544  }
 0x1ad   :  { %v1077_v26 = vmul.f32 %v1076_v2, %v1074_v21  ;;  %v1078_v56 = vmul.f32 %v1076_v2, %v1071_v13  ;;  %vm4148_vm15 = vmmov %vm4147_vm14 }
 0x1ae   :  { %1505 = vrot.lane.b32.xlu1 %v3990_v4, %s4143_s24  ;;  %s3558_s24 = sld [smem:[#allocation4 + $0x55]] }
 0x1af   :  { %v1079_v5 = vadd.f32 %v1077_v26, %v1023_v47  ;;  %v1082_v53 = vpop.permute.xlu0 %1081  ;;  %v1080_v17 = vadd.f32 %v1078_v56, %v1024_v49  ;;  %v1084_v0 = vpop.permute.xlu1 %1083 }
 0x1b0   :  { %v1088_v30 = vsel %vm4141_vm0, 0.0, %v1082_v53  ;;  %v1085_v9 = vsel %vm4142_vm1, %v1082_v53, %v1084_v0  ;;  %1517 = vrot.lane.b32.xlu0 %v2379_v38, %s4146_s20  ;;  %vm4150_vm0 = vcmask 154624  }
 0x1b1   :  { %v1091_v7 = vmul.f32 %v1090_v27, %v1088_v30  ;;  %v1092_v11 = vmul.f32 %v1090_v27, %v1085_v9  ;;  %vm4151_vm1 = vmmov %vm4150_vm0 }
 0x1b2   :  { %1519 = vrot.lane.b32.xlu1 %v4000_v55, %s4146_s20  ;;  %v1132_v55 = vstv %s3421_s22  ;;  %s3560_s22 = sld [smem:[#allocation4 + $0x56]]  ;;  %s3564_s20 = sld [smem:[#allocation4 + $0x57]] }
 0x1b3   :  { %v1093_v62 = vadd.f32 %v1091_v7, %v1037_v40  ;;  %v1096_v3 = vpop.permute.xlu0 %1095  ;;  %v1094_v8 = vadd.f32 %v1092_v11, %v1038_v25  ;;  %v1098_v18 = vpop.permute.xlu1 %1097 }
 0x1b4   :  { %v1102_v23 = vsel %vm4144_vm12, 0.0, %v1096_v3  ;;  %v1099_v20 = vsel %vm4145_vm13, %v1096_v3, %v1098_v18  ;;  %1531 = vrot.lane.b32.xlu0 %v2397_v45, %s4149_s13  ;;  %vm4153_vm12 = vcmask 146432  }
 0x1b5   :  { %v1105_v47 = vmul.f32 %v1104_v63, %v1102_v23  ;;  %v1106_v49 = vmul.f32 %v1104_v63, %v1099_v20  ;;  %vm4154_vm13 = vmmov %vm4153_vm12 }
 0x1b6   :  { %1533 = vrot.lane.b32.xlu1 %v2404_v48, %s4149_s13  ;;  %v1146_v48 = vstv %s3430_s18  ;;  %s3566_s18 = sld [smem:[#allocation4 + $0x58]]  ;;  %s3568_s13 = sld [smem:[#allocation4 + $0x59]] }
 0x1b7   :  { %v1107_v6 = vadd.f32 %v1105_v47, %v1051_v54  ;;  %v1110_v58 = vpop.permute.xlu0 %1109  ;;  %v1108_v60 = vadd.f32 %v1106_v49, %v1052_v31  ;;  %v1112_v29 = vpop.permute.xlu1 %1111 }
 0x1b8   :  { %v1116_v12 = vsel %vm4147_vm14, 0.0, %v1110_v58  ;;  %v1113_v44 = vsel %vm4148_vm15, %v1110_v58, %v1112_v29  ;;  %1545 = vrot.lane.b32.xlu0 %v2415_v50, %s4152_s16  ;;  %vm4156_vm14 = vcmask 138240  }
 0x1b9   :  { %v1119_v40 = vmul.f32 %v1118_v15, %v1116_v12  ;;  %v1120_v38 = vmul.f32 %v1118_v15, %v1113_v44  ;;  %vm4157_vm15 = vmmov %vm4156_vm14 }
 0x1ba   :  { %1547 = vrot.lane.b32.xlu1 %v2422_v52, %s4152_s16  ;;  %v1160_v52 = vstv %s3439_s17  ;;  %s3570_s17 = sld [smem:[#allocation4 + $0x5a]]  ;;  %s3574_s16 = sld [smem:[#allocation4 + $0x5b]] }
 0x1bb   :  { %v1121_v25 = vadd.f32 %v1119_v40, %v1065_v16  ;;  %v1124_v61 = vpop.permute.xlu0 %1123  ;;  %v1122_v46 = vadd.f32 %v1120_v38, %v1066_v28  ;;  %v1126_v35 = vpop.permute.xlu1 %1125  ;;  %v1230_v38 = vstv %s1753_s30 }
 0x1bc   :  { %v1130_v43 = vsel %vm4150_vm0, 0.0, %v1124_v61  ;;  %v1127_v14 = vsel %vm4151_vm1, %v1124_v61, %v1126_v35  ;;  %1559 = vrot.lane.b32.xlu0 %v2350_v32, %s4155_s2  ;;  %vm4159_vm0 = vcmask 130048  }
 0x1bd   :  { %v1133_v42 = vmul.f32 %v1132_v55, %v1130_v43  ;;  %v1134_v45 = vmul.f32 %v1132_v55, %v1127_v14  ;;  %vm4160_vm1 = vmmov %vm4159_vm0 }
 0x1be   :  { %1561 = vrot.lane.b32.xlu1 %v2368_v36, %s4155_s2  ;;  %v1174_v36 = vstv %s3448_s15  ;;  %s3576_s15 = sld [smem:[#allocation4 + $0x5c]]  ;;  %s3580_s2 = sld [smem:[#allocation4 + $0x5d]] }
 0x1bf   :  { %v1135_v54 = vadd.f32 %v1133_v42, %v1079_v5  ;;  %v1138_v51 = vpop.permute.xlu0 %1137  ;;  %v1136_v31 = vadd.f32 %v1134_v45, %v1080_v17  ;;  %v1140_v57 = vpop.permute.xlu1 %1139  ;;  %v1244_v45 = vstv %s1754_s1 }
 0x1c0   :  { %v1144_v24 = vsel %vm4153_vm12, 0.0, %v1138_v51  ;;  %v1141_v10 = vsel %vm4154_vm13, %v1138_v51, %v1140_v57  ;;  %1573 = vrot.lane.b32.xlu0 %v4096_v39, %s4158_s25  ;;  %vm4162_vm12 = vcmask 121856  }
 0x1c1   :  { %v1147_v19 = vmul.f32 %v1146_v48, %v1144_v24  ;;  %v1148_v50 = vmul.f32 %v1146_v48, %v1141_v10  ;;  %vm4163_vm13 = vmmov %vm4162_vm12 }
 0x1c2   :  { %1575 = vrot.lane.b32.xlu1 %v4099_v22, %s4158_s25  ;;  %v1188_v22 = vstv %s3457_s21  ;;  %s3582_s21 = sld [smem:[#allocation4 + $0x5e]]  ;;  %s3584_s25 = sld [smem:[#allocation4 + $0x5f]] }
 0x1c3   :  { %v1149_v33 = vadd.f32 %v1147_v19, %v1093_v62  ;;  %v1152_v2 = vpop.permute.xlu0 %1151  ;;  %v1150_v16 = vadd.f32 %v1148_v50, %v1094_v8  ;;  %v1154_v28 = vpop.permute.xlu1 %1153  ;;  %v1258_v50 = vstv %s1755_s10 }
 0x1c4   :  { %v1158_v41 = vsel %vm4156_vm14, 0.0, %v1152_v2  ;;  %v1155_v1 = vsel %vm4157_vm15, %v1152_v2, %v1154_v28  ;;  %1587 = vrot.lane.b32.xlu0 %v4106_v37, %s4161_s6  ;;  %v1202_v37 = vstv %s3466_s3  ;;  %vm4165_vm14 = vcmask 113664   ;;  %s3586_s3 = sld [smem:[#allocation4 + $0x60]] }
 0x1c5   :  { %v1161_v21 = vmul.f32 %v1160_v52, %v1158_v41  ;;  %v1162_v32 = vmul.f32 %v1160_v52, %v1155_v1  ;;  %vm4166_vm15 = vmmov %vm4165_vm14 }
 0x1c6   :  { %1589 = vrot.lane.b32.xlu1 %v4109_v34, %s4161_s6  ;;  %s3670_s6 = sld [smem:[#allocation4 + $0x61]] }
 0x1c7   :  { %v1163_v26 = vadd.f32 %v1161_v21, %v1107_v6  ;;  %v1166_v13 = vpop.permute.xlu0 %1165  ;;  %v1164_v56 = vadd.f32 %v1162_v32, %v1108_v60  ;;  %v1168_v5 = vpop.permute.xlu1 %1167  ;;  %v1216_v6 = vstv %s1752_s14  ;;  %s1968_s14 = smov [#allocation9]  }
 0x1c8   :  { %v1172_v27 = vsel %vm4159_vm0, 0.0, %v1166_v13  ;;  %v1169_v17 = vsel %vm4160_vm1, %v1166_v13, %v1168_v5  ;;  %1601 = vrot.lane.b32.xlu0 %v2477_v59, %s4164_s28  ;;  %vm4167_vm0 = vcmask 105472   ;;  %v1264_v13 = vstv %s1756_s7 }
 0x1c9   :  { %v1175_v53 = vmul.f32 %v1174_v36, %v1172_v27  ;;  %v1176_v39 = vmul.f32 %v1174_v36, %v1169_v17  ;;  %vm4168_vm1 = vmmov %vm4167_vm0  ;;  %v1288_v36 = vstv %s1757_s4 }
 0x1ca   :  { %1603 = vrot.lane.b32.xlu1 %v3990_v4, %s4164_s28  ;;  %s1671_s28 = sshll.u32 %s1968_s14, 4  ;;  %s1672_s28 = int_to_ptr.vmem [resolvable:$true] %s1671_s28 }
 0x1cb   :  { %v1177_v30 = vadd.f32 %v1175_v53, %v1121_v25  ;;  %v1180_v0 = vpop.permute.xlu0 %1179  ;;  %v1178_v7 = vadd.f32 %v1176_v39, %v1122_v46  ;;  %v1182_v11 = vpop.permute.xlu1 %1181  ;;  %s1883_s30 = scalar_lea.vmem %s1672_s28, 64  ;;  %p1888_p12 = scmp.lt.s32.totalorder %s1672_s28, %s1672_s28 }
 0x1cc   :  { %v1186_v9 = vsel %vm4162_vm12, 0.0, %v1180_v0  ;;  %v1183_v62 = vsel %vm4163_vm13, %v1180_v0, %v1182_v11  ;;  %vm4169_vm12 = vcmask 23552   ;;  %v1302_v0 = vstv %s1758_s8  ;;  %p1884_p11 = scmp.ne.s32.totalorder %s1672_s28, %s1883_s30  ;;  %p1889_p13 = scmp.lt.s32.totalorder %s1883_s30, %s1883_s30 }
 0x1cd   :  { %v1189_v63 = vmul.f32 %v1188_v22, %v1186_v9  ;;  %v1190_v3 = vmul.f32 %v1188_v22, %v1183_v62  ;;  %vm4170_vm13 = vmmov %vm4169_vm12  ;;  %v1849_v22 = vld [vmem:[#allocation3] sm:$0xf] }
 0x1ce   :  { %p1890_p0 = por %p1889_p13, %p1888_p12 }
 0x1cf   :  { %v1191_v34 = vadd.f32 %v1189_v63, %v1135_v54  ;;  %v1194_v8 = vpop.permute.xlu0 %1193  ;;  %v1192_v23 = vadd.f32 %v1190_v3, %v1136_v31  ;;  %v1196_v47 = vpop.permute.xlu1 %1195 }
 0x1d0   :  { %v1200_v18 = vsel %vm4165_vm14, 0.0, %v1194_v8  ;;  %v1197_v49 = vsel %vm4166_vm15, %v1194_v8, %v1196_v47  ;;  %vm4171_vm14 = vcmask 15360   ;;  %v4179_v8 = vld [vmem:[#allocation14_spill] sm:$0xff]  ;;  %p1891_p1 = pnand %p1890_p0, %p1884_p11 }
 0x1d1   :  { %v1203_v20 = vmul.f32 %v1202_v37, %v1200_v18  ;;  %v1204_v15 = vmul.f32 %v1202_v37, %v1197_v49  ;;  %vm4172_vm15 = vmmov %vm4171_vm14  ;;  %v1316_v18 = vstv %s1759_s5 }
 0x1d3   :  { %v1205_v58 = vadd.f32 %v1203_v20, %v1149_v33  ;;  %v1208_v59 = vpop.permute.xlu0 %1207  ;;  %v1206_v60 = vadd.f32 %v1204_v15, %v1150_v16  ;;  %v1210_v4 = vpop.permute.xlu1 %1209 }
 0x1d4   :  { %v1214_v12 = vsel %vm4167_vm0, 0.0, %v1208_v59  ;;  %v1211_v40 = vsel %vm4168_vm1, %v1208_v59, %v1210_v4  ;;  %vm4173_vm0 = vcmask 7168   ;;  %v1330_v4 = vstv %s3498_s9 }
 0x1d5   :  { %v1217_v29 = vmul.f32 %v1216_v6, %v1214_v12  ;;  %v1218_v44 = vmul.f32 %v1216_v6, %v1211_v40  ;;  %vm4174_vm1 = vmmov %vm4173_vm0 }
 0x1d7   :  { %v3486_v55 = vadd.f32 %v1217_v29, %v1163_v26  ;;  %v1222_v25 = vpop.permute.xlu0 %1221  ;;  %v3488_v61 = vadd.f32 %v1218_v44, %v1164_v56  ;;  %v1224_v43 = vpop.permute.xlu1 %1223 }
 0x1d8   :  { %v1228_v46 = vsel %vm4169_vm12, 0.0, %v1222_v25  ;;  %v1225_v42 = vsel %vm4170_vm13, %v1222_v25, %v1224_v43  ;;  %vm4175_vm12 = vcmask 1039360  }
 0x1d9   :  { %v1231_v35 = vmul.f32 %v1230_v38, %v1228_v46  ;;  %v1232_v14 = vmul.f32 %v1230_v38, %v1225_v42  ;;  %vm4176_vm13 = vmmov %vm4175_vm12 }
 0x1db   :  { %v1233_v48 = vadd.f32 %v1231_v35, %v1177_v30  ;;  %v1236_v54 = vpop.permute.xlu0 %1235  ;;  %v1234_v51 = vadd.f32 %v1232_v14, %v1178_v7  ;;  %v1238_v24 = vpop.permute.xlu1 %1237  ;;  %v1265_v30 = vmul.f32 %v1849_v22, %v1264_v13 }
 0x1dc   :  { %v1242_v31 = vsel %vm4171_vm14, 0.0, %v1236_v54  ;;  %v1239_v19 = vsel %vm4172_vm15, %v1236_v54, %v1238_v24  ;;  %vm4177_vm14 = vcmask 1031168  }
 0x1dd   :  { %v1245_v57 = vmul.f32 %v1244_v45, %v1242_v31  ;;  %v1246_v10 = vmul.f32 %v1244_v45, %v1239_v19  ;;  %vm4178_vm15 = vmmov %vm4177_vm14  ;;  %v1344_v45 = vstv %s1761_s0 }
 0x1df   :  { %v1247_v52 = vadd.f32 %v1245_v57, %v1191_v34  ;;  %v1250_v33 = vpop.permute.xlu0 %1249  ;;  %v1248_v2 = vadd.f32 %v1246_v10, %v1192_v23  ;;  %v1252_v41 = vpop.permute.xlu1 %1251  ;;  %v1273_v23 = vrot.slane %v1265_v30, %v4179_v8 }
 0x1e0   :  { %v1256_v16 = vsel %vm4173_vm0, 0.0, %v1250_v33  ;;  %v1253_v21 = vsel %vm4174_vm1, %v1250_v33, %v1252_v41  ;;  %vm4180_vm0 = vcmask 1022976  }
 0x1e1   :  { %v1259_v28 = vmul.f32 %v1258_v50, %v1256_v16  ;;  %v1260_v1 = vmul.f32 %v1258_v50, %v1253_v21  ;;  %vm4181_vm1 = vmmov %vm4180_vm0  ;;  %v1274_v12 = vcombine.high %v1273_v23, %v1273_v23  ;;  %v1277_v42 = vadd.f32 %v1273_v23, %v3486_v55 }
 0x1e2   :  { %v1358_v50 = vstv %s1762_s11  ;;  %v1386_v23 = vstv %s3548_s26 }
 0x1e3   :  { %v1261_v32 = vadd.f32 %v1259_v28, %v1205_v58  ;;  %v1280_v26 = vpop.permute.xlu0 %1279  ;;  %v1262_v56 = vadd.f32 %v1260_v1, %v1206_v60  ;;  %v1282_v27 = vpop.permute.xlu1 %1281  ;;  %v1278_v43 = vadd.f32 %v1274_v12, %v3488_v61 }
 0x1e4   :  { %v1286_v5 = vsel %vm4175_vm12, %v1282_v27, 0.0  ;;  %v1283_v53 = vsel %vm4176_vm13, %v1280_v26, %v1282_v27  ;;  %vm4182_vm12 = vcmask 941056  }
 0x1e5   :  { %v1290_v17 = vmul.f32 %v1288_v36, %v1286_v5  ;;  %v1289_v39 = vmul.f32 %v1288_v36, %v1283_v53  ;;  %vm4183_vm13 = vmmov %vm4182_vm12 }
 0x1e7   :  { %v1294_v7 = vpop.permute.xlu0 %1293  ;;  %v1292_v9 = vadd.f32 %v1290_v17, %v1234_v51  ;;  %v1291_v11 = vadd.f32 %v1289_v39, %v1233_v48  ;;  %v1296_v63 = vpop.permute.xlu1 %1295 }
 0x1e8   :  { %v1300_v62 = vsel %vm4177_vm14, %v1296_v63, 0.0  ;;  %v1297_v3 = vsel %vm4178_vm15, %v1294_v7, %v1296_v63  ;;  %vm4184_vm14 = vcmask 932864  }
 0x1e9   :  { %v1304_v37 = vmul.f32 %v1302_v0, %v1300_v62  ;;  %v1303_v34 = vmul.f32 %v1302_v0, %v1297_v3  ;;  %vm4185_vm15 = vmmov %vm4184_vm14 }
 0x1eb   :  { %v1308_v47 = vpop.permute.xlu0 %1307  ;;  %v1306_v20 = vadd.f32 %v1304_v37, %v1248_v2  ;;  %v1305_v49 = vadd.f32 %v1303_v34, %v1247_v52  ;;  %v1310_v15 = vpop.permute.xlu1 %1309  ;;  %v1372_v34 = vstv %s3546_s29 }
 0x1ec   :  { %v1314_v6 = vsel %vm4180_vm0, %v1310_v15, 0.0  ;;  %v1311_v58 = vsel %vm4181_vm1, %v1308_v47, %v1310_v15  ;;  %vm4186_vm0 = vcmask 924672   ;;  %v1414_v47 = vstv %s3552_s27 }
 0x1ed   :  { %v1318_v59 = vmul.f32 %v1316_v18, %v1314_v6  ;;  %v1317_v60 = vmul.f32 %v1316_v18, %v1311_v58  ;;  %vm4187_vm1 = vmmov %vm4186_vm0  ;;  %v1400_v18 = vstv %s3550_s19  ;;  %v1442_v58 = vstv %s3558_s24 }
 0x1ef   :  { %v1322_v29 = vpop.permute.xlu0 %1321  ;;  %v3506_v40 = vadd.f32 %v1318_v59, %v1262_v56  ;;  %v3508_v44 = vadd.f32 %v1317_v60, %v1261_v32  ;;  %v1324_v38 = vpop.permute.xlu1 %1323  ;;  %v1456_v59 = vstv %s3560_s22 }
 0x1f0   :  { %v1328_v25 = vsel %vm4182_vm12, %v1324_v38, 0.0  ;;  %v1325_v46 = vsel %vm4183_vm13, %v1322_v29, %v1324_v38  ;;  %vm4188_vm12 = vcmask 916480   ;;  %v1484_v29 = vstv %s3566_s18 }
 0x1f1   :  { %v1332_v35 = vmul.f32 %v1330_v4, %v1328_v25  ;;  %v1331_v14 = vmul.f32 %v1330_v4, %v1325_v46  ;;  %vm4189_vm13 = vmmov %vm4188_vm12  ;;  %v1470_v4 = vstv %s3564_s20  ;;  %v1498_v38 = vstv %s3568_s13 }
 0x1f2   :  { %v1512_v25 = vstv %s3570_s17  ;;  %v1526_v46 = vstv %s3574_s16 }
 0x1f3   :  { %v1336_v48 = vpop.permute.xlu0 %1335  ;;  %v3514_v54 = vadd.f32 %v1332_v35, %v1278_v43  ;;  %v3516_v51 = vadd.f32 %v1331_v14, %v1277_v42  ;;  %v1338_v31 = vpop.permute.xlu1 %1337  ;;  %v1540_v35 = vstv %s3576_s15 }
 0x1f4   :  { %v1342_v24 = vsel %vm4184_vm14, %v1338_v31, 0.0  ;;  %v1339_v57 = vsel %vm4185_vm15, %v1336_v48, %v1338_v31  ;;  %vm4190_vm14 = vcmask 908288  }
 0x1f5   :  { %v1346_v19 = vmul.f32 %v1344_v45, %v1342_v24  ;;  %v1345_v10 = vmul.f32 %v1344_v45, %v1339_v57  ;;  %vm4191_vm15 = vmmov %vm4190_vm14 }
 0x1f7   :  { %v1350_v52 = vpop.permute.xlu0 %1349  ;;  %v3520_v61 = vadd.f32 %v1346_v19, %v1292_v9  ;;  %v3522_v33 = vadd.f32 %v1345_v10, %v1291_v11  ;;  %v1352_v55 = vpop.permute.xlu1 %1351 }
 0x1f8   :  { %v1356_v2 = vsel %vm4186_vm0, %v1352_v55, 0.0  ;;  %v1353_v16 = vsel %vm4187_vm1, %v1350_v52, %v1352_v55  ;;  %vm4192_vm0 = vcmask 900096   ;;  %v1568_v52 = vstv %s3582_s21 }
 0x1f9   :  { %v1360_v41 = vmul.f32 %v1358_v50, %v1356_v2  ;;  %v1359_v28 = vmul.f32 %v1358_v50, %v1353_v16  ;;  %vm4193_vm1 = vmmov %vm4192_vm0  ;;  %v1554_v50 = vstv %s3580_s2  ;;  %v1582_v55 = vstv %s3584_s25 }
 0x1fa   :  { %v1596_v2 = vstv %s3586_s3 }
 0x1fb   :  { %v1364_v21 = vpop.permute.xlu0 %1363  ;;  %v3526_v1 = vadd.f32 %v1360_v41, %v1306_v20  ;;  %v3528_v32 = vadd.f32 %v1359_v28, %v1305_v49  ;;  %v1366_v36 = vpop.permute.xlu1 %1365  ;;  %v1428_v20 = vstv %s3554_s23 }
 0x1fc   :  { %v1370_v15 = vsel %vm4188_vm12, %v1366_v36, 0.0  ;;  %v1367_v6 = vsel %vm4189_vm13, %v1364_v21, %v1366_v36  ;;  %vm4194_vm12 = vcmask 891904  }
 0x1fd   :  { %v1374_v42 = vmul.f32 %v1372_v34, %v1370_v15  ;;  %v1373_v14 = vmul.f32 %v1372_v34, %v1367_v6  ;;  %vm4195_vm13 = vmmov %vm4194_vm12 }
 0x1ff   :  { %v1378_v26 = vpop.permute.xlu0 %1377  ;;  %v1380_v13 = vpop.permute.xlu1 %1379  ;;  %v1375_v34 = vadd.f32 %v1373_v14, %v3508_v44 }
 0x200   :  { %v1384_v60 = vsel %vm4190_vm14, %v1380_v13, 0.0  ;;  %v1381_v12 = vsel %vm4191_vm15, %v1378_v26, %v1380_v13  ;;  %vm4196_vm14 = vcmask 809984  }
 0x201   :  { %v1388_v24 = vmul.f32 %v1386_v23, %v1384_v60  ;;  %v1387_v57 = vmul.f32 %v1386_v23, %v1381_v12  ;;  %vm4197_vm15 = vmmov %vm4196_vm14 }
 0x203   :  { %v1392_v56 = vpop.permute.xlu0 %1391  ;;  %v1394_v27 = vpop.permute.xlu1 %1393  ;;  %v1390_v23 = vadd.f32 %v1388_v24, %v3514_v54 }
 0x204   :  { %v1398_v45 = vsel %vm4192_vm0, %v1394_v27, 0.0  ;;  %v1395_v48 = vsel %vm4193_vm1, %v1392_v56, %v1394_v27  ;;  %vm4198_vm0 = vcmask 801792  }
 0x205   :  { %v1402_v16 = vmul.f32 %v1400_v18, %v1398_v45  ;;  %v1401_v41 = vmul.f32 %v1400_v18, %v1395_v48  ;;  %vm4199_vm1 = vmmov %vm4198_vm0 }
 0x207   :  { %v1406_v5 = vpop.permute.xlu0 %1405  ;;  %v1408_v53 = vpop.permute.xlu1 %1407 }
 0x208   :  { %v1412_v19 = vsel %vm4194_vm12, %v1408_v53, 0.0  ;;  %v1409_v10 = vsel %vm4195_vm13, %v1406_v5, %v1408_v53  ;;  %v1376_v53 = vadd.f32 %v1374_v42, %v3506_v40 }
 0x209   :  { %v1416_v26 = vmul.f32 %v1414_v47, %v1412_v19  ;;  %v1415_v13 = vmul.f32 %v1414_v47, %v1409_v10 }
 0x20b   :  { %v3530_v17 = vpop.permute.xlu0 %1419  ;;  %v3532_v39 = vpop.permute.xlu1 %1421  ;;  %v1417_v60 = vadd.f32 %v1415_v13, %v3528_v32 }
 0x20c   :  { %v1426_v28 = vsel %vm4196_vm14, %v3532_v39, 0.0  ;;  %v1423_v21 = vsel %vm4197_vm15, %v3530_v17, %v3532_v39  ;;  %v1389_v17 = vadd.f32 %v1387_v57, %v3516_v51  ;;  %v1404_v51 = vadd.f32 %v1402_v16, %v3520_v61 }
 0x20d   :  { %v1430_v39 = vmul.f32 %v1428_v20, %v1426_v28  ;;  %v1429_v18 = vmul.f32 %v1428_v20, %v1423_v21  ;;  %v1418_v20 = vadd.f32 %v1416_v26, %v3526_v1 }
 0x20f   :  { %v3534_v22 = vpop.permute.xlu0 %1433  ;;  %v3536_v30 = vpop.permute.xlu1 %1435  ;;  %v1432_v14 = vadd.f32 %v1430_v39, %v1376_v53  ;;  %v1431_v1 = vadd.f32 %v1429_v18, %v1375_v34 }
 0x210   :  { %v1440_v56 = vsel %vm4198_vm0, %v3536_v30, 0.0  ;;  %v1437_v27 = vsel %vm4199_vm1, %v3534_v22, %v3536_v30  ;;  %v1403_v30 = vadd.f32 %v1401_v41, %v3522_v33 }
 0x211   :  { %v1444_v6 = vmul.f32 %v1442_v58, %v1440_v56  ;;  %v1443_v22 = vmul.f32 %v1442_v58, %v1437_v27 }
 0x213   :  { %v3538_v0 = vpop.permute.xlu0 %1447  ;;  %v3540_v7 = vpop.permute.xlu1 %1449  ;;  %v1446_v45 = vadd.f32 %v1444_v6, %v1390_v23  ;;  %v1445_v32 = vadd.f32 %v1443_v22, %v1389_v17 }
 0x214   :  { %v1454_v47 = vsel %vm739_vm6, %v3540_v7, 0.0  ;;  %v1451_v15 = vsel %vm739_vm6, %v3538_v0, %v3540_v7  ;;  %vm4200_vm6 = vcmask 777216  }
 0x215   :  { %v1458_v0 = vmul.f32 %v1456_v59, %v1454_v47  ;;  %v1457_v7 = vmul.f32 %v1456_v59, %v1451_v15 }
 0x217   :  { %v3542_v9 = vpop.permute.xlu0 %1461  ;;  %v3544_v11 = vpop.permute.xlu1 %1463  ;;  %v1460_v10 = vadd.f32 %v1458_v0, %v1404_v51  ;;  %v1459_v16 = vadd.f32 %v1457_v7, %v1403_v30 }
 0x218   :  { %v1468_v40 = vsel %vm754_vm8, %v3544_v11, 0.0  ;;  %v1465_v44 = vsel %vm754_vm8, %v3542_v9, %v3544_v11  ;;  %vm4201_vm8 = vmmov %vm4200_vm6 }
 0x219   :  { %v1472_v9 = vmul.f32 %v1470_v4, %v1468_v40  ;;  %v1471_v11 = vmul.f32 %v1470_v4, %v1465_v44 }
 0x21b   :  { %v3556_v63 = vpop.permute.xlu0 %1475  ;;  %v3562_v62 = vpop.permute.xlu1 %1477  ;;  %v1474_v41 = vadd.f32 %v1472_v9, %v1418_v20  ;;  %v1473_v28 = vadd.f32 %v1471_v11, %v1417_v60 }
 0x21c   :  { %v1482_v48 = vsel %vm4200_vm6, %v3562_v62, 0.0 }
 0x21d   :  { %v1486_v21 = vmul.f32 %v1484_v29, %v1482_v48 }
 0x21f   :  { %v3572_v3 = vpop.permute.xlu0 %1489  ;;  %v3578_v37 = vpop.permute.xlu1 %1491  ;;  %v1488_v7 = vadd.f32 %v1486_v21, %v1432_v14 }
 0x223   :  { %v3589_v8 = vpop.permute.xlu0 %1503  ;;  %v1506_v49 = vpop.permute.xlu1 %1505 }
 0x224   :  { %v1510_v58 = vsel %vm799_vm11, %v1506_v49, 0.0  ;;  %v1507_v42 = vsel %vm799_vm11, %v3589_v8, %v1506_v49  ;;  %v1479_v8 = vsel %vm4201_vm8, %v3556_v63, %v3562_v62 }
 0x225   :  { %v1514_v49 = vmul.f32 %v1512_v25, %v1510_v58  ;;  %v1513_v4 = vmul.f32 %v1512_v25, %v1507_v42  ;;  %v1485_v63 = vmul.f32 %v1484_v29, %v1479_v8  ;;  %v1610_v42 = vstv %s3670_s6 }
 0x227   :  { %v1518_v43 = vpop.permute.xlu0 %1517  ;;  %v1520_v31 = vpop.permute.xlu1 %1519  ;;  %v1516_v26 = vadd.f32 %v1514_v49, %v1460_v10  ;;  %v1515_v13 = vadd.f32 %v1513_v4, %v1459_v16  ;;  %v1487_v58 = vadd.f32 %v1485_v63, %v1431_v1 }
 0x228   :  { %v1524_v61 = vsel %vm814_vm10, %v1520_v31, 0.0  ;;  %v1521_v33 = vsel %vm814_vm10, %v1518_v43, %v1520_v31  ;;  %vm4202_vm10 = vcmask 769024  }
 0x229   :  { %v1528_v57 = vmul.f32 %v1526_v46, %v1524_v61  ;;  %v1527_v43 = vmul.f32 %v1526_v46, %v1521_v33  ;;  %v1496_v62 = vsel %vm4202_vm10, %v3578_v37, 0.0  ;;  %vm4203_vm11 = vmmov %vm4202_vm10 }
 0x22a   :  { %v1493_v25 = vsel %vm4203_vm11, %v3572_v3, %v3578_v37 }
 0x22b   :  { %v3620_v36 = vpop.permute.xlu0 %1531  ;;  %v1534_v5 = vpop.permute.xlu1 %1533  ;;  %v1530_v53 = vadd.f32 %v1528_v57, %v1474_v41  ;;  %v1529_v34 = vadd.f32 %v1527_v43, %v1473_v28  ;;  %v1499_v47 = vmul.f32 %v1498_v38, %v1493_v25  ;;  %v1967_v25 = vmov 1966171168  }
 0x22c   :  { %v1538_v3 = vsel %vm829_vm7, %v1534_v5, 0.0  ;;  %v1535_v37 = vsel %vm829_vm7, %v3620_v36, %v1534_v5 }
 0x22d   :  { %v1541_v30 = vmul.f32 %v1540_v35, %v1535_v37  ;;  %v1501_v61 = vadd.f32 %v1499_v47, %v1445_v32 }
 0x22f   :  { %v1546_v54 = vpop.permute.xlu0 %1545  ;;  %v1548_v12 = vpop.permute.xlu1 %1547  ;;  %v1543_v8 = vadd.f32 %v1541_v30, %v1487_v58 }
 0x230   :  { %v1552_v15 = vsel %vm844_vm3, %v1548_v12, 0.0  ;;  %v1549_v6 = vsel %vm844_vm3, %v1546_v54, %v1548_v12 }
 0x231   :  { %v1556_v60 = vmul.f32 %v1554_v50, %v1552_v15  ;;  %v1555_v54 = vmul.f32 %v1554_v50, %v1549_v6 }
 0x233   :  { %v1560_v59 = vpop.permute.xlu0 %1559  ;;  %v1562_v24 = vpop.permute.xlu1 %1561 }
 0x234   :  { %v1566_v31 = vsel %vm859_vm2, %v1562_v24, 0.0  ;;  %v1563_v19 = vsel %vm859_vm2, %v1560_v59, %v1562_v24  ;;  %v1557_v24 = vadd.f32 %v1555_v54, %v1501_v61 }
 0x235   :  { %v1570_v56 = vmul.f32 %v1568_v52, %v1566_v31  ;;  %v1569_v29 = vmul.f32 %v1568_v52, %v1563_v19  ;;  %v1500_v52 = vmul.f32 %v1498_v38, %v1496_v62 }
 0x237   :  { %v1574_v46 = vpop.permute.xlu0 %1573  ;;  %v1576_v27 = vpop.permute.xlu1 %1575  ;;  %v1572_v40 = vadd.f32 %v1570_v56, %v1516_v26  ;;  %v1571_v44 = vadd.f32 %v1569_v29, %v1515_v13  ;;  %v1502_v11 = vadd.f32 %v1500_v52, %v1446_v45  ;;  %v4204_v56 = vld [vmem:[#allocation13_spill] sm:$0xff] }
 0x238   :  { %v1580_v23 = vsel %vm874_vm4, %v1576_v27, 0.0  ;;  %v1577_v17 = vsel %vm874_vm4, %v1574_v46, %v1576_v27  ;;  %v1637_v46 = vunpack.c.l.s4 %v1967_v25 }
 0x239   :  { %v1584_v39 = vmul.f32 %v1582_v55, %v1580_v23  ;;  %v1583_v18 = vmul.f32 %v1582_v55, %v1577_v17  ;;  %v1542_v55 = vmul.f32 %v1540_v35, %v1538_v3  ;;  %v1558_v50 = vadd.f32 %v1556_v60, %v1502_v11 }
 0x23a   :  { %v1638_v26 = vunpack.c.0.s8 %v1637_v46  ;;  %v4205_v23 = vlaneseq }
 0x23b   :  { %v1588_v22 = vpop.permute.xlu0 %1587  ;;  %v1586_v51 = vadd.f32 %v1584_v39, %v1530_v53  ;;  %v1585_v36 = vadd.f32 %v1583_v18, %v1529_v34  ;;  %v1590_v5 = vpop.permute.xlu1 %1589  ;;  %v1544_v48 = vadd.f32 %v1542_v55, %v1488_v7 }
 0x23c   :  { %v1594_v20 = vsel %vm889_vm5, %v1590_v5, 0.0  ;;  %v1591_v38 = vsel %vm889_vm5, %v1588_v22, %v1590_v5  ;;  %v1641_v29 = vsub.s32 %v1638_v26, %v4204_v56  ;;  %vm1662_vm2 = vcmp.lt.s32.totalorder %v4205_v23, 256 }
 0x23d   :  { %v1618_v12 = vadd.f32 %v1586_v51, %v1572_v40  ;;  %v1617_v0 = vadd.f32 %v1585_v36, %v1571_v44  ;;  %v1598_v33 = vmul.f32 %v1596_v2, %v1594_v20  ;;  %v1597_v35 = vmul.f32 %v1596_v2, %v1591_v38 }
 0x23f   :  { %v1602_v9 = vpop.permute.xlu0 %1601  ;;  %v1604_v59 = vpop.permute.xlu1 %1603  ;;  %v1600_v1 = vadd.f32 %v1598_v33, %v1544_v48  ;;  %v1599_v43 = vadd.f32 %v1597_v35, %v1543_v8 }
 0x240   :  { %v1608_v49 = vsel %vm904_vm9, %v1604_v59, 0.0  ;;  %v1605_v4 = vsel %vm904_vm9, %v1602_v9, %v1604_v59 }
 0x241   :  { %v1612_v57 = vmul.f32 %v1610_v42, %v1608_v49  ;;  %v1611_v14 = vmul.f32 %v1610_v42, %v1605_v4 }
 0x243   :  { %v1614_v31 = vadd.f32 %v1612_v57, %v1558_v50  ;;  %v1613_v45 = vadd.f32 %v1611_v14, %v1557_v24 }
 0x245   :  { %v1616_v32 = vadd.f32 %v1614_v31, %v1600_v1  ;;  %v1615_v19 = vadd.f32 %v1613_v45, %v1599_v43 }
 0x247   :  { %v1620_v10 = vadd.f32 %v1618_v12, %v1616_v32  ;;  %v1619_v16 = vadd.f32 %v1617_v0, %v1615_v19 }
 0x249   :  { %v1782_v2 = vmul.f32 -1.442695, %v1620_v10  ;;  %v1781_v41 = vmul.f32 -1.442695, %v1619_v16 }
 0x24b   :  { %1841 = vpow2.f32 %v1782_v2 }
 0x24c   :  { %1843 = vpow2.f32 %v1781_v41 }
 0x255   :  { %v1842_v28 = vpop.eup %1841 }
 0x256   :  { %v1844_v21 = vpop.eup %1843  ;;  %v1628_v63 = vadd.f32 1.0, %v1842_v28 }
 0x257   :  { %v1627_v62 = vadd.f32 1.0, %v1844_v21 }
 0x258   :  { %1845 = vrcp.f32 %v1628_v63 }
 0x259   :  { %1847 = vrcp.f32 %v1627_v62 }
 0x262   :  { %v1846_v13 = vpop.eup %1845 }
 0x263   :  { %v1848_v27 = vpop.eup %1847 }
 0x264   :  { %v1635_v53 = vcombine.low %v1848_v27, %v1846_v13 }
 0x266   :  { %v1642_v34 = vrot.slane %v1635_v53, %v1641_v29 }
 0x268   :  { %v1643_v17 = vcombine.high %v1642_v34, %v1642_v34  ;;  %v1650_v3 = vrot.slane %v1642_v34, %v1641_v29 }
 0x26a   :  { %v1657_v37 = vrot.slane %v1643_v17, %v1641_v29  ;;  %1664 = vst.msk [vmem:[#allocation9] sm:$0x3] %vm1662_vm2, %v1650_v3 }
 0x26c   :  { %1665 = vst.msk [vmem:[#allocation9 + $0x2] sm:$0x3] %vm1662_vm2, %v1657_v37 }
 0x26d   :  { %1894 = shalt.err (!%p1891_p1)
}
 0x26e   :  { %s4206_s4 = sld [smem:[#allocation64_spill]] }
 0x274   :  { %s1895_s7 = scalar_lea.hbm %s4206_s4, 64 }
 0x275   :  { %p1896_p2 = scmp.ne.s32.totalorder %s4206_s4, %s1895_s7  ;;  %p1899_p3 = scmp.lt.u32.totalorder %s1895_s7, %s4206_s4 }
 0x277   :  { %p1901_p4 = pnand %p1899_p3, %p1896_p2 }
 0x279   :  { %1904 = shalt.err (!%p1901_p4)
}
 0x27a   :  { %s4207_s11 = smov 32  }
 0x27b   :  { %1677 = dma.vmem_to_hbm [thread:$0]  %s1672_s28, 64, %s4206_s4, [#allocation6], %s4207_s11, %s4207_s11, %s4008_s12  }
 0x27c   :  { %1909 = dma.done.wait [#allocation6], 64  }
 0x27d   :  { %1910 = vsyncadd [#allocation6], 4294967232 }
 0x27e   :  { %1681 = vsyncpa [#allocation5], 1 }
 0x27f   :  { %1682 = vsyncpa [#allocation6], 1 }
 0x280   :  { %1683 = vsyncpa [#allocation7], 1 }

</bundles_post_ra>
